<compile_context>
chip_gen: v6e
topology: v6e:2x2x1
jax: 0.10.0
libtpu: 0.0.40
codegen_flags: <defaults>
</compile_context>

<pallas_src>
import functools

import jax
import jax.numpy as jnp
from jax.experimental import pallas as pl
from jax.experimental.pallas import tpu as pltpu


_COMPILER_PARAMS = pltpu.CompilerParams(
    dimension_semantics=("parallel",),        # batch axis -> both TCs on v7x
    vmem_limit_bytes=32 * 1024 * 1024,
)


# -----------------------------------------------------------------------------
# In-kernel helpers
# -----------------------------------------------------------------------------
def _elu(v):
    return jnp.where(v > 0, v, jnp.exp(jnp.minimum(v, 0.0)) - 1.0)


def _leaky_relu(v):
    return jnp.where(v > 0, v, 0.01 * v)


def _conv3x3(x, w_ref, H, W):
    """3x3 'same' conv on a lane-dense (Cin, H*W) tile -> (Cout, H*W) f32.

    The im2col patch is built one kernel row (dy) at a time -- three shifted
    lane slices of a zero-extended row with edge-column masks -- and the
    output is accumulated over three K = 3*Cin MXU matmuls (bf16 inputs,
    f32 accumulation).  Tap order (dy, dx, cin) matches _flatten_conv_w.
    """
    x = x.astype(jnp.bfloat16)
    C, S = x.shape
    kc = 3 * C
    w = w_ref[...]                                            # (Cout, 9*Cin) bf16
    col = jax.lax.broadcasted_iota(jnp.int32, (1, S), 1) % W
    not_left = col != 0
    not_right = col != (W - 1)
    zpad = jnp.zeros((C, W + 1), x.dtype)
    xz = jnp.concatenate([zpad, x, zpad], axis=1)             # (C, S + 2W + 2)
    acc = None
    for r, oy in enumerate((-1, 0, 1)):
        taps = []
        for ox in (-1, 0, 1):
            start = (W + 1) + oy * W + ox
            win = xz[:, start:start + S]                      # (C, S)
            if ox == -1:
                win = jnp.where(not_left, win, jnp.zeros_like(win))
            elif ox == 1:
                win = jnp.where(not_right, win, jnp.zeros_like(win))
            taps.append(win)
        patch = jnp.concatenate(taps, axis=0)                 # (3*Cin, S) bf16
        part = jnp.dot(w[:, r * kc:(r + 1) * kc], patch,
                       preferred_element_type=jnp.float32)
        acc = part if acc is None else acc + part
    return acc


def _double_conv(x, w1, s1, b1, w2, s2, b2, H, W):
    """UNet conv block: (Conv3x3 -> ELU -> BN) x 2, fully in VMEM (f32)."""
    a1 = _conv3x3(x, w1, H, W)
    a1 = _elu(a1) * s1[...] + b1[...]
    a2 = _conv3x3(a1, w2, H, W)
    return _elu(a2) * s2[...] + b2[...]


# -----------------------------------------------------------------------------
# Kernels (one fused UNet stage per pallas_call, one batch element per step)
# -----------------------------------------------------------------------------
def _down_first_kernel(x_ref, wh, bh, w1, s1, b1, w2, s2, b2, skip_ref, *, H, W):
    # head: Conv3x3 (BN scale pre-folded into wh) + shift + LeakyReLU,
    # fused with the first UNet conv block.
    h0 = _leaky_relu(_conv3x3(x_ref[0], wh, H, W) + bh[...])
    skip_ref[0] = _double_conv(h0, w1, s1, b1, w2, s2, b2, H, W).astype(
        skip_ref.dtype)


def _down_mid_kernel(x_ref, w1, s1, b1, w2, s2, b2, skip_ref, *, H, W):
    skip_ref[0] = _double_conv(x_ref[0], w1, s1, b1, w2, s2, b2, H, W).astype(
        skip_ref.dtype)


def _down_bottom_kernel(x_ref, w1, s1, b1, w2, s2, b2, wup, z_ref, *, H, W):
    h = _double_conv(x_ref[0], w1, s1, b1, w2, s2, b2, H, W)
    # Fused ConvTranspose2d(k=2, s=2) matmul (phase-major output); the spatial
    # interleave is a pure permutation done in XLA between pallas_calls.
    z_ref[0] = jnp.dot(wup[...], h.astype(jnp.bfloat16),
                       preferred_element_type=jnp.float32).astype(z_ref.dtype)


def _up_body(up_ref, skip_ref, w1a, w1b, s1, b1, w2, s2, b2, H, W):
    # Fused skip concat: conv1 = w1a @ im2col(up) + w1b @ im2col(skip).
    a1 = _conv3x3(up_ref[0], w1a, H, W) + _conv3x3(skip_ref[0], w1b, H, W)
    a1 = _elu(a1) * s1[...] + b1[...]
    a2 = _conv3x3(a1, w2, H, W)
    return _elu(a2) * s2[...] + b2[...]


def _up_mid_kernel(up_ref, skip_ref, w1a, w1b, s1, b1, w2, s2, b2, wup,
                   z_ref, *, H, W):
    h = _up_body(up_ref, skip_ref, w1a, w1b, s1, b1, w2, s2, b2, H, W)
    z_ref[0] = jnp.dot(wup[...], h.astype(jnp.bfloat16),
                       preferred_element_type=jnp.float32).astype(z_ref.dtype)


def _up_last_kernel(up_ref, skip_ref, w1a, w1b, s1, b1, w2, s2, b2, wl, bl,
                    o_ref, *, H, W):
    h = _up_body(up_ref, skip_ref, w1a, w1b, s1, b1, w2, s2, b2, H, W)
    # Fused final 1x1 conv + bias.
    o = jnp.dot(wl[...], h.astype(jnp.bfloat16),
                preferred_element_type=jnp.float32) + bl[...]
    o_ref[0] = o.astype(o_ref.dtype)


# -----------------------------------------------------------------------------
# pallas_call wrapper + XLA-level layout glue (pool / interleave)
# -----------------------------------------------------------------------------
def _stage_call(kernel, batch_ins, const_ins, out_channels, out_spatial,
                out_dtype):
    """One pallas_call over the batch grid; per-sample lane-dense (C, S) blocks."""
    N = batch_ins[0].shape[0]
    in_specs = ([pl.BlockSpec((1, a.shape[1], a.shape[2]), lambda n: (n, 0, 0))
                 for a in batch_ins] +
                [pl.BlockSpec(a.shape, lambda n: (0, 0)) for a in const_ins])
    return pl.pallas_call(
        kernel,
        out_shape=jax.ShapeDtypeStruct((N, out_channels, out_spatial), out_dtype),
        grid=(N,),
        in_specs=in_specs,
        out_specs=pl.BlockSpec((1, out_channels, out_spatial),
                               lambda n: (n, 0, 0)),
        compiler_params=_COMPILER_PARAMS,
    )(*batch_ins, *const_ins)


def _maxpool2x2(x, H, W):
    """(N, C, H*W) -> (N, C, (H/2)*(W/2)) 2x2 max-pool (XLA, bf16, O(C*S))."""
    # TODO(synk): fold into the producing kernel via strided VMEM loads once
    # spatial tiling lands; in XLA it costs one extra bf16 full-res HBM read
    # per down level, but no MXU work and no O(S^2) constants.
    N, C, _ = x.shape
    y = x.reshape(N, C, H // 2, 2, W // 2, 2)
    return jnp.max(y, axis=(3, 5)).reshape(N, C, (H // 2) * (W // 2))


def _interleave2x2(z, h_low, w_low):
    """Phase-major transposed-conv output (N, 4*C, S_low) -> (N, C, 4*S_low).

    Row group k = 2*dy + dx of z holds output phase (dy, dx); the interleave
    is a pure layout permutation done in XLA (no MXU work, scales linearly).
    """
    N, c4, _ = z.shape
    c = c4 // 4
    zz = z.reshape(N, 2, 2, c, h_low, w_low)
    up = jnp.transpose(zz, (0, 3, 4, 1, 5, 2))          # (N, C, Hl, 2, Wl, 2)
    return up.reshape(N, c, 4 * h_low * w_low)


# -----------------------------------------------------------------------------
# Parameters: PyTorch layouts + explicit conversion to kernel layouts
# -----------------------------------------------------------------------------
def init_params(key, in_views, out_depths, depth, wf):
    """Synthetic parameters in PyTorch tensor layouts.
       Conv2d weight          : (Cout, Cin, kH, kW)
       ConvTranspose2d weight : (Cin, Cout, kH, kW)
       BatchNorm (eval mode)  : folded to per-channel (scale, shift)."""
    kit = iter(jax.random.split(key, 256))

    def conv_w(cout, cin, kh, kw):
        fan_in = cin * kh * kw
        return jax.random.normal(next(kit), (cout, cin, kh, kw),
                                 jnp.float32) * (fan_in ** -0.5)

    def bn(c):
        gamma = 1.0 + 0.1 * jax.random.normal(next(kit), (c,), jnp.float32)
        beta = 0.1 * jax.random.normal(next(kit), (c,), jnp.float32)
        mean = 0.1 * jax.random.normal(next(kit), (c,), jnp.float32)
        var = 1.0 + 0.1 * jax.random.uniform(next(kit), (c,), jnp.float32)
        scale = gamma * jax.lax.rsqrt(var + 1e-5)
        shift = beta - mean * scale
        return scale, shift

    def conv_block(cin, cout):
        s1, b1 = bn(cout)
        s2, b2 = bn(cout)
        return {"w1": conv_w(cout, cin, 3, 3), "scale1": s1, "shift1": b1,
                "w2": conv_w(cout, cout, 3, 3), "scale2": s2, "shift2": b2}

    params = {}
    s, b = bn(out_depths)
    params["head"] = {"w": conv_w(out_depths, in_views, 3, 3),
                      "scale": s, "shift": b}

    prev = out_depths
    params["down"] = []
    for i in range(depth):
        c = 2 ** (wf + i)
        params["down"].append(conv_block(prev, c))
        prev = c

    params["up"] = []
    for i in reversed(range(depth - 1)):
        c = 2 ** (wf + i)
        w_up = jax.random.normal(next(kit), (prev, c, 2, 2),
                                 jnp.float32) * ((prev * 4) ** -0.5)
        # first-conv input channels ordered [upsampled, skip]
        params["up"].append({"w_up": w_up, "block": conv_block(2 * c, c)})
        prev = c

    # final 1x1 conv (Conv2d default bias=True in the standard UNet tail)
    params["last"] = {
        "w": conv_w(out_depths, prev, 1, 1),
        "b": 0.01 * jax.random.normal(next(kit), (out_depths,), jnp.float32)}
    return params


def _flatten_conv_w(w):
    """torch Conv2d weight (Cout, Cin, kH, kW) -> (Cout, kH*kW*Cin),
    tap-major / channel-minor, matching the im2col patch row order."""
    cout, cin, kh, kw = w.shape
    return jnp.transpose(w, (0, 2, 3, 1)).reshape(cout, kh * kw * cin)


def prepare_params(params):
    """Fold BN, flatten/permute to kernel layouts, pre-cast weights to bf16.
    Call ONCE outside jit; the returned pytree is what xlfmnet_forward takes."""
    def col(v):
        return v[:, None].astype(jnp.float32)      # per-channel (C, 1) f32

    kp = {}
    h = params["head"]
    # head is Conv -> BN -> LeakyReLU: fold the BN scale into the conv weight.
    kp["head"] = {
        "w": _flatten_conv_w(
            h["w"] * h["scale"][:, None, None, None]).astype(jnp.bfloat16),
        "b": col(h["shift"])}

    def block(blk):
        return {"w1": _flatten_conv_w(blk["w1"]).astype(jnp.bfloat16),
                "s1": col(blk["scale1"]), "b1": col(blk["shift1"]),
                "w2": _flatten_conv_w(blk["w2"]).astype(jnp.bfloat16),
                "s2": col(blk["scale2"]), "b2": col(blk["shift2"])}

    kp["down"] = [block(b) for b in params["down"]]

    kp["up"] = []
    for up in params["up"]:
        w_up = up["w_up"]                              # (Cin, Cout, 2, 2)
        cup = w_up.shape[1]
        wup_mat = jnp.transpose(w_up, (2, 3, 1, 0)).reshape(4 * cup,
                                                            w_up.shape[0])
        blk = block(up["block"])
        w1 = up["block"]["w1"]                         # (Cmid, Cup+Cskip, 3, 3)
        del blk["w1"]
        blk["w1a"] = _flatten_conv_w(w1[:, :cup]).astype(jnp.bfloat16)  # up half
        blk["w1b"] = _flatten_conv_w(w1[:, cup:]).astype(jnp.bfloat16)  # skip half
        blk["wup"] = wup_mat.astype(jnp.bfloat16)
        kp["up"].append(blk)

    l = params["last"]
    kp["last"] = {"w": l["w"][:, :, 0, 0].astype(jnp.bfloat16),
                  "b": l["b"][:, None].astype(jnp.float32)}
    return kp


# -----------------------------------------------------------------------------
# Full forward pass (XLFMNet.forward)
# -----------------------------------------------------------------------------
def xlfmnet_forward(kp, x_nchw):
    """XLFMNet.forward.  `kp` must come from prepare_params (bf16 kernel layouts).

    @autocast() is a CUDA fp16 context (no-op on TPU); kernels use bf16 MXU
    inputs with f32 accumulation explicitly instead.
    # TODO(synk): dropout with drop_out=1.0 (keep-prob 1) is identity, omitted.
    # TODO(synk): unet_settings['skip_conn'] is not forwarded to UNet in the
    # reference code, so the standard skip concatenation is always applied.
    """
    N, _, H, W = x_nchw.shape
    depth = len(kp["down"])
    assert depth >= 2, "this implementation assumes UNet depth >= 2"
    assert H % (2 ** (depth - 1)) == 0 and W % (2 ** (depth - 1)) == 0

    x = x_nchw.reshape(N, x_nchw.shape[1], H * W)   # NCHW -> (N, C, H*W), free

    skips = []
    ch, cw = H, W

    # ---- down path ---------------------------------------------------------
    # level 0: head conv (+folded BN, LeakyReLU) fused with the first block
    d0 = kp["down"][0]
    skip = _stage_call(
        functools.partial(_down_first_kernel, H=ch, W=cw),
        [x],
        [kp["head"]["w"], kp["head"]["b"],
         d0["w1"], d0["s1"], d0["b1"], d0["w2"], d0["s2"], d0["b2"]],
        d0["w2"].shape[0], ch * cw, jnp.bfloat16)
    skips.append(skip)
    x = _maxpool2x2(skip, ch, cw)
    ch //= 2
    cw //= 2

    # middle levels
    for i in range(1, depth - 1):
        blk = kp["down"][i]
        skip = _stage_call(
            functools.partial(_down_mid_kernel, H=ch, W=cw),
            [x],
            [blk["w1"], blk["s1"], blk["b1"], blk["w2"], blk["s2"], blk["b2"]],
            blk["w2"].shape[0], ch * cw, jnp.bfloat16)
        skips.append(skip)
        x = _maxpool2x2(skip, ch, cw)
        ch //= 2
        cw //= 2

    # bottom level: conv block + fused ConvTranspose matmul of the first up level
    blk = kp["down"][-1]
    wup0 = kp["up"][0]["wup"]
    z = _stage_call(
        functools.partial(_down_bottom_kernel, H=ch, W=cw),
        [x],
        [blk["w1"], blk["s1"], blk["b1"], blk["w2"], blk["s2"], blk["b2"], wup0],
        wup0.shape[0], ch * cw, jnp.bfloat16)

    # ---- up path -------------------------------------------------------------
    out = None
    for i, upp in enumerate(kp["up"]):
        up = _interleave2x2(z, ch, cw)              # (N, Cup, 4*S_low), bf16
        ch *= 2
        cw *= 2
        skip = skips[-i - 1]
        consts = [upp["w1a"], upp["w1b"], upp["s1"], upp["b1"],
                  upp["w2"], upp["s2"], upp["b2"]]
        if i < len(kp["up"]) - 1:
            wupn = kp["up"][i + 1]["wup"]           # next level's transposed conv
            z = _stage_call(
                functools.partial(_up_mid_kernel, H=ch, W=cw),
                [up, skip], consts + [wupn],
                wupn.shape[0], ch * cw, jnp.bfloat16)
        else:
            out = _stage_call(
                functools.partial(_up_last_kernel, H=ch, W=cw),
                [up, skip], consts + [kp["last"]["w"], kp["last"]["b"]],
                kp["last"]["w"].shape[0], ch * cw, jnp.float32)

    return out.reshape(N, -1, H, W)                 # back to NCHW


if __name__ == "__main__":
    key = jax.random.PRNGKey(0)
    k_params, k_x = jax.random.split(key)

    # Small configuration consistent with XLFMNet.__init__:
    in_views = 4
    output_shape = (16, 16, 8)          # (H, W, out_depths)
    out_depths = output_shape[2]
    unet_settings = {"depth": 2, "wf": 3, "drop_out": 1.0,
                     "batch_norm": True, "skip_conn": False}

    params = init_params(k_params, in_views, out_depths,
                         unet_settings["depth"], unet_settings["wf"])
    kp = prepare_params(params)          # once, outside jit (bf16 kernel layouts)

    x = jax.random.normal(
        k_x, (2, in_views, output_shape[0], output_shape[1]), jnp.float32)  # NCHW

    out = jax.jit(xlfmnet_forward)(kp, x)
    out = jax.block_until_ready(out)

    assert out.shape == (2, out_depths, output_shape[0], output_shape[1]), out.shape
    assert bool(jnp.all(jnp.isfinite(out)))
    print("KERNEL_OK")
</pallas_src>

<mosaic_0001>
module attributes {stable_mosaic.version = 11 : i64} {
  func.func @_down_bottom_kernel(%arg0: i32, %arg1: memref<1x8x64xbf16, #tpu.memory_space<vmem>>, %arg2: memref<16x72xbf16, #tpu.memory_space<vmem>>, %arg3: memref<16x1xf32, #tpu.memory_space<vmem>>, %arg4: memref<16x1xf32, #tpu.memory_space<vmem>>, %arg5: memref<16x144xbf16, #tpu.memory_space<vmem>>, %arg6: memref<16x1xf32, #tpu.memory_space<vmem>>, %arg7: memref<16x1xf32, #tpu.memory_space<vmem>>, %arg8: memref<32x16xbf16, #tpu.memory_space<vmem>>, %arg9: memref<1x32x64xbf16, #tpu.memory_space<vmem>>) attributes {dimension_semantics = [#tpu.dimension_semantics<parallel>], iteration_bounds = array<i64: 2>, scalar_prefetch = 0 : i64, scratch_operands = 0 : i64, tpu.core_type = #tpu.core_type<tc>, window_params = [{transform_indices = @transform_0, window_bounds = array<i64: 1, 8, 64>}, {pipeline_mode = #tpu.pipeline_mode<synchronous>, transform_indices = @transform_1, window_bounds = array<i64: 16, 72>}, {pipeline_mode = #tpu.pipeline_mode<synchronous>, transform_indices = @transform_2, window_bounds = array<i64: 16, 1>}, {pipeline_mode = #tpu.pipeline_mode<synchronous>, transform_indices = @transform_3, window_bounds = array<i64: 16, 1>}, {pipeline_mode = #tpu.pipeline_mode<synchronous>, transform_indices = @transform_4, window_bounds = array<i64: 16, 144>}, {pipeline_mode = #tpu.pipeline_mode<synchronous>, transform_indices = @transform_5, window_bounds = array<i64: 16, 1>}, {pipeline_mode = #tpu.pipeline_mode<synchronous>, transform_indices = @transform_6, window_bounds = array<i64: 16, 1>}, {pipeline_mode = #tpu.pipeline_mode<synchronous>, transform_indices = @transform_7, window_bounds = array<i64: 32, 16>}, {transform_indices = @transform_8, window_bounds = array<i64: 1, 32, 64>}]} {
    %c0 = arith.constant 0 : index
    %c0_0 = arith.constant 0 : index
    %c0_1 = arith.constant 0 : index
    %0 = vector.load %arg1[%c0, %c0_0, %c0_1] : memref<1x8x64xbf16, #tpu.memory_space<vmem>>, vector<1x8x64xbf16>
    %1 = vector.shape_cast %0 : vector<1x8x64xbf16> to vector<8x64xbf16>
    %c0_2 = arith.constant 0 : index
    %c0_3 = arith.constant 0 : index
    %2 = vector.load %arg2[%c0_2, %c0_3] : memref<16x72xbf16, #tpu.memory_space<vmem>>, vector<16x72xbf16>
    %3 = tpu.iota {dimensions = array<i32: 1>} : vector<1x64xi32>
    %c8_i32 = arith.constant 8 : i32
    %c0_i32 = arith.constant 0 : i32
    %4 = arith.cmpi eq, %c8_i32, %c0_i32 : i32
    %c1_i32 = arith.constant 1 : i32
    %5 = arith.select %4, %c1_i32, %c8_i32 : i32
    %6 = vector.broadcast %5 : i32 to vector<1x64xi32>
    %7 = arith.remsi %3, %6 : vector<1x64xi32>
    %c0_i32_4 = arith.constant 0 : i32
    %8 = vector.broadcast %c0_i32_4 : i32 to vector<1x64xi32>
    %9 = arith.cmpi ne, %7, %8 : vector<1x64xi32>
    %c0_i32_5 = arith.constant 0 : i32
    %10 = vector.broadcast %c0_i32_5 : i32 to vector<1x64xi32>
    %11 = arith.cmpi slt, %7, %10 : vector<1x64xi32>
    %c0_i32_6 = arith.constant 0 : i32
    %12 = arith.cmpi slt, %5, %c0_i32_6 : i32
    %13 = vector.broadcast %12 : i1 to vector<1x64xi1>
    %14 = vector.broadcast %13 : vector<1x64xi1> to vector<1x64xi1>
    %15 = arith.xori %11, %14 : vector<1x64xi1>
    %16 = arith.andi %15, %9 : vector<1x64xi1>
    %17 = vector.broadcast %5 : i32 to vector<1x64xi32>
    %18 = arith.addi %7, %17 : vector<1x64xi32>
    %19 = arith.select %16, %18, %7 : vector<1x64xi1>, vector<1x64xi32>
    %c0_i32_7 = arith.constant 0 : i32
    %20 = vector.broadcast %c0_i32_7 : i32 to vector<1x64xi32>
    %21 = arith.cmpi ne, %19, %20 : vector<1x64xi32>
    %c7_i32 = arith.constant 7 : i32
    %22 = vector.broadcast %c7_i32 : i32 to vector<1x64xi32>
    %23 = arith.cmpi ne, %19, %22 : vector<1x64xi32>
    %cst = arith.constant 0.000000e+00 : bf16
    %24 = vector.broadcast %cst : bf16 to vector<8x9xbf16>
    %25 = tpu.concatenate %24, %1, %24 in 1 : vector<8x9xbf16>, vector<8x64xbf16>, vector<8x9xbf16> -> vector<8x82xbf16>
    %26 = vector.extract_strided_slice %25 {offsets = [0, 0], sizes = [8, 64], strides = [1, 1]} : vector<8x82xbf16> to vector<8x64xbf16>
    %cst_8 = arith.constant 0.000000e+00 : bf16
    %27 = vector.broadcast %cst_8 : bf16 to vector<8x64xbf16>
    %28 = vector.shape_cast %21 : vector<1x64xi1> to vector<1x64xi1>
    %29 = vector.broadcast %28 : vector<1x64xi1> to vector<8x64xi1>
    %30 = arith.select %29, %26, %27 : vector<8x64xi1>, vector<8x64xbf16>
    %31 = vector.extract_strided_slice %25 {offsets = [0, 1], sizes = [8, 64], strides = [1, 1]} : vector<8x82xbf16> to vector<8x64xbf16>
    %32 = vector.extract_strided_slice %25 {offsets = [0, 2], sizes = [8, 64], strides = [1, 1]} : vector<8x82xbf16> to vector<8x64xbf16>
    %cst_9 = arith.constant 0.000000e+00 : bf16
    %33 = vector.broadcast %cst_9 : bf16 to vector<8x64xbf16>
    %34 = vector.shape_cast %23 : vector<1x64xi1> to vector<1x64xi1>
    %35 = vector.broadcast %34 : vector<1x64xi1> to vector<8x64xi1>
    %36 = arith.select %35, %32, %33 : vector<8x64xi1>, vector<8x64xbf16>
    %37 = tpu.concatenate %30, %31, %36 in 0 : vector<8x64xbf16>, vector<8x64xbf16>, vector<8x64xbf16> -> vector<24x64xbf16>
    %38 = vector.extract_strided_slice %2 {offsets = [0, 0], sizes = [16, 24], strides = [1, 1]} : vector<16x72xbf16> to vector<16x24xbf16>
    %cst_10 = arith.constant dense<0.000000e+00> : vector<16x64xf32>
    %39 = tpu.matmul %38, %37, %cst_10 {dimension_numbers = #tpu.dot_dimension_numbers<[1], [0], [0], [1], [0, 0, 1, 1], [], []>} : vector<16x24xbf16>, vector<24x64xbf16>, vector<16x64xf32> -> vector<16x64xf32>
    %40 = vector.extract_strided_slice %25 {offsets = [0, 8], sizes = [8, 64], strides = [1, 1]} : vector<8x82xbf16> to vector<8x64xbf16>
    %cst_11 = arith.constant 0.000000e+00 : bf16
    %41 = vector.broadcast %cst_11 : bf16 to vector<8x64xbf16>
    %42 = vector.shape_cast %21 : vector<1x64xi1> to vector<1x64xi1>
    %43 = vector.broadcast %42 : vector<1x64xi1> to vector<8x64xi1>
    %44 = arith.select %43, %40, %41 : vector<8x64xi1>, vector<8x64xbf16>
    %45 = vector.extract_strided_slice %25 {offsets = [0, 9], sizes = [8, 64], strides = [1, 1]} : vector<8x82xbf16> to vector<8x64xbf16>
    %46 = vector.extract_strided_slice %25 {offsets = [0, 10], sizes = [8, 64], strides = [1, 1]} : vector<8x82xbf16> to vector<8x64xbf16>
    %cst_12 = arith.constant 0.000000e+00 : bf16
    %47 = vector.broadcast %cst_12 : bf16 to vector<8x64xbf16>
    %48 = vector.shape_cast %23 : vector<1x64xi1> to vector<1x64xi1>
    %49 = vector.broadcast %48 : vector<1x64xi1> to vector<8x64xi1>
    %50 = arith.select %49, %46, %47 : vector<8x64xi1>, vector<8x64xbf16>
    %51 = tpu.concatenate %44, %45, %50 in 0 : vector<8x64xbf16>, vector<8x64xbf16>, vector<8x64xbf16> -> vector<24x64xbf16>
    %52 = vector.extract_strided_slice %2 {offsets = [0, 24], sizes = [16, 24], strides = [1, 1]} : vector<16x72xbf16> to vector<16x24xbf16>
    %cst_13 = arith.constant dense<0.000000e+00> : vector<16x64xf32>
    %53 = tpu.matmul %52, %51, %cst_13 {dimension_numbers = #tpu.dot_dimension_numbers<[1], [0], [0], [1], [0, 0, 1, 1], [], []>} : vector<16x24xbf16>, vector<24x64xbf16>, vector<16x64xf32> -> vector<16x64xf32>
    %54 = arith.addf %39, %53 : vector<16x64xf32>
    %55 = vector.extract_strided_slice %25 {offsets = [0, 16], sizes = [8, 64], strides = [1, 1]} : vector<8x82xbf16> to vector<8x64xbf16>
    %cst_14 = arith.constant 0.000000e+00 : bf16
    %56 = vector.broadcast %cst_14 : bf16 to vector<8x64xbf16>
    %57 = vector.shape_cast %21 : vector<1x64xi1> to vector<1x64xi1>
    %58 = vector.broadcast %57 : vector<1x64xi1> to vector<8x64xi1>
    %59 = arith.select %58, %55, %56 : vector<8x64xi1>, vector<8x64xbf16>
    %60 = vector.extract_strided_slice %25 {offsets = [0, 17], sizes = [8, 64], strides = [1, 1]} : vector<8x82xbf16> to vector<8x64xbf16>
    %61 = vector.extract_strided_slice %25 {offsets = [0, 18], sizes = [8, 64], strides = [1, 1]} : vector<8x82xbf16> to vector<8x64xbf16>
    %cst_15 = arith.constant 0.000000e+00 : bf16
    %62 = vector.broadcast %cst_15 : bf16 to vector<8x64xbf16>
    %63 = vector.shape_cast %23 : vector<1x64xi1> to vector<1x64xi1>
    %64 = vector.broadcast %63 : vector<1x64xi1> to vector<8x64xi1>
    %65 = arith.select %64, %61, %62 : vector<8x64xi1>, vector<8x64xbf16>
    %66 = tpu.concatenate %59, %60, %65 in 0 : vector<8x64xbf16>, vector<8x64xbf16>, vector<8x64xbf16> -> vector<24x64xbf16>
    %67 = vector.extract_strided_slice %2 {offsets = [0, 48], sizes = [16, 24], strides = [1, 1]} : vector<16x72xbf16> to vector<16x24xbf16>
    %cst_16 = arith.constant dense<0.000000e+00> : vector<16x64xf32>
    %68 = tpu.matmul %67, %66, %cst_16 {dimension_numbers = #tpu.dot_dimension_numbers<[1], [0], [0], [1], [0, 0, 1, 1], [], []>} : vector<16x24xbf16>, vector<24x64xbf16>, vector<16x64xf32> -> vector<16x64xf32>
    %69 = arith.addf %54, %68 : vector<16x64xf32>
    %cst_17 = arith.constant 0.000000e+00 : f32
    %70 = vector.broadcast %cst_17 : f32 to vector<16x64xf32>
    %71 = arith.cmpf ogt, %69, %70 : vector<16x64xf32>
    %cst_18 = arith.constant 0.000000e+00 : f32
    %72 = vector.broadcast %cst_18 : f32 to vector<16x64xf32>
    %73 = arith.minimumf %69, %72 : vector<16x64xf32>
    %74 = math.exp %73 : vector<16x64xf32>
    %cst_19 = arith.constant 1.000000e+00 : f32
    %75 = vector.broadcast %cst_19 : f32 to vector<16x64xf32>
    %76 = arith.subf %74, %75 : vector<16x64xf32>
    %77 = arith.select %71, %69, %76 : vector<16x64xi1>, vector<16x64xf32>
    %c0_20 = arith.constant 0 : index
    %c0_21 = arith.constant 0 : index
    %78 = vector.load %arg3[%c0_20, %c0_21] : memref<16x1xf32, #tpu.memory_space<vmem>>, vector<16x1xf32>
    %79 = vector.broadcast %78 : vector<16x1xf32> to vector<16x64xf32>
    %80 = arith.mulf %77, %79 : vector<16x64xf32>
    %c0_22 = arith.constant 0 : index
    %c0_23 = arith.constant 0 : index
    %81 = vector.load %arg4[%c0_22, %c0_23] : memref<16x1xf32, #tpu.memory_space<vmem>>, vector<16x1xf32>
    %82 = vector.broadcast %81 : vector<16x1xf32> to vector<16x64xf32>
    %83 = arith.addf %80, %82 : vector<16x64xf32>
    %84 = arith.truncf %83 : vector<16x64xf32> to vector<16x64xbf16>
    %c0_24 = arith.constant 0 : index
    %c0_25 = arith.constant 0 : index
    %85 = vector.load %arg5[%c0_24, %c0_25] : memref<16x144xbf16, #tpu.memory_space<vmem>>, vector<16x144xbf16>
    %86 = tpu.iota {dimensions = array<i32: 1>} : vector<1x64xi32>
    %c8_i32_26 = arith.constant 8 : i32
    %c0_i32_27 = arith.constant 0 : i32
    %87 = arith.cmpi eq, %c8_i32_26, %c0_i32_27 : i32
    %c1_i32_28 = arith.constant 1 : i32
    %88 = arith.select %87, %c1_i32_28, %c8_i32_26 : i32
    %89 = vector.broadcast %88 : i32 to vector<1x64xi32>
    %90 = arith.remsi %86, %89 : vector<1x64xi32>
    %c0_i32_29 = arith.constant 0 : i32
    %91 = vector.broadcast %c0_i32_29 : i32 to vector<1x64xi32>
    %92 = arith.cmpi ne, %90, %91 : vector<1x64xi32>
    %c0_i32_30 = arith.constant 0 : i32
    %93 = vector.broadcast %c0_i32_30 : i32 to vector<1x64xi32>
    %94 = arith.cmpi slt, %90, %93 : vector<1x64xi32>
    %c0_i32_31 = arith.constant 0 : i32
    %95 = arith.cmpi slt, %88, %c0_i32_31 : i32
    %96 = vector.broadcast %95 : i1 to vector<1x64xi1>
    %97 = vector.broadcast %96 : vector<1x64xi1> to vector<1x64xi1>
    %98 = arith.xori %94, %97 : vector<1x64xi1>
    %99 = arith.andi %98, %92 : vector<1x64xi1>
    %100 = vector.broadcast %88 : i32 to vector<1x64xi32>
    %101 = arith.addi %90, %100 : vector<1x64xi32>
    %102 = arith.select %99, %101, %90 : vector<1x64xi1>, vector<1x64xi32>
    %c0_i32_32 = arith.constant 0 : i32
    %103 = vector.broadcast %c0_i32_32 : i32 to vector<1x64xi32>
    %104 = arith.cmpi ne, %102, %103 : vector<1x64xi32>
    %c7_i32_33 = arith.constant 7 : i32
    %105 = vector.broadcast %c7_i32_33 : i32 to vector<1x64xi32>
    %106 = arith.cmpi ne, %102, %105 : vector<1x64xi32>
    %cst_34 = arith.constant 0.000000e+00 : bf16
    %107 = vector.broadcast %cst_34 : bf16 to vector<16x9xbf16>
    %108 = tpu.concatenate %107, %84, %107 in 1 : vector<16x9xbf16>, vector<16x64xbf16>, vector<16x9xbf16> -> vector<16x82xbf16>
    %109 = vector.extract_strided_slice %108 {offsets = [0, 0], sizes = [16, 64], strides = [1, 1]} : vector<16x82xbf16> to vector<16x64xbf16>
    %cst_35 = arith.constant 0.000000e+00 : bf16
    %110 = vector.broadcast %cst_35 : bf16 to vector<16x64xbf16>
    %111 = vector.shape_cast %104 : vector<1x64xi1> to vector<1x64xi1>
    %112 = vector.broadcast %111 : vector<1x64xi1> to vector<16x64xi1>
    %113 = arith.select %112, %109, %110 : vector<16x64xi1>, vector<16x64xbf16>
    %114 = vector.extract_strided_slice %108 {offsets = [0, 1], sizes = [16, 64], strides = [1, 1]} : vector<16x82xbf16> to vector<16x64xbf16>
    %115 = vector.extract_strided_slice %108 {offsets = [0, 2], sizes = [16, 64], strides = [1, 1]} : vector<16x82xbf16> to vector<16x64xbf16>
    %cst_36 = arith.constant 0.000000e+00 : bf16
    %116 = vector.broadcast %cst_36 : bf16 to vector<16x64xbf16>
    %117 = vector.shape_cast %106 : vector<1x64xi1> to vector<1x64xi1>
    %118 = vector.broadcast %117 : vector<1x64xi1> to vector<16x64xi1>
    %119 = arith.select %118, %115, %116 : vector<16x64xi1>, vector<16x64xbf16>
    %120 = tpu.concatenate %113, %114, %119 in 0 : vector<16x64xbf16>, vector<16x64xbf16>, vector<16x64xbf16> -> vector<48x64xbf16>
    %121 = vector.extract_strided_slice %85 {offsets = [0, 0], sizes = [16, 48], strides = [1, 1]} : vector<16x144xbf16> to vector<16x48xbf16>
    %cst_37 = arith.constant dense<0.000000e+00> : vector<16x64xf32>
    %122 = tpu.matmul %121, %120, %cst_37 {dimension_numbers = #tpu.dot_dimension_numbers<[1], [0], [0], [1], [0, 0, 1, 1], [], []>} : vector<16x48xbf16>, vector<48x64xbf16>, vector<16x64xf32> -> vector<16x64xf32>
    %123 = vector.extract_strided_slice %108 {offsets = [0, 8], sizes = [16, 64], strides = [1, 1]} : vector<16x82xbf16> to vector<16x64xbf16>
    %cst_38 = arith.constant 0.000000e+00 : bf16
    %124 = vector.broadcast %cst_38 : bf16 to vector<16x64xbf16>
    %125 = vector.shape_cast %104 : vector<1x64xi1> to vector<1x64xi1>
    %126 = vector.broadcast %125 : vector<1x64xi1> to vector<16x64xi1>
    %127 = arith.select %126, %123, %124 : vector<16x64xi1>, vector<16x64xbf16>
    %128 = vector.extract_strided_slice %108 {offsets = [0, 9], sizes = [16, 64], strides = [1, 1]} : vector<16x82xbf16> to vector<16x64xbf16>
    %129 = vector.extract_strided_slice %108 {offsets = [0, 10], sizes = [16, 64], strides = [1, 1]} : vector<16x82xbf16> to vector<16x64xbf16>
    %cst_39 = arith.constant 0.000000e+00 : bf16
    %130 = vector.broadcast %cst_39 : bf16 to vector<16x64xbf16>
    %131 = vector.shape_cast %106 : vector<1x64xi1> to vector<1x64xi1>
    %132 = vector.broadcast %131 : vector<1x64xi1> to vector<16x64xi1>
    %133 = arith.select %132, %129, %130 : vector<16x64xi1>, vector<16x64xbf16>
    %134 = tpu.concatenate %127, %128, %133 in 0 : vector<16x64xbf16>, vector<16x64xbf16>, vector<16x64xbf16> -> vector<48x64xbf16>
    %135 = vector.extract_strided_slice %85 {offsets = [0, 48], sizes = [16, 48], strides = [1, 1]} : vector<16x144xbf16> to vector<16x48xbf16>
    %cst_40 = arith.constant dense<0.000000e+00> : vector<16x64xf32>
    %136 = tpu.matmul %135, %134, %cst_40 {dimension_numbers = #tpu.dot_dimension_numbers<[1], [0], [0], [1], [0, 0, 1, 1], [], []>} : vector<16x48xbf16>, vector<48x64xbf16>, vector<16x64xf32> -> vector<16x64xf32>
    %137 = arith.addf %122, %136 : vector<16x64xf32>
    %138 = vector.extract_strided_slice %108 {offsets = [0, 16], sizes = [16, 64], strides = [1, 1]} : vector<16x82xbf16> to vector<16x64xbf16>
    %cst_41 = arith.constant 0.000000e+00 : bf16
    %139 = vector.broadcast %cst_41 : bf16 to vector<16x64xbf16>
    %140 = vector.shape_cast %104 : vector<1x64xi1> to vector<1x64xi1>
    %141 = vector.broadcast %140 : vector<1x64xi1> to vector<16x64xi1>
    %142 = arith.select %141, %138, %139 : vector<16x64xi1>, vector<16x64xbf16>
    %143 = vector.extract_strided_slice %108 {offsets = [0, 17], sizes = [16, 64], strides = [1, 1]} : vector<16x82xbf16> to vector<16x64xbf16>
    %144 = vector.extract_strided_slice %108 {offsets = [0, 18], sizes = [16, 64], strides = [1, 1]} : vector<16x82xbf16> to vector<16x64xbf16>
    %cst_42 = arith.constant 0.000000e+00 : bf16
    %145 = vector.broadcast %cst_42 : bf16 to vector<16x64xbf16>
    %146 = vector.shape_cast %106 : vector<1x64xi1> to vector<1x64xi1>
    %147 = vector.broadcast %146 : vector<1x64xi1> to vector<16x64xi1>
    %148 = arith.select %147, %144, %145 : vector<16x64xi1>, vector<16x64xbf16>
    %149 = tpu.concatenate %142, %143, %148 in 0 : vector<16x64xbf16>, vector<16x64xbf16>, vector<16x64xbf16> -> vector<48x64xbf16>
    %150 = vector.extract_strided_slice %85 {offsets = [0, 96], sizes = [16, 48], strides = [1, 1]} : vector<16x144xbf16> to vector<16x48xbf16>
    %cst_43 = arith.constant dense<0.000000e+00> : vector<16x64xf32>
    %151 = tpu.matmul %150, %149, %cst_43 {dimension_numbers = #tpu.dot_dimension_numbers<[1], [0], [0], [1], [0, 0, 1, 1], [], []>} : vector<16x48xbf16>, vector<48x64xbf16>, vector<16x64xf32> -> vector<16x64xf32>
    %152 = arith.addf %137, %151 : vector<16x64xf32>
    %cst_44 = arith.constant 0.000000e+00 : f32
    %153 = vector.broadcast %cst_44 : f32 to vector<16x64xf32>
    %154 = arith.cmpf ogt, %152, %153 : vector<16x64xf32>
    %cst_45 = arith.constant 0.000000e+00 : f32
    %155 = vector.broadcast %cst_45 : f32 to vector<16x64xf32>
    %156 = arith.minimumf %152, %155 : vector<16x64xf32>
    %157 = math.exp %156 : vector<16x64xf32>
    %cst_46 = arith.constant 1.000000e+00 : f32
    %158 = vector.broadcast %cst_46 : f32 to vector<16x64xf32>
    %159 = arith.subf %157, %158 : vector<16x64xf32>
    %160 = arith.select %154, %152, %159 : vector<16x64xi1>, vector<16x64xf32>
    %c0_47 = arith.constant 0 : index
    %c0_48 = arith.constant 0 : index
    %161 = vector.load %arg6[%c0_47, %c0_48] : memref<16x1xf32, #tpu.memory_space<vmem>>, vector<16x1xf32>
    %162 = vector.broadcast %161 : vector<16x1xf32> to vector<16x64xf32>
    %163 = arith.mulf %160, %162 : vector<16x64xf32>
    %c0_49 = arith.constant 0 : index
    %c0_50 = arith.constant 0 : index
    %164 = vector.load %arg7[%c0_49, %c0_50] : memref<16x1xf32, #tpu.memory_space<vmem>>, vector<16x1xf32>
    %165 = vector.broadcast %164 : vector<16x1xf32> to vector<16x64xf32>
    %166 = arith.addf %163, %165 : vector<16x64xf32>
    %c0_51 = arith.constant 0 : index
    %c0_52 = arith.constant 0 : index
    %167 = vector.load %arg8[%c0_51, %c0_52] : memref<32x16xbf16, #tpu.memory_space<vmem>>, vector<32x16xbf16>
    %168 = arith.truncf %166 : vector<16x64xf32> to vector<16x64xbf16>
    %cst_53 = arith.constant dense<0.000000e+00> : vector<32x64xf32>
    %169 = tpu.matmul %167, %168, %cst_53 {dimension_numbers = #tpu.dot_dimension_numbers<[1], [0], [0], [1], [0, 0, 1, 1], [], []>} : vector<32x16xbf16>, vector<16x64xbf16>, vector<32x64xf32> -> vector<32x64xf32>
    %170 = arith.truncf %169 : vector<32x64xf32> to vector<32x64xbf16>
    %c0_54 = arith.constant 0 : index
    %c0_55 = arith.constant 0 : index
    %c0_56 = arith.constant 0 : index
    %171 = vector.load %arg9[%c0_54, %c0_55, %c0_56] : memref<1x32x64xbf16, #tpu.memory_space<vmem>>, vector<1x32x64xbf16>
    %172 = vector.shape_cast %171 : vector<1x32x64xbf16> to vector<32x64xbf16>
    %173 = vector.shape_cast %170 : vector<32x64xbf16> to vector<1x32x64xbf16>
    tpu.vector_store %arg9[%c0_54, %c0_55, %c0_56], %173 {strides = array<i32>} : memref<1x32x64xbf16, #tpu.memory_space<vmem>>, vector<1x32x64xbf16>,
    return
  }
  func.func @transform_0(%arg0: i32) -> (i32, i32, i32) {
    %c0_i32 = arith.constant 0 : i32
    %c0_i32_0 = arith.constant 0 : i32
    %c0_i32_1 = arith.constant 0 : i32
    return %arg0, %c0_i32, %c0_i32_0 : i32, i32, i32
  }
  func.func @transform_1(%arg0: i32) -> (i32, i32) {
    %c0_i32 = arith.constant 0 : i32
    %c0_i32_0 = arith.constant 0 : i32
    %c0_i32_1 = arith.constant 0 : i32
    return %c0_i32, %c0_i32_0 : i32, i32
  }
  func.func @transform_2(%arg0: i32) -> (i32, i32) {
    %c0_i32 = arith.constant 0 : i32
    %c0_i32_0 = arith.constant 0 : i32
    %c0_i32_1 = arith.constant 0 : i32
    return %c0_i32, %c0_i32_0 : i32, i32
  }
  func.func @transform_3(%arg0: i32) -> (i32, i32) {
    %c0_i32 = arith.constant 0 : i32
    %c0_i32_0 = arith.constant 0 : i32
    %c0_i32_1 = arith.constant 0 : i32
    return %c0_i32, %c0_i32_0 : i32, i32
  }
  func.func @transform_4(%arg0: i32) -> (i32, i32) {
    %c0_i32 = arith.constant 0 : i32
    %c0_i32_0 = arith.constant 0 : i32
    %c0_i32_1 = arith.constant 0 : i32
    return %c0_i32, %c0_i32_0 : i32, i32
  }
  func.func @transform_5(%arg0: i32) -> (i32, i32) {
    %c0_i32 = arith.constant 0 : i32
    %c0_i32_0 = arith.constant 0 : i32
    %c0_i32_1 = arith.constant 0 : i32
    return %c0_i32, %c0_i32_0 : i32, i32
  }
  func.func @transform_6(%arg0: i32) -> (i32, i32) {
    %c0_i32 = arith.constant 0 : i32
    %c0_i32_0 = arith.constant 0 : i32
    %c0_i32_1 = arith.constant 0 : i32
    return %c0_i32, %c0_i32_0 : i32, i32
  }
  func.func @transform_7(%arg0: i32) -> (i32, i32) {
    %c0_i32 = arith.constant 0 : i32
    %c0_i32_0 = arith.constant 0 : i32
    %c0_i32_1 = arith.constant 0 : i32
    return %c0_i32, %c0_i32_0 : i32, i32
  }
  func.func @transform_8(%arg0: i32) -> (i32, i32, i32) {
    %c0_i32 = arith.constant 0 : i32
    %c0_i32_0 = arith.constant 0 : i32
    %c0_i32_1 = arith.constant 0 : i32
    return %arg0, %c0_i32, %c0_i32_0 : i32, i32, i32
  }
}

module attributes {stable_mosaic.version = 11 : i64} {
  func.func @_down_first_kernel(%arg0: i32, %arg1: memref<1x4x256xf32, #tpu.memory_space<vmem>>, %arg2: memref<8x36xbf16, #tpu.memory_space<vmem>>, %arg3: memref<8x1xf32, #tpu.memory_space<vmem>>, %arg4: memref<8x72xbf16, #tpu.memory_space<vmem>>, %arg5: memref<8x1xf32, #tpu.memory_space<vmem>>, %arg6: memref<8x1xf32, #tpu.memory_space<vmem>>, %arg7: memref<8x72xbf16, #tpu.memory_space<vmem>>, %arg8: memref<8x1xf32, #tpu.memory_space<vmem>>, %arg9: memref<8x1xf32, #tpu.memory_space<vmem>>, %arg10: memref<1x8x256xbf16, #tpu.memory_space<vmem>>) attributes {dimension_semantics = [#tpu.dimension_semantics<parallel>], iteration_bounds = array<i64: 2>, scalar_prefetch = 0 : i64, scratch_operands = 0 : i64, tpu.core_type = #tpu.core_type<tc>, window_params = [{transform_indices = @transform_0, window_bounds = array<i64: 1, 4, 256>}, {pipeline_mode = #tpu.pipeline_mode<synchronous>, transform_indices = @transform_1, window_bounds = array<i64: 8, 36>}, {pipeline_mode = #tpu.pipeline_mode<synchronous>, transform_indices = @transform_2, window_bounds = array<i64: 8, 1>}, {pipeline_mode = #tpu.pipeline_mode<synchronous>, transform_indices = @transform_3, window_bounds = array<i64: 8, 72>}, {pipeline_mode = #tpu.pipeline_mode<synchronous>, transform_indices = @transform_4, window_bounds = array<i64: 8, 1>}, {pipeline_mode = #tpu.pipeline_mode<synchronous>, transform_indices = @transform_5, window_bounds = array<i64: 8, 1>}, {pipeline_mode = #tpu.pipeline_mode<synchronous>, transform_indices = @transform_6, window_bounds = array<i64: 8, 72>}, {pipeline_mode = #tpu.pipeline_mode<synchronous>, transform_indices = @transform_7, window_bounds = array<i64: 8, 1>}, {pipeline_mode = #tpu.pipeline_mode<synchronous>, transform_indices = @transform_8, window_bounds = array<i64: 8, 1>}, {transform_indices = @transform_9, window_bounds = array<i64: 1, 8, 256>}]} {
    %c0 = arith.constant 0 : index
    %c0_0 = arith.constant 0 : index
    %c0_1 = arith.constant 0 : index
    %0 = vector.load %arg1[%c0, %c0_0, %c0_1] : memref<1x4x256xf32, #tpu.memory_space<vmem>>, vector<1x4x256xf32>
    %1 = vector.shape_cast %0 : vector<1x4x256xf32> to vector<4x256xf32>
    %2 = arith.truncf %1 : vector<4x256xf32> to vector<4x256xbf16>
    %c0_2 = arith.constant 0 : index
    %c0_3 = arith.constant 0 : index
    %3 = vector.load %arg2[%c0_2, %c0_3] : memref<8x36xbf16, #tpu.memory_space<vmem>>, vector<8x36xbf16>
    %4 = tpu.iota {dimensions = array<i32: 1>} : vector<1x256xi32>
    %c16_i32 = arith.constant 16 : i32
    %c0_i32 = arith.constant 0 : i32
    %5 = arith.cmpi eq, %c16_i32, %c0_i32 : i32
    %c1_i32 = arith.constant 1 : i32
    %6 = arith.select %5, %c1_i32, %c16_i32 : i32
    %7 = vector.broadcast %6 : i32 to vector<1x256xi32>
    %8 = arith.remsi %4, %7 : vector<1x256xi32>
    %c0_i32_4 = arith.constant 0 : i32
    %9 = vector.broadcast %c0_i32_4 : i32 to vector<1x256xi32>
    %10 = arith.cmpi ne, %8, %9 : vector<1x256xi32>
    %c0_i32_5 = arith.constant 0 : i32
    %11 = vector.broadcast %c0_i32_5 : i32 to vector<1x256xi32>
    %12 = arith.cmpi slt, %8, %11 : vector<1x256xi32>
    %c0_i32_6 = arith.constant 0 : i32
    %13 = arith.cmpi slt, %6, %c0_i32_6 : i32
    %14 = vector.broadcast %13 : i1 to vector<1x256xi1>
    %15 = vector.broadcast %14 : vector<1x256xi1> to vector<1x256xi1>
    %16 = arith.xori %12, %15 : vector<1x256xi1>
    %17 = arith.andi %16, %10 : vector<1x256xi1>
    %18 = vector.broadcast %6 : i32 to vector<1x256xi32>
    %19 = arith.addi %8, %18 : vector<1x256xi32>
    %20 = arith.select %17, %19, %8 : vector<1x256xi1>, vector<1x256xi32>
    %c0_i32_7 = arith.constant 0 : i32
    %21 = vector.broadcast %c0_i32_7 : i32 to vector<1x256xi32>
    %22 = arith.cmpi ne, %20, %21 : vector<1x256xi32>
    %c15_i32 = arith.constant 15 : i32
    %23 = vector.broadcast %c15_i32 : i32 to vector<1x256xi32>
    %24 = arith.cmpi ne, %20, %23 : vector<1x256xi32>
    %cst = arith.constant 0.000000e+00 : bf16
    %25 = vector.broadcast %cst : bf16 to vector<4x17xbf16>
    %26 = tpu.concatenate %25, %2, %25 in 1 : vector<4x17xbf16>, vector<4x256xbf16>, vector<4x17xbf16> -> vector<4x290xbf16>
    %27 = vector.extract_strided_slice %26 {offsets = [0, 0], sizes = [4, 256], strides = [1, 1]} : vector<4x290xbf16> to vector<4x256xbf16>
    %cst_8 = arith.constant 0.000000e+00 : bf16
    %28 = vector.broadcast %cst_8 : bf16 to vector<4x256xbf16>
    %29 = vector.shape_cast %22 : vector<1x256xi1> to vector<1x256xi1>
    %30 = vector.broadcast %29 : vector<1x256xi1> to vector<4x256xi1>
    %31 = arith.select %30, %27, %28 : vector<4x256xi1>, vector<4x256xbf16>
    %32 = vector.extract_strided_slice %26 {offsets = [0, 1], sizes = [4, 256], strides = [1, 1]} : vector<4x290xbf16> to vector<4x256xbf16>
    %33 = vector.extract_strided_slice %26 {offsets = [0, 2], sizes = [4, 256], strides = [1, 1]} : vector<4x290xbf16> to vector<4x256xbf16>
    %cst_9 = arith.constant 0.000000e+00 : bf16
    %34 = vector.broadcast %cst_9 : bf16 to vector<4x256xbf16>
    %35 = vector.shape_cast %24 : vector<1x256xi1> to vector<1x256xi1>
    %36 = vector.broadcast %35 : vector<1x256xi1> to vector<4x256xi1>
    %37 = arith.select %36, %33, %34 : vector<4x256xi1>, vector<4x256xbf16>
    %38 = tpu.concatenate %31, %32, %37 in 0 : vector<4x256xbf16>, vector<4x256xbf16>, vector<4x256xbf16> -> vector<12x256xbf16>
    %39 = vector.extract_strided_slice %3 {offsets = [0, 0], sizes = [8, 12], strides = [1, 1]} : vector<8x36xbf16> to vector<8x12xbf16>
    %cst_10 = arith.constant dense<0.000000e+00> : vector<8x256xf32>
    %40 = tpu.matmul %39, %38, %cst_10 {dimension_numbers = #tpu.dot_dimension_numbers<[1], [0], [0], [1], [0, 0, 1, 1], [], []>} : vector<8x12xbf16>, vector<12x256xbf16>, vector<8x256xf32> -> vector<8x256xf32>
    %41 = vector.extract_strided_slice %26 {offsets = [0, 16], sizes = [4, 256], strides = [1, 1]} : vector<4x290xbf16> to vector<4x256xbf16>
    %cst_11 = arith.constant 0.000000e+00 : bf16
    %42 = vector.broadcast %cst_11 : bf16 to vector<4x256xbf16>
    %43 = vector.shape_cast %22 : vector<1x256xi1> to vector<1x256xi1>
    %44 = vector.broadcast %43 : vector<1x256xi1> to vector<4x256xi1>
    %45 = arith.select %44, %41, %42 : vector<4x256xi1>, vector<4x256xbf16>
    %46 = vector.extract_strided_slice %26 {offsets = [0, 17], sizes = [4, 256], strides = [1, 1]} : vector<4x290xbf16> to vector<4x256xbf16>
    %47 = vector.extract_strided_slice %26 {offsets = [0, 18], sizes = [4, 256], strides = [1, 1]} : vector<4x290xbf16> to vector<4x256xbf16>
    %cst_12 = arith.constant 0.000000e+00 : bf16
    %48 = vector.broadcast %cst_12 : bf16 to vector<4x256xbf16>
    %49 = vector.shape_cast %24 : vector<1x256xi1> to vector<1x256xi1>
    %50 = vector.broadcast %49 : vector<1x256xi1> to vector<4x256xi1>
    %51 = arith.select %50, %47, %48 : vector<4x256xi1>, vector<4x256xbf16>
    %52 = tpu.concatenate %45, %46, %51 in 0 : vector<4x256xbf16>, vector<4x256xbf16>, vector<4x256xbf16> -> vector<12x256xbf16>
    %53 = vector.extract_strided_slice %3 {offsets = [0, 12], sizes = [8, 12], strides = [1, 1]} : vector<8x36xbf16> to vector<8x12xbf16>
    %cst_13 = arith.constant dense<0.000000e+00> : vector<8x256xf32>
    %54 = tpu.matmul %53, %52, %cst_13 {dimension_numbers = #tpu.dot_dimension_numbers<[1], [0], [0], [1], [0, 0, 1, 1], [], []>} : vector<8x12xbf16>, vector<12x256xbf16>, vector<8x256xf32> -> vector<8x256xf32>
    %55 = arith.addf %40, %54 : vector<8x256xf32>
    %56 = vector.extract_strided_slice %26 {offsets = [0, 32], sizes = [4, 256], strides = [1, 1]} : vector<4x290xbf16> to vector<4x256xbf16>
    %cst_14 = arith.constant 0.000000e+00 : bf16
    %57 = vector.broadcast %cst_14 : bf16 to vector<4x256xbf16>
    %58 = vector.shape_cast %22 : vector<1x256xi1> to vector<1x256xi1>
    %59 = vector.broadcast %58 : vector<1x256xi1> to vector<4x256xi1>
    %60 = arith.select %59, %56, %57 : vector<4x256xi1>, vector<4x256xbf16>
    %61 = vector.extract_strided_slice %26 {offsets = [0, 33], sizes = [4, 256], strides = [1, 1]} : vector<4x290xbf16> to vector<4x256xbf16>
    %62 = vector.extract_strided_slice %26 {offsets = [0, 34], sizes = [4, 256], strides = [1, 1]} : vector<4x290xbf16> to vector<4x256xbf16>
    %cst_15 = arith.constant 0.000000e+00 : bf16
    %63 = vector.broadcast %cst_15 : bf16 to vector<4x256xbf16>
    %64 = vector.shape_cast %24 : vector<1x256xi1> to vector<1x256xi1>
    %65 = vector.broadcast %64 : vector<1x256xi1> to vector<4x256xi1>
    %66 = arith.select %65, %62, %63 : vector<4x256xi1>, vector<4x256xbf16>
    %67 = tpu.concatenate %60, %61, %66 in 0 : vector<4x256xbf16>, vector<4x256xbf16>, vector<4x256xbf16> -> vector<12x256xbf16>
    %68 = vector.extract_strided_slice %3 {offsets = [0, 24], sizes = [8, 12], strides = [1, 1]} : vector<8x36xbf16> to vector<8x12xbf16>
    %cst_16 = arith.constant dense<0.000000e+00> : vector<8x256xf32>
    %69 = tpu.matmul %68, %67, %cst_16 {dimension_numbers = #tpu.dot_dimension_numbers<[1], [0], [0], [1], [0, 0, 1, 1], [], []>} : vector<8x12xbf16>, vector<12x256xbf16>, vector<8x256xf32> -> vector<8x256xf32>
    %70 = arith.addf %55, %69 : vector<8x256xf32>
    %c0_17 = arith.constant 0 : index
    %c0_18 = arith.constant 0 : index
    %71 = vector.load %arg3[%c0_17, %c0_18] : memref<8x1xf32, #tpu.memory_space<vmem>>, vector<8x1xf32>
    %72 = vector.broadcast %71 : vector<8x1xf32> to vector<8x256xf32>
    %73 = arith.addf %70, %72 : vector<8x256xf32>
    %cst_19 = arith.constant 0.000000e+00 : f32
    %74 = vector.broadcast %cst_19 : f32 to vector<8x256xf32>
    %75 = arith.cmpf ogt, %73, %74 : vector<8x256xf32>
    %cst_20 = arith.constant 0.00999999977 : f32
    %76 = vector.broadcast %cst_20 : f32 to vector<8x256xf32>
    %77 = arith.mulf %76, %73 : vector<8x256xf32>
    %78 = arith.select %75, %73, %77 : vector<8x256xi1>, vector<8x256xf32>
    %79 = arith.truncf %78 : vector<8x256xf32> to vector<8x256xbf16>
    %c0_21 = arith.constant 0 : index
    %c0_22 = arith.constant 0 : index
    %80 = vector.load %arg4[%c0_21, %c0_22] : memref<8x72xbf16, #tpu.memory_space<vmem>>, vector<8x72xbf16>
    %81 = tpu.iota {dimensions = array<i32: 1>} : vector<1x256xi32>
    %c16_i32_23 = arith.constant 16 : i32
    %c0_i32_24 = arith.constant 0 : i32
    %82 = arith.cmpi eq, %c16_i32_23, %c0_i32_24 : i32
    %c1_i32_25 = arith.constant 1 : i32
    %83 = arith.select %82, %c1_i32_25, %c16_i32_23 : i32
    %84 = vector.broadcast %83 : i32 to vector<1x256xi32>
    %85 = arith.remsi %81, %84 : vector<1x256xi32>
    %c0_i32_26 = arith.constant 0 : i32
    %86 = vector.broadcast %c0_i32_26 : i32 to vector<1x256xi32>
    %87 = arith.cmpi ne, %85, %86 : vector<1x256xi32>
    %c0_i32_27 = arith.constant 0 : i32
    %88 = vector.broadcast %c0_i32_27 : i32 to vector<1x256xi32>
    %89 = arith.cmpi slt, %85, %88 : vector<1x256xi32>
    %c0_i32_28 = arith.constant 0 : i32
    %90 = arith.cmpi slt, %83, %c0_i32_28 : i32
    %91 = vector.broadcast %90 : i1 to vector<1x256xi1>
    %92 = vector.broadcast %91 : vector<1x256xi1> to vector<1x256xi1>
    %93 = arith.xori %89, %92 : vector<1x256xi1>
    %94 = arith.andi %93, %87 : vector<1x256xi1>
    %95 = vector.broadcast %83 : i32 to vector<1x256xi32>
    %96 = arith.addi %85, %95 : vector<1x256xi32>
    %97 = arith.select %94, %96, %85 : vector<1x256xi1>, vector<1x256xi32>
    %c0_i32_29 = arith.constant 0 : i32
    %98 = vector.broadcast %c0_i32_29 : i32 to vector<1x256xi32>
    %99 = arith.cmpi ne, %97, %98 : vector<1x256xi32>
    %c15_i32_30 = arith.constant 15 : i32
    %100 = vector.broadcast %c15_i32_30 : i32 to vector<1x256xi32>
    %101 = arith.cmpi ne, %97, %100 : vector<1x256xi32>
    %cst_31 = arith.constant 0.000000e+00 : bf16
    %102 = vector.broadcast %cst_31 : bf16 to vector<8x17xbf16>
    %103 = tpu.concatenate %102, %79, %102 in 1 : vector<8x17xbf16>, vector<8x256xbf16>, vector<8x17xbf16> -> vector<8x290xbf16>
    %104 = vector.extract_strided_slice %103 {offsets = [0, 0], sizes = [8, 256], strides = [1, 1]} : vector<8x290xbf16> to vector<8x256xbf16>
    %cst_32 = arith.constant 0.000000e+00 : bf16
    %105 = vector.broadcast %cst_32 : bf16 to vector<8x256xbf16>
    %106 = vector.shape_cast %99 : vector<1x256xi1> to vector<1x256xi1>
    %107 = vector.broadcast %106 : vector<1x256xi1> to vector<8x256xi1>
    %108 = arith.select %107, %104, %105 : vector<8x256xi1>, vector<8x256xbf16>
    %109 = vector.extract_strided_slice %103 {offsets = [0, 1], sizes = [8, 256], strides = [1, 1]} : vector<8x290xbf16> to vector<8x256xbf16>
    %110 = vector.extract_strided_slice %103 {offsets = [0, 2], sizes = [8, 256], strides = [1, 1]} : vector<8x290xbf16> to vector<8x256xbf16>
    %cst_33 = arith.constant 0.000000e+00 : bf16
    %111 = vector.broadcast %cst_33 : bf16 to vector<8x256xbf16>
    %112 = vector.shape_cast %101 : vector<1x256xi1> to vector<1x256xi1>
    %113 = vector.broadcast %112 : vector<1x256xi1> to vector<8x256xi1>
    %114 = arith.select %113, %110, %111 : vector<8x256xi1>, vector<8x256xbf16>
    %115 = tpu.concatenate %108, %109, %114 in 0 : vector<8x256xbf16>, vector<8x256xbf16>, vector<8x256xbf16> -> vector<24x256xbf16>
    %116 = vector.extract_strided_slice %80 {offsets = [0, 0], sizes = [8, 24], strides = [1, 1]} : vector<8x72xbf16> to vector<8x24xbf16>
    %cst_34 = arith.constant dense<0.000000e+00> : vector<8x256xf32>
    %117 = tpu.matmul %116, %115, %cst_34 {dimension_numbers = #tpu.dot_dimension_numbers<[1], [0], [0], [1], [0, 0, 1, 1], [], []>} : vector<8x24xbf16>, vector<24x256xbf16>, vector<8x256xf32> -> vector<8x256xf32>
    %118 = vector.extract_strided_slice %103 {offsets = [0, 16], sizes = [8, 256], strides = [1, 1]} : vector<8x290xbf16> to vector<8x256xbf16>
    %cst_35 = arith.constant 0.000000e+00 : bf16
    %119 = vector.broadcast %cst_35 : bf16 to vector<8x256xbf16>
    %120 = vector.shape_cast %99 : vector<1x256xi1> to vector<1x256xi1>
    %121 = vector.broadcast %120 : vector<1x256xi1> to vector<8x256xi1>
    %122 = arith.select %121, %118, %119 : vector<8x256xi1>, vector<8x256xbf16>
    %123 = vector.extract_strided_slice %103 {offsets = [0, 17], sizes = [8, 256], strides = [1, 1]} : vector<8x290xbf16> to vector<8x256xbf16>
    %124 = vector.extract_strided_slice %103 {offsets = [0, 18], sizes = [8, 256], strides = [1, 1]} : vector<8x290xbf16> to vector<8x256xbf16>
    %cst_36 = arith.constant 0.000000e+00 : bf16
    %125 = vector.broadcast %cst_36 : bf16 to vector<8x256xbf16>
    %126 = vector.shape_cast %101 : vector<1x256xi1> to vector<1x256xi1>
    %127 = vector.broadcast %126 : vector<1x256xi1> to vector<8x256xi1>
    %128 = arith.select %127, %124, %125 : vector<8x256xi1>, vector<8x256xbf16>
    %129 = tpu.concatenate %122, %123, %128 in 0 : vector<8x256xbf16>, vector<8x256xbf16>, vector<8x256xbf16> -> vector<24x256xbf16>
    %130 = vector.extract_strided_slice %80 {offsets = [0, 24], sizes = [8, 24], strides = [1, 1]} : vector<8x72xbf16> to vector<8x24xbf16>
    %cst_37 = arith.constant dense<0.000000e+00> : vector<8x256xf32>
    %131 = tpu.matmul %130, %129, %cst_37 {dimension_numbers = #tpu.dot_dimension_numbers<[1], [0], [0], [1], [0, 0, 1, 1], [], []>} : vector<8x24xbf16>, vector<24x256xbf16>, vector<8x256xf32> -> vector<8x256xf32>
    %132 = arith.addf %117, %131 : vector<8x256xf32>
    %133 = vector.extract_strided_slice %103 {offsets = [0, 32], sizes = [8, 256], strides = [1, 1]} : vector<8x290xbf16> to vector<8x256xbf16>
    %cst_38 = arith.constant 0.000000e+00 : bf16
    %134 = vector.broadcast %cst_38 : bf16 to vector<8x256xbf16>
    %135 = vector.shape_cast %99 : vector<1x256xi1> to vector<1x256xi1>
    %136 = vector.broadcast %135 : vector<1x256xi1> to vector<8x256xi1>
    %137 = arith.select %136, %133, %134 : vector<8x256xi1>, vector<8x256xbf16>
    %138 = vector.extract_strided_slice %103 {offsets = [0, 33], sizes = [8, 256], strides = [1, 1]} : vector<8x290xbf16> to vector<8x256xbf16>
    %139 = vector.extract_strided_slice %103 {offsets = [0, 34], sizes = [8, 256], strides = [1, 1]} : vector<8x290xbf16> to vector<8x256xbf16>
    %cst_39 = arith.constant 0.000000e+00 : bf16
    %140 = vector.broadcast %cst_39 : bf16 to vector<8x256xbf16>
    %141 = vector.shape_cast %101 : vector<1x256xi1> to vector<1x256xi1>
    %142 = vector.broadcast %141 : vector<1x256xi1> to vector<8x256xi1>
    %143 = arith.select %142, %139, %140 : vector<8x256xi1>, vector<8x256xbf16>
    %144 = tpu.concatenate %137, %138, %143 in 0 : vector<8x256xbf16>, vector<8x256xbf16>, vector<8x256xbf16> -> vector<24x256xbf16>
    %145 = vector.extract_strided_slice %80 {offsets = [0, 48], sizes = [8, 24], strides = [1, 1]} : vector<8x72xbf16> to vector<8x24xbf16>
    %cst_40 = arith.constant dense<0.000000e+00> : vector<8x256xf32>
    %146 = tpu.matmul %145, %144, %cst_40 {dimension_numbers = #tpu.dot_dimension_numbers<[1], [0], [0], [1], [0, 0, 1, 1], [], []>} : vector<8x24xbf16>, vector<24x256xbf16>, vector<8x256xf32> -> vector<8x256xf32>
    %147 = arith.addf %132, %146 : vector<8x256xf32>
    %cst_41 = arith.constant 0.000000e+00 : f32
    %148 = vector.broadcast %cst_41 : f32 to vector<8x256xf32>
    %149 = arith.cmpf ogt, %147, %148 : vector<8x256xf32>
    %cst_42 = arith.constant 0.000000e+00 : f32
    %150 = vector.broadcast %cst_42 : f32 to vector<8x256xf32>
    %151 = arith.minimumf %147, %150 : vector<8x256xf32>
    %152 = math.exp %151 : vector<8x256xf32>
    %cst_43 = arith.constant 1.000000e+00 : f32
    %153 = vector.broadcast %cst_43 : f32 to vector<8x256xf32>
    %154 = arith.subf %152, %153 : vector<8x256xf32>
    %155 = arith.select %149, %147, %154 : vector<8x256xi1>, vector<8x256xf32>
    %c0_44 = arith.constant 0 : index
    %c0_45 = arith.constant 0 : index
    %156 = vector.load %arg5[%c0_44, %c0_45] : memref<8x1xf32, #tpu.memory_space<vmem>>, vector<8x1xf32>
    %157 = vector.broadcast %156 : vector<8x1xf32> to vector<8x256xf32>
    %158 = arith.mulf %155, %157 : vector<8x256xf32>
    %c0_46 = arith.constant 0 : index
    %c0_47 = arith.constant 0 : index
    %159 = vector.load %arg6[%c0_46, %c0_47] : memref<8x1xf32, #tpu.memory_space<vmem>>, vector<8x1xf32>
    %160 = vector.broadcast %159 : vector<8x1xf32> to vector<8x256xf32>
    %161 = arith.addf %158, %160 : vector<8x256xf32>
    %162 = arith.truncf %161 : vector<8x256xf32> to vector<8x256xbf16>
    %c0_48 = arith.constant 0 : index
    %c0_49 = arith.constant 0 : index
    %163 = vector.load %arg7[%c0_48, %c0_49] : memref<8x72xbf16, #tpu.memory_space<vmem>>, vector<8x72xbf16>
    %164 = tpu.iota {dimensions = array<i32: 1>} : vector<1x256xi32>
    %c16_i32_50 = arith.constant 16 : i32
    %c0_i32_51 = arith.constant 0 : i32
    %165 = arith.cmpi eq, %c16_i32_50, %c0_i32_51 : i32
    %c1_i32_52 = arith.constant 1 : i32
    %166 = arith.select %165, %c1_i32_52, %c16_i32_50 : i32
    %167 = vector.broadcast %166 : i32 to vector<1x256xi32>
    %168 = arith.remsi %164, %167 : vector<1x256xi32>
    %c0_i32_53 = arith.constant 0 : i32
    %169 = vector.broadcast %c0_i32_53 : i32 to vector<1x256xi32>
    %170 = arith.cmpi ne, %168, %169 : vector<1x256xi32>
    %c0_i32_54 = arith.constant 0 : i32
    %171 = vector.broadcast %c0_i32_54 : i32 to vector<1x256xi32>
    %172 = arith.cmpi slt, %168, %171 : vector<1x256xi32>
    %c0_i32_55 = arith.constant 0 : i32
    %173 = arith.cmpi slt, %166, %c0_i32_55 : i32
    %174 = vector.broadcast %173 : i1 to vector<1x256xi1>
    %175 = vector.broadcast %174 : vector<1x256xi1> to vector<1x256xi1>
    %176 = arith.xori %172, %175 : vector<1x256xi1>
    %177 = arith.andi %176, %170 : vector<1x256xi1>
    %178 = vector.broadcast %166 : i32 to vector<1x256xi32>
    %179 = arith.addi %168, %178 : vector<1x256xi32>
    %180 = arith.select %177, %179, %168 : vector<1x256xi1>, vector<1x256xi32>
    %c0_i32_56 = arith.constant 0 : i32
    %181 = vector.broadcast %c0_i32_56 : i32 to vector<1x256xi32>
    %182 = arith.cmpi ne, %180, %181 : vector<1x256xi32>
    %c15_i32_57 = arith.constant 15 : i32
    %183 = vector.broadcast %c15_i32_57 : i32 to vector<1x256xi32>
    %184 = arith.cmpi ne, %180, %183 : vector<1x256xi32>
    %cst_58 = arith.constant 0.000000e+00 : bf16
    %185 = vector.broadcast %cst_58 : bf16 to vector<8x17xbf16>
    %186 = tpu.concatenate %185, %162, %185 in 1 : vector<8x17xbf16>, vector<8x256xbf16>, vector<8x17xbf16> -> vector<8x290xbf16>
    %187 = vector.extract_strided_slice %186 {offsets = [0, 0], sizes = [8, 256], strides = [1, 1]} : vector<8x290xbf16> to vector<8x256xbf16>
    %cst_59 = arith.constant 0.000000e+00 : bf16
    %188 = vector.broadcast %cst_59 : bf16 to vector<8x256xbf16>
    %189 = vector.shape_cast %182 : vector<1x256xi1> to vector<1x256xi1>
    %190 = vector.broadcast %189 : vector<1x256xi1> to vector<8x256xi1>
    %191 = arith.select %190, %187, %188 : vector<8x256xi1>, vector<8x256xbf16>
    %192 = vector.extract_strided_slice %186 {offsets = [0, 1], sizes = [8, 256], strides = [1, 1]} : vector<8x290xbf16> to vector<8x256xbf16>
    %193 = vector.extract_strided_slice %186 {offsets = [0, 2], sizes = [8, 256], strides = [1, 1]} : vector<8x290xbf16> to vector<8x256xbf16>
    %cst_60 = arith.constant 0.000000e+00 : bf16
    %194 = vector.broadcast %cst_60 : bf16 to vector<8x256xbf16>
    %195 = vector.shape_cast %184 : vector<1x256xi1> to vector<1x256xi1>
    %196 = vector.broadcast %195 : vector<1x256xi1> to vector<8x256xi1>
    %197 = arith.select %196, %193, %194 : vector<8x256xi1>, vector<8x256xbf16>
    %198 = tpu.concatenate %191, %192, %197 in 0 : vector<8x256xbf16>, vector<8x256xbf16>, vector<8x256xbf16> -> vector<24x256xbf16>
    %199 = vector.extract_strided_slice %163 {offsets = [0, 0], sizes = [8, 24], strides = [1, 1]} : vector<8x72xbf16> to vector<8x24xbf16>
    %cst_61 = arith.constant dense<0.000000e+00> : vector<8x256xf32>
    %200 = tpu.matmul %199, %198, %cst_61 {dimension_numbers = #tpu.dot_dimension_numbers<[1], [0], [0], [1], [0, 0, 1, 1], [], []>} : vector<8x24xbf16>, vector<24x256xbf16>, vector<8x256xf32> -> vector<8x256xf32>
    %201 = vector.extract_strided_slice %186 {offsets = [0, 16], sizes = [8, 256], strides = [1, 1]} : vector<8x290xbf16> to vector<8x256xbf16>
    %cst_62 = arith.constant 0.000000e+00 : bf16
    %202 = vector.broadcast %cst_62 : bf16 to vector<8x256xbf16>
    %203 = vector.shape_cast %182 : vector<1x256xi1> to vector<1x256xi1>
    %204 = vector.broadcast %203 : vector<1x256xi1> to vector<8x256xi1>
    %205 = arith.select %204, %201, %202 : vector<8x256xi1>, vector<8x256xbf16>
    %206 = vector.extract_strided_slice %186 {offsets = [0, 17], sizes = [8, 256], strides = [1, 1]} : vector<8x290xbf16> to vector<8x256xbf16>
    %207 = vector.extract_strided_slice %186 {offsets = [0, 18], sizes = [8, 256], strides = [1, 1]} : vector<8x290xbf16> to vector<8x256xbf16>
    %cst_63 = arith.constant 0.000000e+00 : bf16
    %208 = vector.broadcast %cst_63 : bf16 to vector<8x256xbf16>
    %209 = vector.shape_cast %184 : vector<1x256xi1> to vector<1x256xi1>
    %210 = vector.broadcast %209 : vector<1x256xi1> to vector<8x256xi1>
    %211 = arith.select %210, %207, %208 : vector<8x256xi1>, vector<8x256xbf16>
    %212 = tpu.concatenate %205, %206, %211 in 0 : vector<8x256xbf16>, vector<8x256xbf16>, vector<8x256xbf16> -> vector<24x256xbf16>
    %213 = vector.extract_strided_slice %163 {offsets = [0, 24], sizes = [8, 24], strides = [1, 1]} : vector<8x72xbf16> to vector<8x24xbf16>
    %cst_64 = arith.constant dense<0.000000e+00> : vector<8x256xf32>
    %214 = tpu.matmul %213, %212, %cst_64 {dimension_numbers = #tpu.dot_dimension_numbers<[1], [0], [0], [1], [0, 0, 1, 1], [], []>} : vector<8x24xbf16>, vector<24x256xbf16>, vector<8x256xf32> -> vector<8x256xf32>
    %215 = arith.addf %200, %214 : vector<8x256xf32>
    %216 = vector.extract_strided_slice %186 {offsets = [0, 32], sizes = [8, 256], strides = [1, 1]} : vector<8x290xbf16> to vector<8x256xbf16>
    %cst_65 = arith.constant 0.000000e+00 : bf16
    %217 = vector.broadcast %cst_65 : bf16 to vector<8x256xbf16>
    %218 = vector.shape_cast %182 : vector<1x256xi1> to vector<1x256xi1>
    %219 = vector.broadcast %218 : vector<1x256xi1> to vector<8x256xi1>
    %220 = arith.select %219, %216, %217 : vector<8x256xi1>, vector<8x256xbf16>
    %221 = vector.extract_strided_slice %186 {offsets = [0, 33], sizes = [8, 256], strides = [1, 1]} : vector<8x290xbf16> to vector<8x256xbf16>
    %222 = vector.extract_strided_slice %186 {offsets = [0, 34], sizes = [8, 256], strides = [1, 1]} : vector<8x290xbf16> to vector<8x256xbf16>
    %cst_66 = arith.constant 0.000000e+00 : bf16
    %223 = vector.broadcast %cst_66 : bf16 to vector<8x256xbf16>
    %224 = vector.shape_cast %184 : vector<1x256xi1> to vector<1x256xi1>
    %225 = vector.broadcast %224 : vector<1x256xi1> to vector<8x256xi1>
    %226 = arith.select %225, %222, %223 : vector<8x256xi1>, vector<8x256xbf16>
    %227 = tpu.concatenate %220, %221, %226 in 0 : vector<8x256xbf16>, vector<8x256xbf16>, vector<8x256xbf16> -> vector<24x256xbf16>
    %228 = vector.extract_strided_slice %163 {offsets = [0, 48], sizes = [8, 24], strides = [1, 1]} : vector<8x72xbf16> to vector<8x24xbf16>
    %cst_67 = arith.constant dense<0.000000e+00> : vector<8x256xf32>
    %229 = tpu.matmul %228, %227, %cst_67 {dimension_numbers = #tpu.dot_dimension_numbers<[1], [0], [0], [1], [0, 0, 1, 1], [], []>} : vector<8x24xbf16>, vector<24x256xbf16>, vector<8x256xf32> -> vector<8x256xf32>
    %230 = arith.addf %215, %229 : vector<8x256xf32>
    %cst_68 = arith.constant 0.000000e+00 : f32
    %231 = vector.broadcast %cst_68 : f32 to vector<8x256xf32>
    %232 = arith.cmpf ogt, %230, %231 : vector<8x256xf32>
    %cst_69 = arith.constant 0.000000e+00 : f32
    %233 = vector.broadcast %cst_69 : f32 to vector<8x256xf32>
    %234 = arith.minimumf %230, %233 : vector<8x256xf32>
    %235 = math.exp %234 : vector<8x256xf32>
    %cst_70 = arith.constant 1.000000e+00 : f32
    %236 = vector.broadcast %cst_70 : f32 to vector<8x256xf32>
    %237 = arith.subf %235, %236 : vector<8x256xf32>
    %238 = arith.select %232, %230, %237 : vector<8x256xi1>, vector<8x256xf32>
    %c0_71 = arith.constant 0 : index
    %c0_72 = arith.constant 0 : index
    %239 = vector.load %arg8[%c0_71, %c0_72] : memref<8x1xf32, #tpu.memory_space<vmem>>, vector<8x1xf32>
    %240 = vector.broadcast %239 : vector<8x1xf32> to vector<8x256xf32>
    %241 = arith.mulf %238, %240 : vector<8x256xf32>
    %c0_73 = arith.constant 0 : index
    %c0_74 = arith.constant 0 : index
    %242 = vector.load %arg9[%c0_73, %c0_74] : memref<8x1xf32, #tpu.memory_space<vmem>>, vector<8x1xf32>
    %243 = vector.broadcast %242 : vector<8x1xf32> to vector<8x256xf32>
    %244 = arith.addf %241, %243 : vector<8x256xf32>
    %245 = arith.truncf %244 : vector<8x256xf32> to vector<8x256xbf16>
    %c0_75 = arith.constant 0 : index
    %c0_76 = arith.constant 0 : index
    %c0_77 = arith.constant 0 : index
    %246 = vector.load %arg10[%c0_75, %c0_76, %c0_77] : memref<1x8x256xbf16, #tpu.memory_space<vmem>>, vector<1x8x256xbf16>
    %247 = vector.shape_cast %246 : vector<1x8x256xbf16> to vector<8x256xbf16>
    %248 = vector.shape_cast %245 : vector<8x256xbf16> to vector<1x8x256xbf16>
    tpu.vector_store %arg10[%c0_75, %c0_76, %c0_77], %248 {strides = array<i32>} : memref<1x8x256xbf16, #tpu.memory_space<vmem>>, vector<1x8x256xbf16>,
    return
  }
  func.func @transform_0(%arg0: i32) -> (i32, i32, i32) {
    %c0_i32 = arith.constant 0 : i32
    %c0_i32_0 = arith.constant 0 : i32
    %c0_i32_1 = arith.constant 0 : i32
    return %arg0, %c0_i32, %c0_i32_0 : i32, i32, i32
  }
  func.func @transform_1(%arg0: i32) -> (i32, i32) {
    %c0_i32 = arith.constant 0 : i32
    %c0_i32_0 = arith.constant 0 : i32
    %c0_i32_1 = arith.constant 0 : i32
    return %c0_i32, %c0_i32_0 : i32, i32
  }
  func.func @transform_2(%arg0: i32) -> (i32, i32) {
    %c0_i32 = arith.constant 0 : i32
    %c0_i32_0 = arith.constant 0 : i32
    %c0_i32_1 = arith.constant 0 : i32
    return %c0_i32, %c0_i32_0 : i32, i32
  }
  func.func @transform_3(%arg0: i32) -> (i32, i32) {
    %c0_i32 = arith.constant 0 : i32
    %c0_i32_0 = arith.constant 0 : i32
    %c0_i32_1 = arith.constant 0 : i32
    return %c0_i32, %c0_i32_0 : i32, i32
  }
  func.func @transform_4(%arg0: i32) -> (i32, i32) {
    %c0_i32 = arith.constant 0 : i32
    %c0_i32_0 = arith.constant 0 : i32
    %c0_i32_1 = arith.constant 0 : i32
    return %c0_i32, %c0_i32_0 : i32, i32
  }
  func.func @transform_5(%arg0: i32) -> (i32, i32) {
    %c0_i32 = arith.constant 0 : i32
    %c0_i32_0 = arith.constant 0 : i32
    %c0_i32_1 = arith.constant 0 : i32
    return %c0_i32, %c0_i32_0 : i32, i32
  }
  func.func @transform_6(%arg0: i32) -> (i32, i32) {
    %c0_i32 = arith.constant 0 : i32
    %c0_i32_0 = arith.constant 0 : i32
    %c0_i32_1 = arith.constant 0 : i32
    return %c0_i32, %c0_i32_0 : i32, i32
  }
  func.func @transform_7(%arg0: i32) -> (i32, i32) {
    %c0_i32 = arith.constant 0 : i32
    %c0_i32_0 = arith.constant 0 : i32
    %c0_i32_1 = arith.constant 0 : i32
    return %c0_i32, %c0_i32_0 : i32, i32
  }
  func.func @transform_8(%arg0: i32) -> (i32, i32) {
    %c0_i32 = arith.constant 0 : i32
    %c0_i32_0 = arith.constant 0 : i32
    %c0_i32_1 = arith.constant 0 : i32
    return %c0_i32, %c0_i32_0 : i32, i32
  }
  func.func @transform_9(%arg0: i32) -> (i32, i32, i32) {
    %c0_i32 = arith.constant 0 : i32
    %c0_i32_0 = arith.constant 0 : i32
    %c0_i32_1 = arith.constant 0 : i32
    return %arg0, %c0_i32, %c0_i32_0 : i32, i32, i32
  }
}

module attributes {stable_mosaic.version = 11 : i64} {
  func.func @_up_last_kernel(%arg0: i32, %arg1: memref<1x8x256xbf16, #tpu.memory_space<vmem>>, %arg2: memref<1x8x256xbf16, #tpu.memory_space<vmem>>, %arg3: memref<8x72xbf16, #tpu.memory_space<vmem>>, %arg4: memref<8x72xbf16, #tpu.memory_space<vmem>>, %arg5: memref<8x1xf32, #tpu.memory_space<vmem>>, %arg6: memref<8x1xf32, #tpu.memory_space<vmem>>, %arg7: memref<8x72xbf16, #tpu.memory_space<vmem>>, %arg8: memref<8x1xf32, #tpu.memory_space<vmem>>, %arg9: memref<8x1xf32, #tpu.memory_space<vmem>>, %arg10: memref<8x8xbf16, #tpu.memory_space<vmem>>, %arg11: memref<8x1xf32, #tpu.memory_space<vmem>>, %arg12: memref<1x8x256xf32, #tpu.memory_space<vmem>>) attributes {dimension_semantics = [#tpu.dimension_semantics<parallel>], iteration_bounds = array<i64: 2>, scalar_prefetch = 0 : i64, scratch_operands = 0 : i64, tpu.core_type = #tpu.core_type<tc>, window_params = [{transform_indices = @transform_0, window_bounds = array<i64: 1, 8, 256>}, {transform_indices = @transform_1, window_bounds = array<i64: 1, 8, 256>}, {pipeline_mode = #tpu.pipeline_mode<synchronous>, transform_indices = @transform_2, window_bounds = array<i64: 8, 72>}, {pipeline_mode = #tpu.pipeline_mode<synchronous>, transform_indices = @transform_3, window_bounds = array<i64: 8, 72>}, {pipeline_mode = #tpu.pipeline_mode<synchronous>, transform_indices = @transform_4, window_bounds = array<i64: 8, 1>}, {pipeline_mode = #tpu.pipeline_mode<synchronous>, transform_indices = @transform_5, window_bounds = array<i64: 8, 1>}, {pipeline_mode = #tpu.pipeline_mode<synchronous>, transform_indices = @transform_6, window_bounds = array<i64: 8, 72>}, {pipeline_mode = #tpu.pipeline_mode<synchronous>, transform_indices = @transform_7, window_bounds = array<i64: 8, 1>}, {pipeline_mode = #tpu.pipeline_mode<synchronous>, transform_indices = @transform_8, window_bounds = array<i64: 8, 1>}, {pipeline_mode = #tpu.pipeline_mode<synchronous>, transform_indices = @transform_9, window_bounds = array<i64: 8, 8>}, {pipeline_mode = #tpu.pipeline_mode<synchronous>, transform_indices = @transform_10, window_bounds = array<i64: 8, 1>}, {transform_indices = @transform_11, window_bounds = array<i64: 1, 8, 256>}]} {
    %c0 = arith.constant 0 : index
    %c0_0 = arith.constant 0 : index
    %c0_1 = arith.constant 0 : index
    %0 = vector.load %arg1[%c0, %c0_0, %c0_1] : memref<1x8x256xbf16, #tpu.memory_space<vmem>>, vector<1x8x256xbf16>
    %1 = vector.shape_cast %0 : vector<1x8x256xbf16> to vector<8x256xbf16>
    %c0_2 = arith.constant 0 : index
    %c0_3 = arith.constant 0 : index
    %2 = vector.load %arg3[%c0_2, %c0_3] : memref<8x72xbf16, #tpu.memory_space<vmem>>, vector<8x72xbf16>
    %3 = tpu.iota {dimensions = array<i32: 1>} : vector<1x256xi32>
    %c16_i32 = arith.constant 16 : i32
    %c0_i32 = arith.constant 0 : i32
    %4 = arith.cmpi eq, %c16_i32, %c0_i32 : i32
    %c1_i32 = arith.constant 1 : i32
    %5 = arith.select %4, %c1_i32, %c16_i32 : i32
    %6 = vector.broadcast %5 : i32 to vector<1x256xi32>
    %7 = arith.remsi %3, %6 : vector<1x256xi32>
    %c0_i32_4 = arith.constant 0 : i32
    %8 = vector.broadcast %c0_i32_4 : i32 to vector<1x256xi32>
    %9 = arith.cmpi ne, %7, %8 : vector<1x256xi32>
    %c0_i32_5 = arith.constant 0 : i32
    %10 = vector.broadcast %c0_i32_5 : i32 to vector<1x256xi32>
    %11 = arith.cmpi slt, %7, %10 : vector<1x256xi32>
    %c0_i32_6 = arith.constant 0 : i32
    %12 = arith.cmpi slt, %5, %c0_i32_6 : i32
    %13 = vector.broadcast %12 : i1 to vector<1x256xi1>
    %14 = vector.broadcast %13 : vector<1x256xi1> to vector<1x256xi1>
    %15 = arith.xori %11, %14 : vector<1x256xi1>
    %16 = arith.andi %15, %9 : vector<1x256xi1>
    %17 = vector.broadcast %5 : i32 to vector<1x256xi32>
    %18 = arith.addi %7, %17 : vector<1x256xi32>
    %19 = arith.select %16, %18, %7 : vector<1x256xi1>, vector<1x256xi32>
    %c0_i32_7 = arith.constant 0 : i32
    %20 = vector.broadcast %c0_i32_7 : i32 to vector<1x256xi32>
    %21 = arith.cmpi ne, %19, %20 : vector<1x256xi32>
    %c15_i32 = arith.constant 15 : i32
    %22 = vector.broadcast %c15_i32 : i32 to vector<1x256xi32>
    %23 = arith.cmpi ne, %19, %22 : vector<1x256xi32>
    %cst = arith.constant 0.000000e+00 : bf16
    %24 = vector.broadcast %cst : bf16 to vector<8x17xbf16>
    %25 = tpu.concatenate %24, %1, %24 in 1 : vector<8x17xbf16>, vector<8x256xbf16>, vector<8x17xbf16> -> vector<8x290xbf16>
    %26 = vector.extract_strided_slice %25 {offsets = [0, 0], sizes = [8, 256], strides = [1, 1]} : vector<8x290xbf16> to vector<8x256xbf16>
    %cst_8 = arith.constant 0.000000e+00 : bf16
    %27 = vector.broadcast %cst_8 : bf16 to vector<8x256xbf16>
    %28 = vector.shape_cast %21 : vector<1x256xi1> to vector<1x256xi1>
    %29 = vector.broadcast %28 : vector<1x256xi1> to vector<8x256xi1>
    %30 = arith.select %29, %26, %27 : vector<8x256xi1>, vector<8x256xbf16>
    %31 = vector.extract_strided_slice %25 {offsets = [0, 1], sizes = [8, 256], strides = [1, 1]} : vector<8x290xbf16> to vector<8x256xbf16>
    %32 = vector.extract_strided_slice %25 {offsets = [0, 2], sizes = [8, 256], strides = [1, 1]} : vector<8x290xbf16> to vector<8x256xbf16>
    %cst_9 = arith.constant 0.000000e+00 : bf16
    %33 = vector.broadcast %cst_9 : bf16 to vector<8x256xbf16>
    %34 = vector.shape_cast %23 : vector<1x256xi1> to vector<1x256xi1>
    %35 = vector.broadcast %34 : vector<1x256xi1> to vector<8x256xi1>
    %36 = arith.select %35, %32, %33 : vector<8x256xi1>, vector<8x256xbf16>
    %37 = tpu.concatenate %30, %31, %36 in 0 : vector<8x256xbf16>, vector<8x256xbf16>, vector<8x256xbf16> -> vector<24x256xbf16>
    %38 = vector.extract_strided_slice %2 {offsets = [0, 0], sizes = [8, 24], strides = [1, 1]} : vector<8x72xbf16> to vector<8x24xbf16>
    %cst_10 = arith.constant dense<0.000000e+00> : vector<8x256xf32>
    %39 = tpu.matmul %38, %37, %cst_10 {dimension_numbers = #tpu.dot_dimension_numbers<[1], [0], [0], [1], [0, 0, 1, 1], [], []>} : vector<8x24xbf16>, vector<24x256xbf16>, vector<8x256xf32> -> vector<8x256xf32>
    %40 = vector.extract_strided_slice %25 {offsets = [0, 16], sizes = [8, 256], strides = [1, 1]} : vector<8x290xbf16> to vector<8x256xbf16>
    %cst_11 = arith.constant 0.000000e+00 : bf16
    %41 = vector.broadcast %cst_11 : bf16 to vector<8x256xbf16>
    %42 = vector.shape_cast %21 : vector<1x256xi1> to vector<1x256xi1>
    %43 = vector.broadcast %42 : vector<1x256xi1> to vector<8x256xi1>
    %44 = arith.select %43, %40, %41 : vector<8x256xi1>, vector<8x256xbf16>
    %45 = vector.extract_strided_slice %25 {offsets = [0, 17], sizes = [8, 256], strides = [1, 1]} : vector<8x290xbf16> to vector<8x256xbf16>
    %46 = vector.extract_strided_slice %25 {offsets = [0, 18], sizes = [8, 256], strides = [1, 1]} : vector<8x290xbf16> to vector<8x256xbf16>
    %cst_12 = arith.constant 0.000000e+00 : bf16
    %47 = vector.broadcast %cst_12 : bf16 to vector<8x256xbf16>
    %48 = vector.shape_cast %23 : vector<1x256xi1> to vector<1x256xi1>
    %49 = vector.broadcast %48 : vector<1x256xi1> to vector<8x256xi1>
    %50 = arith.select %49, %46, %47 : vector<8x256xi1>, vector<8x256xbf16>
    %51 = tpu.concatenate %44, %45, %50 in 0 : vector<8x256xbf16>, vector<8x256xbf16>, vector<8x256xbf16> -> vector<24x256xbf16>
    %52 = vector.extract_strided_slice %2 {offsets = [0, 24], sizes = [8, 24], strides = [1, 1]} : vector<8x72xbf16> to vector<8x24xbf16>
    %cst_13 = arith.constant dense<0.000000e+00> : vector<8x256xf32>
    %53 = tpu.matmul %52, %51, %cst_13 {dimension_numbers = #tpu.dot_dimension_numbers<[1], [0], [0], [1], [0, 0, 1, 1], [], []>} : vector<8x24xbf16>, vector<24x256xbf16>, vector<8x256xf32> -> vector<8x256xf32>
    %54 = arith.addf %39, %53 : vector<8x256xf32>
    %55 = vector.extract_strided_slice %25 {offsets = [0, 32], sizes = [8, 256], strides = [1, 1]} : vector<8x290xbf16> to vector<8x256xbf16>
    %cst_14 = arith.constant 0.000000e+00 : bf16
    %56 = vector.broadcast %cst_14 : bf16 to vector<8x256xbf16>
    %57 = vector.shape_cast %21 : vector<1x256xi1> to vector<1x256xi1>
    %58 = vector.broadcast %57 : vector<1x256xi1> to vector<8x256xi1>
    %59 = arith.select %58, %55, %56 : vector<8x256xi1>, vector<8x256xbf16>
    %60 = vector.extract_strided_slice %25 {offsets = [0, 33], sizes = [8, 256], strides = [1, 1]} : vector<8x290xbf16> to vector<8x256xbf16>
    %61 = vector.extract_strided_slice %25 {offsets = [0, 34], sizes = [8, 256], strides = [1, 1]} : vector<8x290xbf16> to vector<8x256xbf16>
    %cst_15 = arith.constant 0.000000e+00 : bf16
    %62 = vector.broadcast %cst_15 : bf16 to vector<8x256xbf16>
    %63 = vector.shape_cast %23 : vector<1x256xi1> to vector<1x256xi1>
    %64 = vector.broadcast %63 : vector<1x256xi1> to vector<8x256xi1>
    %65 = arith.select %64, %61, %62 : vector<8x256xi1>, vector<8x256xbf16>
    %66 = tpu.concatenate %59, %60, %65 in 0 : vector<8x256xbf16>, vector<8x256xbf16>, vector<8x256xbf16> -> vector<24x256xbf16>
    %67 = vector.extract_strided_slice %2 {offsets = [0, 48], sizes = [8, 24], strides = [1, 1]} : vector<8x72xbf16> to vector<8x24xbf16>
    %cst_16 = arith.constant dense<0.000000e+00> : vector<8x256xf32>
    %68 = tpu.matmul %67, %66, %cst_16 {dimension_numbers = #tpu.dot_dimension_numbers<[1], [0], [0], [1], [0, 0, 1, 1], [], []>} : vector<8x24xbf16>, vector<24x256xbf16>, vector<8x256xf32> -> vector<8x256xf32>
    %69 = arith.addf %54, %68 : vector<8x256xf32>
    %c0_17 = arith.constant 0 : index
    %c0_18 = arith.constant 0 : index
    %c0_19 = arith.constant 0 : index
    %70 = vector.load %arg2[%c0_17, %c0_18, %c0_19] : memref<1x8x256xbf16, #tpu.memory_space<vmem>>, vector<1x8x256xbf16>
    %71 = vector.shape_cast %70 : vector<1x8x256xbf16> to vector<8x256xbf16>
    %c0_20 = arith.constant 0 : index
    %c0_21 = arith.constant 0 : index
    %72 = vector.load %arg4[%c0_20, %c0_21] : memref<8x72xbf16, #tpu.memory_space<vmem>>, vector<8x72xbf16>
    %73 = tpu.iota {dimensions = array<i32: 1>} : vector<1x256xi32>
    %c16_i32_22 = arith.constant 16 : i32
    %c0_i32_23 = arith.constant 0 : i32
    %74 = arith.cmpi eq, %c16_i32_22, %c0_i32_23 : i32
    %c1_i32_24 = arith.constant 1 : i32
    %75 = arith.select %74, %c1_i32_24, %c16_i32_22 : i32
    %76 = vector.broadcast %75 : i32 to vector<1x256xi32>
    %77 = arith.remsi %73, %76 : vector<1x256xi32>
    %c0_i32_25 = arith.constant 0 : i32
    %78 = vector.broadcast %c0_i32_25 : i32 to vector<1x256xi32>
    %79 = arith.cmpi ne, %77, %78 : vector<1x256xi32>
    %c0_i32_26 = arith.constant 0 : i32
    %80 = vector.broadcast %c0_i32_26 : i32 to vector<1x256xi32>
    %81 = arith.cmpi slt, %77, %80 : vector<1x256xi32>
    %c0_i32_27 = arith.constant 0 : i32
    %82 = arith.cmpi slt, %75, %c0_i32_27 : i32
    %83 = vector.broadcast %82 : i1 to vector<1x256xi1>
    %84 = vector.broadcast %83 : vector<1x256xi1> to vector<1x256xi1>
    %85 = arith.xori %81, %84 : vector<1x256xi1>
    %86 = arith.andi %85, %79 : vector<1x256xi1>
    %87 = vector.broadcast %75 : i32 to vector<1x256xi32>
    %88 = arith.addi %77, %87 : vector<1x256xi32>
    %89 = arith.select %86, %88, %77 : vector<1x256xi1>, vector<1x256xi32>
    %c0_i32_28 = arith.constant 0 : i32
    %90 = vector.broadcast %c0_i32_28 : i32 to vector<1x256xi32>
    %91 = arith.cmpi ne, %89, %90 : vector<1x256xi32>
    %c15_i32_29 = arith.constant 15 : i32
    %92 = vector.broadcast %c15_i32_29 : i32 to vector<1x256xi32>
    %93 = arith.cmpi ne, %89, %92 : vector<1x256xi32>
    %cst_30 = arith.constant 0.000000e+00 : bf16
    %94 = vector.broadcast %cst_30 : bf16 to vector<8x17xbf16>
    %95 = tpu.concatenate %94, %71, %94 in 1 : vector<8x17xbf16>, vector<8x256xbf16>, vector<8x17xbf16> -> vector<8x290xbf16>
    %96 = vector.extract_strided_slice %95 {offsets = [0, 0], sizes = [8, 256], strides = [1, 1]} : vector<8x290xbf16> to vector<8x256xbf16>
    %cst_31 = arith.constant 0.000000e+00 : bf16
    %97 = vector.broadcast %cst_31 : bf16 to vector<8x256xbf16>
    %98 = vector.shape_cast %91 : vector<1x256xi1> to vector<1x256xi1>
    %99 = vector.broadcast %98 : vector<1x256xi1> to vector<8x256xi1>
    %100 = arith.select %99, %96, %97 : vector<8x256xi1>, vector<8x256xbf16>
    %101 = vector.extract_strided_slice %95 {offsets = [0, 1], sizes = [8, 256], strides = [1, 1]} : vector<8x290xbf16> to vector<8x256xbf16>
    %102 = vector.extract_strided_slice %95 {offsets = [0, 2], sizes = [8, 256], strides = [1, 1]} : vector<8x290xbf16> to vector<8x256xbf16>
    %cst_32 = arith.constant 0.000000e+00 : bf16
    %103 = vector.broadcast %cst_32 : bf16 to vector<8x256xbf16>
    %104 = vector.shape_cast %93 : vector<1x256xi1> to vector<1x256xi1>
    %105 = vector.broadcast %104 : vector<1x256xi1> to vector<8x256xi1>
    %106 = arith.select %105, %102, %103 : vector<8x256xi1>, vector<8x256xbf16>
    %107 = tpu.concatenate %100, %101, %106 in 0 : vector<8x256xbf16>, vector<8x256xbf16>, vector<8x256xbf16> -> vector<24x256xbf16>
    %108 = vector.extract_strided_slice %72 {offsets = [0, 0], sizes = [8, 24], strides = [1, 1]} : vector<8x72xbf16> to vector<8x24xbf16>
    %cst_33 = arith.constant dense<0.000000e+00> : vector<8x256xf32>
    %109 = tpu.matmul %108, %107, %cst_33 {dimension_numbers = #tpu.dot_dimension_numbers<[1], [0], [0], [1], [0, 0, 1, 1], [], []>} : vector<8x24xbf16>, vector<24x256xbf16>, vector<8x256xf32> -> vector<8x256xf32>
    %110 = vector.extract_strided_slice %95 {offsets = [0, 16], sizes = [8, 256], strides = [1, 1]} : vector<8x290xbf16> to vector<8x256xbf16>
    %cst_34 = arith.constant 0.000000e+00 : bf16
    %111 = vector.broadcast %cst_34 : bf16 to vector<8x256xbf16>
    %112 = vector.shape_cast %91 : vector<1x256xi1> to vector<1x256xi1>
    %113 = vector.broadcast %112 : vector<1x256xi1> to vector<8x256xi1>
    %114 = arith.select %113, %110, %111 : vector<8x256xi1>, vector<8x256xbf16>
    %115 = vector.extract_strided_slice %95 {offsets = [0, 17], sizes = [8, 256], strides = [1, 1]} : vector<8x290xbf16> to vector<8x256xbf16>
    %116 = vector.extract_strided_slice %95 {offsets = [0, 18], sizes = [8, 256], strides = [1, 1]} : vector<8x290xbf16> to vector<8x256xbf16>
    %cst_35 = arith.constant 0.000000e+00 : bf16
    %117 = vector.broadcast %cst_35 : bf16 to vector<8x256xbf16>
    %118 = vector.shape_cast %93 : vector<1x256xi1> to vector<1x256xi1>
    %119 = vector.broadcast %118 : vector<1x256xi1> to vector<8x256xi1>
    %120 = arith.select %119, %116, %117 : vector<8x256xi1>, vector<8x256xbf16>
    %121 = tpu.concatenate %114, %115, %120 in 0 : vector<8x256xbf16>, vector<8x256xbf16>, vector<8x256xbf16> -> vector<24x256xbf16>
    %122 = vector.extract_strided_slice %72 {offsets = [0, 24], sizes = [8, 24], strides = [1, 1]} : vector<8x72xbf16> to vector<8x24xbf16>
    %cst_36 = arith.constant dense<0.000000e+00> : vector<8x256xf32>
    %123 = tpu.matmul %122, %121, %cst_36 {dimension_numbers = #tpu.dot_dimension_numbers<[1], [0], [0], [1], [0, 0, 1, 1], [], []>} : vector<8x24xbf16>, vector<24x256xbf16>, vector<8x256xf32> -> vector<8x256xf32>
    %124 = arith.addf %109, %123 : vector<8x256xf32>
    %125 = vector.extract_strided_slice %95 {offsets = [0, 32], sizes = [8, 256], strides = [1, 1]} : vector<8x290xbf16> to vector<8x256xbf16>
    %cst_37 = arith.constant 0.000000e+00 : bf16
    %126 = vector.broadcast %cst_37 : bf16 to vector<8x256xbf16>
    %127 = vector.shape_cast %91 : vector<1x256xi1> to vector<1x256xi1>
    %128 = vector.broadcast %127 : vector<1x256xi1> to vector<8x256xi1>
    %129 = arith.select %128, %125, %126 : vector<8x256xi1>, vector<8x256xbf16>
    %130 = vector.extract_strided_slice %95 {offsets = [0, 33], sizes = [8, 256], strides = [1, 1]} : vector<8x290xbf16> to vector<8x256xbf16>
    %131 = vector.extract_strided_slice %95 {offsets = [0, 34], sizes = [8, 256], strides = [1, 1]} : vector<8x290xbf16> to vector<8x256xbf16>
    %cst_38 = arith.constant 0.000000e+00 : bf16
    %132 = vector.broadcast %cst_38 : bf16 to vector<8x256xbf16>
    %133 = vector.shape_cast %93 : vector<1x256xi1> to vector<1x256xi1>
    %134 = vector.broadcast %133 : vector<1x256xi1> to vector<8x256xi1>
    %135 = arith.select %134, %131, %132 : vector<8x256xi1>, vector<8x256xbf16>
    %136 = tpu.concatenate %129, %130, %135 in 0 : vector<8x256xbf16>, vector<8x256xbf16>, vector<8x256xbf16> -> vector<24x256xbf16>
    %137 = vector.extract_strided_slice %72 {offsets = [0, 48], sizes = [8, 24], strides = [1, 1]} : vector<8x72xbf16> to vector<8x24xbf16>
    %cst_39 = arith.constant dense<0.000000e+00> : vector<8x256xf32>
    %138 = tpu.matmul %137, %136, %cst_39 {dimension_numbers = #tpu.dot_dimension_numbers<[1], [0], [0], [1], [0, 0, 1, 1], [], []>} : vector<8x24xbf16>, vector<24x256xbf16>, vector<8x256xf32> -> vector<8x256xf32>
    %139 = arith.addf %124, %138 : vector<8x256xf32>
    %140 = arith.addf %69, %139 : vector<8x256xf32>
    %cst_40 = arith.constant 0.000000e+00 : f32
    %141 = vector.broadcast %cst_40 : f32 to vector<8x256xf32>
    %142 = arith.cmpf ogt, %140, %141 : vector<8x256xf32>
    %cst_41 = arith.constant 0.000000e+00 : f32
    %143 = vector.broadcast %cst_41 : f32 to vector<8x256xf32>
    %144 = arith.minimumf %140, %143 : vector<8x256xf32>
    %145 = math.exp %144 : vector<8x256xf32>
    %cst_42 = arith.constant 1.000000e+00 : f32
    %146 = vector.broadcast %cst_42 : f32 to vector<8x256xf32>
    %147 = arith.subf %145, %146 : vector<8x256xf32>
    %148 = arith.select %142, %140, %147 : vector<8x256xi1>, vector<8x256xf32>
    %c0_43 = arith.constant 0 : index
    %c0_44 = arith.constant 0 : index
    %149 = vector.load %arg5[%c0_43, %c0_44] : memref<8x1xf32, #tpu.memory_space<vmem>>, vector<8x1xf32>
    %150 = vector.broadcast %149 : vector<8x1xf32> to vector<8x256xf32>
    %151 = arith.mulf %148, %150 : vector<8x256xf32>
    %c0_45 = arith.constant 0 : index
    %c0_46 = arith.constant 0 : index
    %152 = vector.load %arg6[%c0_45, %c0_46] : memref<8x1xf32, #tpu.memory_space<vmem>>, vector<8x1xf32>
    %153 = vector.broadcast %152 : vector<8x1xf32> to vector<8x256xf32>
    %154 = arith.addf %151, %153 : vector<8x256xf32>
    %155 = arith.truncf %154 : vector<8x256xf32> to vector<8x256xbf16>
    %c0_47 = arith.constant 0 : index
    %c0_48 = arith.constant 0 : index
    %156 = vector.load %arg7[%c0_47, %c0_48] : memref<8x72xbf16, #tpu.memory_space<vmem>>, vector<8x72xbf16>
    %157 = tpu.iota {dimensions = array<i32: 1>} : vector<1x256xi32>
    %c16_i32_49 = arith.constant 16 : i32
    %c0_i32_50 = arith.constant 0 : i32
    %158 = arith.cmpi eq, %c16_i32_49, %c0_i32_50 : i32
    %c1_i32_51 = arith.constant 1 : i32
    %159 = arith.select %158, %c1_i32_51, %c16_i32_49 : i32
    %160 = vector.broadcast %159 : i32 to vector<1x256xi32>
    %161 = arith.remsi %157, %160 : vector<1x256xi32>
    %c0_i32_52 = arith.constant 0 : i32
    %162 = vector.broadcast %c0_i32_52 : i32 to vector<1x256xi32>
    %163 = arith.cmpi ne, %161, %162 : vector<1x256xi32>
    %c0_i32_53 = arith.constant 0 : i32
    %164 = vector.broadcast %c0_i32_53 : i32 to vector<1x256xi32>
    %165 = arith.cmpi slt, %161, %164 : vector<1x256xi32>
    %c0_i32_54 = arith.constant 0 : i32
    %166 = arith.cmpi slt, %159, %c0_i32_54 : i32
    %167 = vector.broadcast %166 : i1 to vector<1x256xi1>
    %168 = vector.broadcast %167 : vector<1x256xi1> to vector<1x256xi1>
    %169 = arith.xori %165, %168 : vector<1x256xi1>
    %170 = arith.andi %169, %163 : vector<1x256xi1>
    %171 = vector.broadcast %159 : i32 to vector<1x256xi32>
    %172 = arith.addi %161, %171 : vector<1x256xi32>
    %173 = arith.select %170, %172, %161 : vector<1x256xi1>, vector<1x256xi32>
    %c0_i32_55 = arith.constant 0 : i32
    %174 = vector.broadcast %c0_i32_55 : i32 to vector<1x256xi32>
    %175 = arith.cmpi ne, %173, %174 : vector<1x256xi32>
    %c15_i32_56 = arith.constant 15 : i32
    %176 = vector.broadcast %c15_i32_56 : i32 to vector<1x256xi32>
    %177 = arith.cmpi ne, %173, %176 : vector<1x256xi32>
    %cst_57 = arith.constant 0.000000e+00 : bf16
    %178 = vector.broadcast %cst_57 : bf16 to vector<8x17xbf16>
    %179 = tpu.concatenate %178, %155, %178 in 1 : vector<8x17xbf16>, vector<8x256xbf16>, vector<8x17xbf16> -> vector<8x290xbf16>
    %180 = vector.extract_strided_slice %179 {offsets = [0, 0], sizes = [8, 256], strides = [1, 1]} : vector<8x290xbf16> to vector<8x256xbf16>
    %cst_58 = arith.constant 0.000000e+00 : bf16
    %181 = vector.broadcast %cst_58 : bf16 to vector<8x256xbf16>
    %182 = vector.shape_cast %175 : vector<1x256xi1> to vector<1x256xi1>
    %183 = vector.broadcast %182 : vector<1x256xi1> to vector<8x256xi1>
    %184 = arith.select %183, %180, %181 : vector<8x256xi1>, vector<8x256xbf16>
    %185 = vector.extract_strided_slice %179 {offsets = [0, 1], sizes = [8, 256], strides = [1, 1]} : vector<8x290xbf16> to vector<8x256xbf16>
    %186 = vector.extract_strided_slice %179 {offsets = [0, 2], sizes = [8, 256], strides = [1, 1]} : vector<8x290xbf16> to vector<8x256xbf16>
    %cst_59 = arith.constant 0.000000e+00 : bf16
    %187 = vector.broadcast %cst_59 : bf16 to vector<8x256xbf16>
    %188 = vector.shape_cast %177 : vector<1x256xi1> to vector<1x256xi1>
    %189 = vector.broadcast %188 : vector<1x256xi1> to vector<8x256xi1>
    %190 = arith.select %189, %186, %187 : vector<8x256xi1>, vector<8x256xbf16>
    %191 = tpu.concatenate %184, %185, %190 in 0 : vector<8x256xbf16>, vector<8x256xbf16>, vector<8x256xbf16> -> vector<24x256xbf16>
    %192 = vector.extract_strided_slice %156 {offsets = [0, 0], sizes = [8, 24], strides = [1, 1]} : vector<8x72xbf16> to vector<8x24xbf16>
    %cst_60 = arith.constant dense<0.000000e+00> : vector<8x256xf32>
    %193 = tpu.matmul %192, %191, %cst_60 {dimension_numbers = #tpu.dot_dimension_numbers<[1], [0], [0], [1], [0, 0, 1, 1], [], []>} : vector<8x24xbf16>, vector<24x256xbf16>, vector<8x256xf32> -> vector<8x256xf32>
    %194 = vector.extract_strided_slice %179 {offsets = [0, 16], sizes = [8, 256], strides = [1, 1]} : vector<8x290xbf16> to vector<8x256xbf16>
    %cst_61 = arith.constant 0.000000e+00 : bf16
    %195 = vector.broadcast %cst_61 : bf16 to vector<8x256xbf16>
    %196 = vector.shape_cast %175 : vector<1x256xi1> to vector<1x256xi1>
    %197 = vector.broadcast %196 : vector<1x256xi1> to vector<8x256xi1>
    %198 = arith.select %197, %194, %195 : vector<8x256xi1>, vector<8x256xbf16>
    %199 = vector.extract_strided_slice %179 {offsets = [0, 17], sizes = [8, 256], strides = [1, 1]} : vector<8x290xbf16> to vector<8x256xbf16>
    %200 = vector.extract_strided_slice %179 {offsets = [0, 18], sizes = [8, 256], strides = [1, 1]} : vector<8x290xbf16> to vector<8x256xbf16>
    %cst_62 = arith.constant 0.000000e+00 : bf16
    %201 = vector.broadcast %cst_62 : bf16 to vector<8x256xbf16>
    %202 = vector.shape_cast %177 : vector<1x256xi1> to vector<1x256xi1>
    %203 = vector.broadcast %202 : vector<1x256xi1> to vector<8x256xi1>
    %204 = arith.select %203, %200, %201 : vector<8x256xi1>, vector<8x256xbf16>
    %205 = tpu.concatenate %198, %199, %204 in 0 : vector<8x256xbf16>, vector<8x256xbf16>, vector<8x256xbf16> -> vector<24x256xbf16>
    %206 = vector.extract_strided_slice %156 {offsets = [0, 24], sizes = [8, 24], strides = [1, 1]} : vector<8x72xbf16> to vector<8x24xbf16>
    %cst_63 = arith.constant dense<0.000000e+00> : vector<8x256xf32>
    %207 = tpu.matmul %206, %205, %cst_63 {dimension_numbers = #tpu.dot_dimension_numbers<[1], [0], [0], [1], [0, 0, 1, 1], [], []>} : vector<8x24xbf16>, vector<24x256xbf16>, vector<8x256xf32> -> vector<8x256xf32>
    %208 = arith.addf %193, %207 : vector<8x256xf32>
    %209 = vector.extract_strided_slice %179 {offsets = [0, 32], sizes = [8, 256], strides = [1, 1]} : vector<8x290xbf16> to vector<8x256xbf16>
    %cst_64 = arith.constant 0.000000e+00 : bf16
    %210 = vector.broadcast %cst_64 : bf16 to vector<8x256xbf16>
    %211 = vector.shape_cast %175 : vector<1x256xi1> to vector<1x256xi1>
    %212 = vector.broadcast %211 : vector<1x256xi1> to vector<8x256xi1>
    %213 = arith.select %212, %209, %210 : vector<8x256xi1>, vector<8x256xbf16>
    %214 = vector.extract_strided_slice %179 {offsets = [0, 33], sizes = [8, 256], strides = [1, 1]} : vector<8x290xbf16> to vector<8x256xbf16>
    %215 = vector.extract_strided_slice %179 {offsets = [0, 34], sizes = [8, 256], strides = [1, 1]} : vector<8x290xbf16> to vector<8x256xbf16>
    %cst_65 = arith.constant 0.000000e+00 : bf16
    %216 = vector.broadcast %cst_65 : bf16 to vector<8x256xbf16>
    %217 = vector.shape_cast %177 : vector<1x256xi1> to vector<1x256xi1>
    %218 = vector.broadcast %217 : vector<1x256xi1> to vector<8x256xi1>
    %219 = arith.select %218, %215, %216 : vector<8x256xi1>, vector<8x256xbf16>
    %220 = tpu.concatenate %213, %214, %219 in 0 : vector<8x256xbf16>, vector<8x256xbf16>, vector<8x256xbf16> -> vector<24x256xbf16>
    %221 = vector.extract_strided_slice %156 {offsets = [0, 48], sizes = [8, 24], strides = [1, 1]} : vector<8x72xbf16> to vector<8x24xbf16>
    %cst_66 = arith.constant dense<0.000000e+00> : vector<8x256xf32>
    %222 = tpu.matmul %221, %220, %cst_66 {dimension_numbers = #tpu.dot_dimension_numbers<[1], [0], [0], [1], [0, 0, 1, 1], [], []>} : vector<8x24xbf16>, vector<24x256xbf16>, vector<8x256xf32> -> vector<8x256xf32>
    %223 = arith.addf %208, %222 : vector<8x256xf32>
    %cst_67 = arith.constant 0.000000e+00 : f32
    %224 = vector.broadcast %cst_67 : f32 to vector<8x256xf32>
    %225 = arith.cmpf ogt, %223, %224 : vector<8x256xf32>
    %cst_68 = arith.constant 0.000000e+00 : f32
    %226 = vector.broadcast %cst_68 : f32 to vector<8x256xf32>
    %227 = arith.minimumf %223, %226 : vector<8x256xf32>
    %228 = math.exp %227 : vector<8x256xf32>
    %cst_69 = arith.constant 1.000000e+00 : f32
    %229 = vector.broadcast %cst_69 : f32 to vector<8x256xf32>
    %230 = arith.subf %228, %229 : vector<8x256xf32>
    %231 = arith.select %225, %223, %230 : vector<8x256xi1>, vector<8x256xf32>
    %c0_70 = arith.constant 0 : index
    %c0_71 = arith.constant 0 : index
    %232 = vector.load %arg8[%c0_70, %c0_71] : memref<8x1xf32, #tpu.memory_space<vmem>>, vector<8x1xf32>
    %233 = vector.broadcast %232 : vector<8x1xf32> to vector<8x256xf32>
    %234 = arith.mulf %231, %233 : vector<8x256xf32>
    %c0_72 = arith.constant 0 : index
    %c0_73 = arith.constant 0 : index
    %235 = vector.load %arg9[%c0_72, %c0_73] : memref<8x1xf32, #tpu.memory_space<vmem>>, vector<8x1xf32>
    %236 = vector.broadcast %235 : vector<8x1xf32> to vector<8x256xf32>
    %237 = arith.addf %234, %236 : vector<8x256xf32>
    %c0_74 = arith.constant 0 : index
    %c0_75 = arith.constant 0 : index
    %238 = vector.load %arg10[%c0_74, %c0_75] : memref<8x8xbf16, #tpu.memory_space<vmem>>, vector<8x8xbf16>
    %239 = arith.truncf %237 : vector<8x256xf32> to vector<8x256xbf16>
    %cst_76 = arith.constant dense<0.000000e+00> : vector<8x256xf32>
    %240 = tpu.matmul %238, %239, %cst_76 {dimension_numbers = #tpu.dot_dimension_numbers<[1], [0], [0], [1], [0, 0, 1, 1], [], []>} : vector<8x8xbf16>, vector<8x256xbf16>, vector<8x256xf32> -> vector<8x256xf32>
    %c0_77 = arith.constant 0 : index
    %c0_78 = arith.constant 0 : index
    %241 = vector.load %arg11[%c0_77, %c0_78] : memref<8x1xf32, #tpu.memory_space<vmem>>, vector<8x1xf32>
    %242 = vector.broadcast %241 : vector<8x1xf32> to vector<8x256xf32>
    %243 = arith.addf %240, %242 : vector<8x256xf32>
    %c0_79 = arith.constant 0 : index
    %c0_80 = arith.constant 0 : index
    %c0_81 = arith.constant 0 : index
    %244 = vector.load %arg12[%c0_79, %c0_80, %c0_81] : memref<1x8x256xf32, #tpu.memory_space<vmem>>, vector<1x8x256xf32>
    %245 = vector.shape_cast %244 : vector<1x8x256xf32> to vector<8x256xf32>
    %246 = vector.shape_cast %243 : vector<8x256xf32> to vector<1x8x256xf32>
    tpu.vector_store %arg12[%c0_79, %c0_80, %c0_81], %246 {strides = array<i32>} : memref<1x8x256xf32, #tpu.memory_space<vmem>>, vector<1x8x256xf32>,
    return
  }
  func.func @transform_0(%arg0: i32) -> (i32, i32, i32) {
    %c0_i32 = arith.constant 0 : i32
    %c0_i32_0 = arith.constant 0 : i32
    %c0_i32_1 = arith.constant 0 : i32
    return %arg0, %c0_i32, %c0_i32_0 : i32, i32, i32
  }
  func.func @transform_1(%arg0: i32) -> (i32, i32, i32) {
    %c0_i32 = arith.constant 0 : i32
    %c0_i32_0 = arith.constant 0 : i32
    %c0_i32_1 = arith.constant 0 : i32
    return %arg0, %c0_i32, %c0_i32_0 : i32, i32, i32
  }
  func.func @transform_2(%arg0: i32) -> (i32, i32) {
    %c0_i32 = arith.constant 0 : i32
    %c0_i32_0 = arith.constant 0 : i32
    %c0_i32_1 = arith.constant 0 : i32
    return %c0_i32, %c0_i32_0 : i32, i32
  }
  func.func @transform_3(%arg0: i32) -> (i32, i32) {
    %c0_i32 = arith.constant 0 : i32
    %c0_i32_0 = arith.constant 0 : i32
    %c0_i32_1 = arith.constant 0 : i32
    return %c0_i32, %c0_i32_0 : i32, i32
  }
  func.func @transform_4(%arg0: i32) -> (i32, i32) {
    %c0_i32 = arith.constant 0 : i32
    %c0_i32_0 = arith.constant 0 : i32
    %c0_i32_1 = arith.constant 0 : i32
    return %c0_i32, %c0_i32_0 : i32, i32
  }
  func.func @transform_5(%arg0: i32) -> (i32, i32) {
    %c0_i32 = arith.constant 0 : i32
    %c0_i32_0 = arith.constant 0 : i32
    %c0_i32_1 = arith.constant 0 : i32
    return %c0_i32, %c0_i32_0 : i32, i32
  }
  func.func @transform_6(%arg0: i32) -> (i32, i32) {
    %c0_i32 = arith.constant 0 : i32
    %c0_i32_0 = arith.constant 0 : i32
    %c0_i32_1 = arith.constant 0 : i32
    return %c0_i32, %c0_i32_0 : i32, i32
  }
  func.func @transform_7(%arg0: i32) -> (i32, i32) {
    %c0_i32 = arith.constant 0 : i32
    %c0_i32_0 = arith.constant 0 : i32
    %c0_i32_1 = arith.constant 0 : i32
    return %c0_i32, %c0_i32_0 : i32, i32
  }
  func.func @transform_8(%arg0: i32) -> (i32, i32) {
    %c0_i32 = arith.constant 0 : i32
    %c0_i32_0 = arith.constant 0 : i32
    %c0_i32_1 = arith.constant 0 : i32
    return %c0_i32, %c0_i32_0 : i32, i32
  }
  func.func @transform_9(%arg0: i32) -> (i32, i32) {
    %c0_i32 = arith.constant 0 : i32
    %c0_i32_0 = arith.constant 0 : i32
    %c0_i32_1 = arith.constant 0 : i32
    return %c0_i32, %c0_i32_0 : i32, i32
  }
  func.func @transform_10(%arg0: i32) -> (i32, i32) {
    %c0_i32 = arith.constant 0 : i32
    %c0_i32_0 = arith.constant 0 : i32
    %c0_i32_1 = arith.constant 0 : i32
    return %c0_i32, %c0_i32_0 : i32, i32
  }
  func.func @transform_11(%arg0: i32) -> (i32, i32, i32) {
    %c0_i32 = arith.constant 0 : i32
    %c0_i32_0 = arith.constant 0 : i32
    %c0_i32_1 = arith.constant 0 : i32
    return %arg0, %c0_i32, %c0_i32_0 : i32, i32, i32
  }
}

</mosaic_0001>

<bundles_post_ra>
// kernel: xlfmnet_forward.4
= control target key start
LH: loop header
LB: loop body
LE: loop exit
PB: predicated region body
PF: predicated region fallthrough
CT: control target
= control target key end

     0   :  { %s1221_s27 = smov 0   ;;  %s1414_s0 = inlined_call_operand.vmem [shape: bf16[2,8,64], index: 0, kind: input, shape index: {}]   ;;  %s1415_s1 = inlined_call_operand.vmem [shape: bf16[16,72], index: 1, kind: input, shape index: {}]   ;;  %s1416_s2 = inlined_call_operand.vmem [shape: f32[16,1], index: 2, kind: input, shape index: {}]   ;;  %s1417_s3 = inlined_call_operand.vmem [shape: f32[16,1], index: 3, kind: input, shape index: {}]   ;;  %s1418_s4 = inlined_call_operand.vmem [shape: bf16[16,144], index: 4, kind: input, shape index: {}]   ;;  %s1419_s5 = inlined_call_operand.vmem [shape: f32[16,1], index: 5, kind: input, shape index: {}]   ;;  %s1420_s6 = inlined_call_operand.vmem [shape: f32[16,1], index: 6, kind: input, shape index: {}]   ;;  %s1421_s7 = inlined_call_operand.vmem [shape: bf16[32,16], index: 7, kind: input, shape index: {}]   ;;  %s1422_s8 = inlined_call_operand.vmem [shape: bf16[2,32,64], index: 8, kind: output, shape index: {}]  }
   0x1 LB: > { %s990_s28 = sadd.s32 4294967295, %s1158_s27   ;;  %p994_p0 = scmp.ge.s32.totalorder %s1158_s27, 1  ;;  %s1158_s27 = sphi %s1221_s27, %s18_s27  }
   0x2   : > { %p261_p1 = scmp.lt.s32.totalorder %s1158_s27, 3 }
   0x4   : > { %p262_p2 = pnand %p994_p0, %p261_p1 }
   0x5   : > { %p294_p3 = scmp.lt.s32.totalorder (!%p262_p2), %s990_s28, 1  ;;  %s1161_s11 = smov (!%p262_p2), 9  }
   0x6   : > { %265 = sbr.rel (%p262_p2) target bundleno = 1416 (0x588), region = 52  ;;  %s1162_s12 = smov (!%p262_p2), 18  }
   0x7   : > { %s1163_s13 = smov (!%p262_p2), 10   ;;  %s1164_s14 = smov (!%p262_p2), 8  }
   0x8   : > { %s1165_s15 = smov (!%p262_p2), 127   ;;  %s1166_s16 = smov (!%p262_p2), 126  }
   0x9   : > { %s1167_s17 = smov (!%p262_p2), 16   ;;  %s1168_s18 = smov (!%p262_p2), 2  }
   0xa   : > { %s1171_s19 = smov (!%p262_p2), 120   ;;  %s1172_s22 = smov (!%p262_p2), 104  }
   0xb   : > { %v309_v0 = vlaneseq  ;;  %v1160_v1 = vmov 0   ;;  %s1426_s28 = smov (!%p294_p3, %s990_s28), 1  ;;  %vm330_vm4 = vcmask 72704   ;;  %vm334_vm5 = vcmask 596992   ;;  %v1138_v26 = vld [vmem:[%s1415_s1] sm:$0xff]   ;;  %s1173_s23 = smov 112  }
   0xc   : > { %1136 = vset.pattern.permute.xlu1 %v1160_v1  ;;  %1135 = vset.pattern.permute.xlu0 %v1160_v1  ;;  %s995_s29 = sshll.u32 %s1426_s28, 2  ;;  %v1169_v20 = vmov 0.0   ;;  %vm1170_vm9 = vmmov 0   ;;  %vm360_vm10 = vcmask 1043456   ;;  %v573_v32 = vld [vmem:[%s1416_s2] sm:$0xff]  ;;  %v588_v34 = vld [vmem:[%s1417_s3 + $0x8] sm:$0xff] }
   0xd   : > { %v310_v2 = vand.u32 127, %v309_v0  ;;  %v346_v3 = vshrl.u32 %v309_v0, 7  ;;  %s297_s10 = scalar_lea.vmem %s1414_s0, %s995_s29  ;;  %1051 = vmatprep.subr.bf16.mxu0 %v1169_v20  ;;  %1059 = vmatprep.subr.bf16.mxu1 %v1169_v20  ;;  %s1174_s30 = smov 80   ;;  %v574_v35 = vld [vmem:[%s1416_s2 + $0x8] sm:$0xff]  ;;  %v587_v36 = vld [vmem:[%s1417_s3] sm:$0xff]  ;;  %vm396_vm13 = vcmask 195584  }
   0xe   : > { %v1137_v6 = vld [vmem:[%s297_s10] ss:$0 sps:$4 sm:$0xff]   ;;  %1055 = vmatprep.mubr.msk.bf16.mxu0 %vm1170_vm9, %v1169_v20  ;;  %1063 = vmatprep.mubr.msk.bf16.mxu1 %vm1170_vm9, %v1169_v20  ;;  %s1022_s10 = sshll.u32 %s1426_s28, 4 }
   0xf   : > { %v315_v4 = vand.u32 7, %v310_v2  ;;  %v347_v5 = vsub.s32 0, %v346_v3  ;;  %328 = vrot.lane.b32.xlu0 %v1137_v6, %s1161_s11 }
  0x11   : > { %vm324_vm0 = vcmp.ne.s32.totalorder %v315_v4, 7  ;;  %vm1235_vm1 = vcmp.ne.s32.totalorder %v315_v4, 0 }
  0x12   : > { %vm343_vm2 = vmpackc.low %vm324_vm0, %vm324_vm0 }
  0x13   : > { %v344_v8 = vsel %vm343_vm2, 65537, %v1160_v1  ;;  %vm339_vm3 = vmpackc.low %vm1235_vm1, %vm1235_vm1  ;;  %vm644_vm1 = vcmask 392192   ;;  %vm745_vm2 = vcmask 261120  }
  0x14   : > { %v348_v9 = vrot.slane %v344_v8, %v347_v5  ;;  %v365_v10 = vsel %vm339_vm3, 65537, %v1160_v1 }
  0x15   : > { %v1248_v11 = vrot.slane %v365_v10, %v347_v5 }
  0x16   : > { %495 = vrot.lane.b32.xlu1 %v348_v9, %s1162_s12  ;;  %374 = vrot.lane.b32.xlu0 %v348_v9, %s1163_s13 }
  0x17   : > { %vm611_vm0 = vcmp.ne.s16.totalorder %v1248_v11, 0 }
  0x1a   : > { %370 = vrot.lane.b32.xlu0 %v1248_v11, %s1164_s14 }
  0x81   : > { %v329_v12 = vpop.permute.xlu0 %328 }
  0x82   : > { %v333_v13 = vsel %vm330_vm4, 0, %v329_v12 }
  0x83   : > { %v1253_v14 = vsel %vm334_vm5, %v333_v13, 0 }
  0x84   : > { %v354_v15 = vrot.slane %v1253_v14, 4  ;;  %v340_v44 = vsel %vm339_vm3, %v1253_v14, 0  ;;  %vm858_vm3 = vcmask 130048  }
  0x86   : > { %355 = vrot.lane.b32.xlu0 %v354_v15, %s1165_s15 }
  0x88   : > { %v1256_v16 = vpop.permute.xlu0 %374  ;;  %v1264_v18 = vpop.permute.xlu1 %495 }
  0x89   : > { %vm376_vm6 = vcmp.ne.s16.totalorder %v1256_v16, 0  ;;  %vm497_vm7 = vcmp.ne.s16.totalorder %v1264_v18, 0  ;;  %v1139_v18 = vld [vmem:[%s1418_s4] ss:$8 sps:$4 sm:$0xff]  }
  0x8a   : > { %v377_v17 = vsel %vm376_vm6, %v1253_v14, 0  ;;  %491 = vrot.lane.b32.xlu0 %v1248_v11, %s1167_s17  ;;  %v498_v19 = vsel %vm497_vm7, %v1253_v14, 0  ;;  %s1175_s17 = smov 32  }
  0x8b   : > { %379 = vrot.lane.b32.xlu1 %v377_v17, %s1166_s16 }
  0x8c   : > { %v1274_v21 = vpop.permute.xlu0 %370 }
  0x8d   : > { %vm372_vm8 = vcmp.ne.s16.totalorder %v1274_v21, 0  ;;  %v1141_v21 = vld [vmem:[%s1418_s4 + $0x4] ss:$8 sps:$4 sm:$0xff]  }
  0x8e   : > { %v373_v22 = vsel %vm372_vm8, %v1253_v14, 0 }
  0x8f   : > { %349 = vrot.lane.b32.xlu1 %v348_v9, %s1168_s18 }
  0x93   : > { %500 = vrot.lane.b32.xlu1 %v498_v19, %s1166_s16 }
  0xf8   : > { %v356_v23 = vpop.permute.xlu0 %355 }
  0xf9   : > { %v382_v24 = vsel %vm360_vm10, %v373_v22, %v356_v23  ;;  %v363_v46 = vsel %vm360_vm10, %v340_v44, %v356_v23 }
  0xfa   : > { %391 = vrot.lane.b32.xlu0 %v382_v24, %s1171_s19 }
  0xfc   : > { %v1290_v27 = vpop.permute.xlu0 %491 }
  0xfd   : > { %v380_v25 = vpop.permute.xlu1 %379  ;;  %vm493_vm11 = vcmp.ne.s16.totalorder %v1290_v27, 0  ;;  %v815_v27 = vld [vmem:[%s1419_s5] sm:$0xff] }
  0xfe   : > { %393 = vrot.lane.b32.xlu1 %v380_v25, %s1171_s19  ;;  %v494_v28 = vsel %vm493_vm11, %v1253_v14, 0  ;;  %388 = vrot.lane.b32.xlu0 %v1138_v26, %s1172_s22 }
  0xff   : > { %v503_v31 = vsel %vm360_vm10, %v494_v28, %v356_v23 }
 0x101   : > { %v1296_v29 = vpop.permute.xlu1 %349 }
 0x102   : > { %vm351_vm12 = vcmp.ne.s16.totalorder %v1296_v29, 0  ;;  %507 = vrot.lane.b32.xlu0 %v503_v31, %s1173_s23 }
 0x103   : > { %v352_v30 = vsel %vm351_vm12, %v1253_v14, 0 }
 0x104   : > { %358 = vrot.lane.b32.xlu1 %v352_v30, %s1166_s16 }
 0x105   : > { %v501_v33 = vpop.permute.xlu1 %500 }
 0x106   : > { %577 = vperm.xlu0 %1135, %v573_v32  }
 0x108   : > { %509 = vrot.lane.b32.xlu1 %v501_v33, %s1173_s23 }
 0x10a   : > { %596 = vperm.xlu0 %1135, %v588_v34  }
 0x10c   : > { %504 = vrot.lane.b32.xlu1 %v1138_v26, %s1174_s30 }
 0x110   : > { %582 = vperm.xlu1 %1136, %v574_v35  }
 0x114   : > { %591 = vperm.xlu1 %1136, %v587_v36   ;;  %v816_v36 = vld [vmem:[%s1419_s5 + $0x8] sm:$0xff] }
 0x16c   : > { %v392_v39 = vpop.permute.xlu0 %391 }
 0x170   : > { %v394_v37 = vpop.permute.xlu1 %393  ;;  %v389_v42 = vpop.permute.xlu0 %388 }
 0x171   : > { %v401_v38 = vsel %vm360_vm10, %v394_v37, 0  ;;  %v830_v37 = vld [vmem:[%s1420_s6 + $0x8] sm:$0xff] }
 0x172   : > { %1052 = vmatpush3.bf16.msra.mxu0 %v401_v38  ;;  %v829_v38 = vld [vmem:[%s1420_s6] sm:$0xff] }
 0x173   : > { %1053 = vmatprep.subr.bf16.mxu0 %v1169_v20 }
 0x174   : > { %v508_v47 = vpop.permute.xlu0 %507 }
 0x176   : > { %v359_v40 = vpop.permute.xlu1 %358  ;;  %1054 = vmatpush3.bf16.msra.mxu0 %v392_v39 }
 0x177   : > { %v448_v41 = vsel %vm360_vm10, %v359_v40, 0  ;;  %1067 = vmatprep.subr.bf16.mxu0 %v1169_v20 }
 0x178   : > { %1060 = vmatpush3.bf16.msra.mxu1 %v448_v41 }
 0x179   : > { %1056 = vmatmul.mubr.msk.bf16.vlgmr.msra.gmra.mxu0 %vm396_vm13, %v389_v42  ;;  %1061 = vmatprep.subr.bf16.mxu1 %v1169_v20 }
 0x17a   : > { %v510_v43 = vpop.permute.xlu1 %509  ;;  %1071 = vmatprep.mubr.msk.bf16.mxu0 %vm1170_vm9, %v1169_v20 }
 0x17b   : > { %v516_v45 = vsel %vm360_vm10, %v510_v43, 0 }
 0x17c   : > { %1062 = vmatpush3.bf16.msra.mxu1 %v363_v46  ;;  %1068 = vmatpush3.bf16.msra.mxu0 %v516_v45 }
 0x17d   : > { %1069 = vmatprep.subr.bf16.mxu0 %v1169_v20  ;;  %1075 = vmatprep.subr.bf16.mxu1 %v1169_v20 }
 0x17e   : > { %v505_v48 = vpop.permute.xlu1 %504 }
 0x17f   : > { %1064 = vmatmul.mubr.msk.bf16.vlgmr.msra.gmra.mxu1 %vm396_vm13, %v1138_v26 }
 0x180   : > { %1070 = vmatpush3.bf16.msra.mxu0 %v508_v47  ;;  %1081 = vmatprep.mubr.msk.bf16.mxu1 %vm1170_vm9, %v1169_v20 }
 0x181   : > { %1085 = vmatprep.subr.bf16.mxu0 %v1169_v20  ;;  %v578_v9 = vpop.permute.xlu0 %577 }
 0x183   : > { %1072 = vmatmul.mubr.msk.bf16.vlgmr.msra.gmra.mxu0 %vm396_vm13, %v505_v48 }
 0x184   : > { %1091 = vmatprep.mubr.msk.bf16.mxu0 %vm1170_vm9, %v1169_v20 }
 0x185   : > { %v597_v19 = vpop.permute.xlu0 %596 }
 0x18b   : > { %v583_v6 = vpop.permute.xlu1 %582 }
 0x18f   : > { %v592_v15 = vpop.permute.xlu1 %591 }
 0x239   : > { %v437_v49 = vpop.f32.mrf.mxu0 }
 0x23b   : > { %v1057_v50 = vpop.f32.mrf.mxu0 }
 0x23c   : > { %v1142_v50 = vld [vmem:[%s1421_s7] sm:$0xff]  }
 0x23d   : > { %v440_v51 = vpop.f32.mrf.mxu0 }
 0x23f   : > { %v1058_v52 = vpop.f32.mrf.mxu0  ;;  %v484_v53 = vpop.f32.mrf.mxu1 }
 0x240   : > { %v485_v55 = vadd.f32 %v484_v53, %v437_v49 }
 0x241   : > { %v1065_v54 = vpop.f32.mrf.mxu1 }
 0x243   : > { %v487_v56 = vpop.f32.mrf.mxu1  ;;  %v552_v57 = vpop.f32.mrf.mxu0 }
 0x244   : > { %v559_v58 = vadd.f32 %v552_v57, %v485_v55  ;;  %v488_v61 = vadd.f32 %v487_v56, %v440_v51 }
 0x245   : > { %v1066_v59 = vpop.f32.mrf.mxu1  ;;  %v1073_v60 = vpop.f32.mrf.mxu0 }
 0x246   : > { %v563_v62 = vmin.f32 %v559_v58, 0.0  ;;  %vm561_vm14 = vcmp.gt.f32.partialorder %v559_v58, 0.0 }
 0x247   : > { %v555_v63 = vpop.f32.mrf.mxu0 }
 0x248   : > { %v565_v0 = vmul.f32 1.442695, %v563_v62  ;;  %v560_v1 = vadd.f32 %v555_v63, %v488_v61 }
 0x249   : > { %v1074_v2 = vpop.f32.mrf.mxu0 }
 0x24a   : > { %1144 = vpow2.f32 %v565_v0  ;;  %v564_v3 = vmin.f32 %v560_v1, 0.0  ;;  %vm562_vm15 = vcmp.gt.f32.partialorder %v560_v1, 0.0 }
 0x24c   : > { %v567_v4 = vmul.f32 1.442695, %v564_v3 }
 0x24e   : > { %1146 = vpow2.f32 %v567_v4 }
 0x257   : > { %v1145_v5 = vpop.eup %1144 }
 0x258   : > { %v1003_v7 = vadd.f32 -1.0, %v1145_v5 }
 0x25a   : > { %v571_v8 = vsel %vm561_vm14, %v559_v58, %v1003_v7 }
 0x25b   : > { %v1147_v10 = vpop.eup %1146  ;;  %v585_v13 = vmul.f32 %v578_v9, %v571_v8 }
 0x25c   : > { %v1004_v12 = vadd.f32 -1.0, %v1147_v10 }
 0x25d   : > { %v599_v22 = vadd.f32 %v592_v15, %v585_v13 }
 0x25e   : > { %v572_v14 = vsel %vm562_vm15, %v560_v1, %v1004_v12 }
 0x25f   : > { %v586_v17 = vmul.f32 %v583_v6, %v572_v14 }
 0x261   : > { %v600_v23 = vadd.f32 %v597_v19, %v586_v17 }
 0x263   : > { %v601_v24 = vpack.c.bf16 %v600_v23, %v599_v22 }
 0x265   : > { %605 = vrot.lane.b32.xlu1 %v601_v24, %s1161_s11  ;;  %s302_s11 = scalar_lea.vmem %s1422_s8, %s1022_s10 }
 0x2d7   : > { %v606_v25 = vpop.permute.xlu1 %605 }
 0x2d8   : > { %v608_v26 = vsel %vm330_vm4, 0, %v606_v25 }
 0x2d9   : > { %v609_v28 = vsel %vm334_vm5, %v608_v26, 0  ;;  %v1143_v26 = vld [vmem:[%s1421_s7 + $0x8] sm:$0xff]  }
 0x2da   : > { %615 = vrot.lane.b32.xlu1 %v609_v28, %s1165_s15  ;;  %v623_v30 = vsel %vm376_vm6, %v609_v28, 0  ;;  %v734_v31 = vsel %vm497_vm7, %v609_v28, 0  ;;  %v613_v34 = vsel %vm351_vm12, %v609_v28, 0  ;;  %v622_v16 = vsel %vm372_vm8, %v609_v28, 0 }
 0x2db   : > { %625 = vrot.lane.b32.xlu0 %v623_v30, %s1166_s16  ;;  %v733_v29 = vsel %vm493_vm11, %v609_v28, 0  ;;  %v612_v45 = vsel %vm611_vm0, %v609_v28, 0  ;;  %vm930_vm6 = vcmask 519168  }
 0x2df   : > { %736 = vrot.lane.b32.xlu0 %v734_v31, %s1166_s16 }
 0x34c   : > { %v616_v32 = vpop.permute.xlu1 %615 }
 0x34d   : > { %637 = vrot.lane.b32.xlu0 %v616_v32, %s1171_s19  ;;  %v626_v33 = vpop.permute.xlu0 %625 }
 0x34e   : > { %639 = vrot.lane.b32.xlu1 %v626_v33, %s1171_s19 }
 0x351   : > { %619 = vrot.lane.b32.xlu0 %v613_v34, %s1166_s16  ;;  %v737_v35 = vpop.permute.xlu0 %736 }
 0x352   : > { %635 = vrot.lane.b32.xlu1 %v622_v16, %s1171_s19 }
 0x355   : > { %752 = vrot.lane.b32.xlu0 %v737_v35, %s1173_s23 }
 0x356   : > { %632 = vrot.lane.b32.xlu1 %v1139_v18, %s1174_s30 }
 0x359   : > { %748 = vrot.lane.b32.xlu0 %v733_v29, %s1173_s23 }
 0x35a   : > { %750 = vrot.lane.b32.xlu1 %v616_v32, %s1173_s23 }
 0x35d   : > { %743 = vrot.lane.b32.xlu0 %v1141_v21, %s1175_s17 }
 0x35e   : > { %741 = vrot.lane.b32.xlu1 %v1139_v18, %s1175_s17 }
 0x361   : > { %824 = vperm.xlu0 %1135, %v816_v36  }
 0x362   : > { %819 = vperm.xlu1 %1136, %v815_v27  }
 0x365   : > { %838 = vperm.xlu0 %1135, %v830_v37  }
 0x366   : > { %833 = vperm.xlu1 %1136, %v829_v38  }
 0x3bf   : > { %v638_v39 = vpop.permute.xlu0 %637 }
 0x3c0   : > { %v640_v40 = vpop.permute.xlu1 %639 }
 0x3c1   : > { %1076 = vmatpush3.bf16.msra.mxu1 %v640_v40 }
 0x3c2   : > { %1077 = vmatprep.subr.bf16.mxu1 %v1169_v20 }
 0x3c3   : > { %v620_v41 = vpop.permute.xlu0 %619 }
 0x3c4   : > { %v636_v42 = vpop.permute.xlu1 %635  ;;  %1086 = vmatpush3.bf16.msra.mxu0 %v620_v41 }
 0x3c5   : > { %1078 = vmatpush3.bf16.msra.mxu1 %v638_v39  ;;  %1087 = vmatprep.subr.bf16.mxu0 %v1169_v20 }
 0x3c6   : > { %1079 = vmatprep.subr.bf16.mxu1 %v1169_v20 }
 0x3c7   : > { %v753_v43 = vpop.permute.xlu0 %752 }
 0x3c8   : > { %v633_v44 = vpop.permute.xlu1 %632  ;;  %1088 = vmatpush3.bf16.msra.mxu0 %v616_v32 }
 0x3c9   : > { %1080 = vmatpush3.bf16.msra.mxu1 %v636_v42  ;;  %1089 = vmatprep.subr.bf16.mxu0 %v1169_v20 }
 0x3ca   : > { %1095 = vmatprep.subr.bf16.mxu1 %v1169_v20 }
 0x3cb   : > { %v749_v46 = vpop.permute.xlu0 %748 }
 0x3cc   : > { %1082 = vmatmul.mubr.msk.bf16.vlgmr.msra.gmra.mxu1 %vm644_vm1, %v633_v44  ;;  %1090 = vmatpush3.bf16.msra.mxu0 %v612_v45  ;;  %v751_v47 = vpop.permute.xlu1 %750 }
 0x3cd   : > { %1096 = vmatpush3.bf16.msra.mxu1 %v753_v43  ;;  %1101 = vmatprep.mubr.msk.bf16.mxu1 %vm1170_vm9, %v1169_v20 }
 0x3ce   : > { %1097 = vmatprep.subr.bf16.mxu1 %v1169_v20 }
 0x3cf   : > { %1092 = vmatmul.mubr.msk.bf16.vlgmr.msra.gmra.mxu0 %vm644_vm1, %v1139_v18  ;;  %v744_v48 = vpop.permute.xlu0 %743 }
 0x3d0   : > { %v742_v11 = vpop.permute.xlu1 %741  ;;  %1107 = vmatprep.mubr.msk.bf16.mxu0 %vm858_vm3, %v1142_v50 }
 0x3d1   : > { %1098 = vmatpush3.bf16.msra.mxu1 %v751_v47  ;;  %v746_v49 = vsel %vm745_vm2, %v742_v11, %v744_v48 }
 0x3d2   : > { %1099 = vmatprep.subr.bf16.mxu1 %v1169_v20 }
 0x3d5   : > { %1100 = vmatpush3.bf16.msra.mxu1 %v749_v46 }
 0x3d8   : > { %1102 = vmatmul.mubr.msk.bf16.vlgmr.msra.gmra.mxu1 %vm644_vm1, %v746_v49 }
 0x3dc   : > { %v825_v8 = vpop.permute.xlu0 %824 }
 0x3dd   : > { %v820_v9 = vpop.permute.xlu1 %819 }
 0x3e0   : > { %v839_v19 = vpop.permute.xlu0 %838 }
 0x3e1   : > { %v834_v22 = vpop.permute.xlu1 %833 }
 0x48c   : > { %v682_v51 = vpop.f32.mrf.mxu1 }
 0x48e   : > { %v1083_v52 = vpop.f32.mrf.mxu1 }
 0x48f   : > { %v726_v53 = vpop.f32.mrf.mxu0 }
 0x490   : > { %v685_v54 = vpop.f32.mrf.mxu1  ;;  %v727_v58 = vadd.f32 %v726_v53, %v682_v51 }
 0x491   : > { %v1093_v55 = vpop.f32.mrf.mxu0 }
 0x492   : > { %v1084_v20 = vpop.f32.mrf.mxu1 }
 0x493   : > { %v729_v56 = vpop.f32.mrf.mxu0 }
 0x494   : > { %v730_v62 = vadd.f32 %v729_v56, %v685_v54 }
 0x495   : > { %v1094_v57 = vpop.f32.mrf.mxu0 }
 0x498   : > { %v794_v59 = vpop.f32.mrf.mxu1 }
 0x499   : > { %v801_v60 = vadd.f32 %v794_v59, %v727_v58 }
 0x49a   : > { %v1103_v61 = vpop.f32.mrf.mxu1 }
 0x49b   : > { %v805_v63 = vmin.f32 %v801_v60, 0.0  ;;  %vm803_vm4 = vcmp.gt.f32.partialorder %v801_v60, 0.0 }
 0x49c   : > { %v797_v0 = vpop.f32.mrf.mxu1 }
 0x49d   : > { %v807_v1 = vmul.f32 1.442695, %v805_v63  ;;  %v802_v2 = vadd.f32 %v797_v0, %v730_v62 }
 0x49e   : > { %v1104_v3 = vpop.f32.mrf.mxu1 }
 0x49f   : > { %1148 = vpow2.f32 %v807_v1  ;;  %v806_v4 = vmin.f32 %v802_v2, 0.0  ;;  %vm804_vm5 = vcmp.gt.f32.partialorder %v802_v2, 0.0 }
 0x4a1   : > { %v809_v5 = vmul.f32 1.442695, %v806_v4 }
 0x4a3   : > { %1150 = vpow2.f32 %v809_v5 }
 0x4ac   : > { %v1149_v6 = vpop.eup %1148 }
 0x4ad   : > { %v1010_v7 = vadd.f32 -1.0, %v1149_v6 }
 0x4af   : > { %v813_v10 = vsel %vm803_vm4, %v801_v60, %v1010_v7 }
 0x4b0   : > { %v1151_v12 = vpop.eup %1150  ;;  %v827_v14 = vmul.f32 %v820_v9, %v813_v10 }
 0x4b1   : > { %v1011_v13 = vadd.f32 -1.0, %v1151_v12 }
 0x4b2   : > { %v841_v23 = vadd.f32 %v834_v22, %v827_v14 }
 0x4b3   : > { %v814_v15 = vsel %vm804_vm5, %v802_v2, %v1011_v13 }
 0x4b4   : > { %v828_v17 = vmul.f32 %v825_v8, %v814_v15 }
 0x4b6   : > { %v842_v24 = vadd.f32 %v839_v19, %v828_v17 }
 0x4b8   : > { %v847_v25 = vpack.c.bf16 %v842_v24, %v841_v23 }
 0x4ba   : > { %1105 = vmatprep.subr.bf16.mxu0 %v847_v25 }
 0x4bb   : > { %1106 = vmatpush3.bf16.msra.mxu0 %v847_v25 }
 0x4be   : > { %1108 = vmatmul.mubr.msk.bf16.vlgmr.msra.gmra.mxu0 %vm858_vm3, %v1143_v26 }
 0x57e   : > { %v1109_v28 = vpop.f32.mrf.mxu0 }
 0x57f   : > { %v1025_v30 = vpack.c.bf16 %v1109_v28, %v1109_v28 }
 0x580   : > { %v899_v31 = vpop.f32.mrf.mxu0 }
 0x581   : > { %933 = vst.msk [vmem:[%s302_s11 + $0x8] sm:$0xf] %vm930_vm6, %v1025_v30  ;;  %v1023_v32 = vpack.c.bf16 %v899_v31, %v899_v31 }
 0x582   : > { %v1110_v33 = vpop.f32.mrf.mxu0 }
 0x583   : > { %931 = vst.msk [vmem:[%s302_s11] sm:$0xf] %vm930_vm6, %v1023_v32  ;;  %v1026_v34 = vpack.c.bf16 %v1110_v33, %v1110_v33 }
 0x584   : > { %v902_v16 = vpop.f32.mrf.mxu0 }
 0x585   : > { %934 = vst.msk [vmem:[%s302_s11 + $0xc] sm:$0xf] %vm930_vm6, %v1026_v34  ;;  %v1024_v18 = vpack.c.bf16 %v902_v16, %v902_v16 }
 0x587   : > { %932 = vst.msk [vmem:[%s302_s11 + $0x4] sm:$0xf] %vm930_vm6, %v1024_v18 }
 0x588 PF: > { %s18_s27 = sadd.s32 1, %s1158_s27  }
 0x589   : > { %p15_p4 = scmp.ge.s32.totalorder %s18_s27, 4  }
 0x58b   :  { %17 = sbr.rel (!%p15_p4) target bundleno = 1 (0x1), region = 82 }

// kernel: xlfmnet_forward.3
= control target key start
LH: loop header
LB: loop body
LE: loop exit
PB: predicated region body
PF: predicated region fallthrough
CT: control target
= control target key end

     0   :  { %s1647_s30 = smov 0   ;;  %s2149_s0 = inlined_call_operand.vmem [shape: f32[2,4,256], index: 0, kind: input, shape index: {}]   ;;  %s2150_s1 = inlined_call_operand.vmem [shape: bf16[8,36], index: 1, kind: input, shape index: {}]   ;;  %s2151_s2 = inlined_call_operand.vmem [shape: f32[8,1], index: 2, kind: input, shape index: {}]   ;;  %s2152_s3 = inlined_call_operand.vmem [shape: bf16[8,72], index: 3, kind: input, shape index: {}]   ;;  %s2153_s4 = inlined_call_operand.vmem [shape: f32[8,1], index: 4, kind: input, shape index: {}]   ;;  %s2154_s5 = inlined_call_operand.vmem [shape: f32[8,1], index: 5, kind: input, shape index: {}]   ;;  %s2155_s6 = inlined_call_operand.vmem [shape: bf16[8,72], index: 6, kind: input, shape index: {}]   ;;  %s2156_s7 = inlined_call_operand.vmem [shape: f32[8,1], index: 7, kind: input, shape index: {}]   ;;  %s2157_s8 = inlined_call_operand.vmem [shape: f32[8,1], index: 8, kind: input, shape index: {}]   ;;  %s2158_s9 = inlined_call_operand.vmem [shape: bf16[2,8,256], index: 9, kind: output, shape index: {}]  }
   0x1 LB: > { %s1499_s10 = sadd.s32 4294967295, %s1581_s30   ;;  %p1503_p0 = scmp.ge.s32.totalorder %s1581_s30, 1  ;;  %s1581_s30 = sphi %s1647_s30, %s19_s30  }
   0x2   : > { %p287_p1 = scmp.lt.s32.totalorder %s1581_s30, 3 }
   0x4   : > { %p288_p2 = pnand %p1503_p0, %p287_p1 }
   0x5   : > { %p323_p3 = scmp.lt.s32.totalorder (!%p288_p2), %s1499_s10, 1  ;;  %s1584_s15 = smov (!%p288_p2), 17  }
   0x6   : > { %291 = sbr.rel (%p288_p2) target bundleno = 1827 (0x723), region = 56  ;;  %s1585_s16 = smov (!%p288_p2), 18  }
   0x7   : > { %s1586_s17 = smov (!%p288_p2), 34   ;;  %s1587_s18 = smov (!%p288_p2), 16  }
   0x8   : > { %s1588_s19 = smov (!%p288_p2), 2   ;;  %s1589_s20 = smov (!%p288_p2), 32  }
   0x9   : > { %s1590_s21 = smov (!%p288_p2), 127   ;;  %s1591_s22 = smov (!%p288_p2), 126  }
   0xa   : > { %s1592_s23 = smov (!%p288_p2), 112   ;;  %s1593_s26 = smov (!%p288_p2), 116  }
   0xb   : > { %v343_v0 = vlaneseq  ;;  %v1583_v1 = vmov 0   ;;  %s2198_s10 = smov (!%p323_p3, %s1499_s10), 1  ;;  %vm380_vm6 = vcmask 138240   ;;  %vm492_vm8 = vcmask 146432   ;;  %s1594_s27 = smov 96  }
   0xc   : > { %587 = vmatprep.mubr.bf16.mxu0 %v1583_v1  ;;  %635 = vmatprep.mubr.bf16.mxu1 %v1583_v1  ;;  %s1536_s11 = sshll.u32 %s2198_s10, 3  ;;  %vm660_vm11 = vcmask 277504   ;;  %vm480_vm14 = vcmask 130048   ;;  %s1595_s12 = smov 104  }
   0xd   : > { %v344_v2 = vand.u32 127, %v343_v0  ;;  %1561 = vset.pattern.permute.xlu0 %v1583_v1  ;;  %1562 = vset.pattern.permute.xlu1 %v1583_v1  ;;  %v398_v3 = vshrl.u32 %v343_v0, 7  ;;  %s327_s14 = scalar_lea.vmem %s2149_s0, %s1536_s11  ;;  %s332_s28 = scalar_lea.vmem %s2158_s9, %s1536_s11 }
   0xe   : > { %v336_v6 = vld [vmem:[%s327_s14] sm:$0xff] }
   0xf   : > { %v345_v4 = vadd.s32 128, %v344_v2  ;;  %v350_v5 = vand.u32 15, %v344_v2  ;;  %v340_v8 = vpack.c.bf16 %v336_v6, %v336_v6  ;;  %v338_v9 = vcombine.high %v336_v6, %v336_v6 }
  0x10   : > { %v399_v10 = vsub.s32 0, %v398_v3  ;;  %v403_v12 = vsub.s32 4, %v398_v3 }
  0x11   : > { %v357_v7 = vand.u32 15, %v345_v4  ;;  %vm372_vm0 = vcmp.ne.s32.totalorder %v350_v5, 15  ;;  %vm370_vm2 = vcmp.ne.s32.totalorder %v350_v5, 0  ;;  %376 = vrot.lane.b32.xlu1 %v340_v8, %s1584_s15  ;;  %v341_v11 = vpack.c.bf16 %v338_v9, %v338_v9 }
  0x13   : > { %vm373_vm1 = vcmp.ne.s32.totalorder %v357_v7, 15  ;;  %vm371_vm3 = vcmp.ne.s32.totalorder %v357_v7, 0 }
  0x14   : > { %vm413_vm4 = vmpackc.low %vm373_vm1, %vm372_vm0  ;;  %vm427_vm0 = vcmask 15360  }
  0x15   : > { %v414_v13 = vsel %vm413_vm4, 65537, %v1583_v1  ;;  %vm395_vm5 = vmpackc.low %vm371_vm3, %vm370_vm2  ;;  %378 = vrot.lane.b32.xlu1 %v341_v11, %s1584_s15  ;;  %vm2161_vm4 = vcmask 1039360  }
  0x16   : > { %v418_v14 = vrot.slane %v414_v13, %v399_v10  ;;  %v422_v15 = vrot.slane %v414_v13, %v403_v12  ;;  %v396_v16 = vsel %vm395_vm5, 65537, %v1583_v1  ;;  %v342_v13 = vld [vmem:[%s2150_s1] sm:$0xf] }
  0x17   : > { %v1671_v17 = vrot.slane %v396_v16, %v403_v12  ;;  %v1674_v18 = vrot.slane %v396_v16, %v399_v10 }
  0x18   : > { %488 = vrot.lane.b32.xlu0 %v418_v14, %s1585_s16 }
  0x19   : > { %658 = vrot.lane.b32.xlu1 %v422_v15, %s1586_s17 }
  0x1c   : > { %490 = vrot.lane.b32.xlu0 %v422_v15, %s1585_s16  ;;  %s1596_s16 = smov 80  }
  0x1d   : > { %478 = vrot.lane.b32.xlu1 %v1671_v17, %s1587_s18 }
  0x20   : > { %656 = vrot.lane.b32.xlu0 %v418_v14, %s1586_s17 }
  0x21   : > { %425 = vrot.lane.b32.xlu1 %v422_v15, %s1588_s19 }
  0x24   : > { %476 = vrot.lane.b32.xlu0 %v1674_v18, %s1587_s18 }
  0x28   : > { %423 = vrot.lane.b32.xlu0 %v418_v14, %s1588_s19 }
  0x2c   : > { %644 = vrot.lane.b32.xlu0 %v1674_v18, %s1589_s20 }
  0x83   : > { %v377_v19 = vpop.permute.xlu1 %376 }
  0x84   : > { %v1680_v20 = vsel %vm380_vm6, 0, %v377_v19 }
  0x85   : > { %v437_v21 = vrot.slane %v1680_v20, 6 }
  0x87   : > { %440 = vrot.lane.b32.xlu0 %v437_v21, %s1590_s21  ;;  %v379_v23 = vpop.permute.xlu1 %378 }
  0x88   : > { %v1688_v24 = vsel %vm380_vm6, %v377_v19, %v379_v23  ;;  %v1691_v25 = vsel %vm380_vm6, %v379_v23, 0  ;;  %v1508_v23 = vcombine.low %v342_v13, %v342_v13 }
  0x89   : > { %v439_v26 = vrot.slane %v1691_v25, 6  ;;  %v438_v27 = vrot.slane %v1688_v24, 6 }
  0x8a   : > { %v1683_v22 = vpop.permute.xlu0 %488 }
  0x8b   : > { %vm494_vm7 = vcmp.ne.s16.totalorder %v1683_v22, 0  ;;  %444 = vrot.lane.b32.xlu0 %v439_v26, %s1590_s21  ;;  %442 = vrot.lane.b32.xlu1 %v438_v27, %s1590_s21  ;;  %v1702_v30 = vpop.permute.xlu1 %658 }
  0x8c   : > { %v497_v28 = vsel %vm494_vm7, %v1680_v20, 0  ;;  %vm664_vm13 = vcmp.ne.s16.totalorder %v1702_v30, 0 }
  0x8d   : > { %v503_v32 = vrot.slane %v497_v28, 4  ;;  %v667_v43 = vsel %vm664_vm13, %v1691_v25, 0 }
  0x8e   : > { %v1698_v29 = vpop.permute.xlu0 %490  ;;  %v673_v48 = vrot.slane %v667_v43, 4 }
  0x8f   : > { %v1706_v31 = vsel %vm492_vm8, %v1683_v22, %v1698_v29  ;;  %vm496_vm9 = vcmp.ne.s16.totalorder %v1698_v29, 0  ;;  %506 = vrot.lane.b32.xlu1 %v503_v32, %s1591_s22  ;;  %v1724_v38 = vpop.permute.xlu1 %478 }
  0x90   : > { %vm495_vm10 = vcmp.ne.s16.totalorder %v1706_v31, 0  ;;  %v499_v33 = vsel %vm496_vm9, %v1691_v25, 0  ;;  %vm2162_vm5 = vcmp.ne.s16.totalorder %v1724_v38, 0 }
  0x91   : > { %v498_v34 = vsel %vm495_vm10, %v1688_v24, 0  ;;  %v505_v40 = vrot.slane %v499_v33, 4  ;;  %v487_v0 = vsel %vm2162_vm5, %v1691_v25, 0 }
  0x92   : > { %v1716_v35 = vpop.permute.xlu0 %656  ;;  %v504_v36 = vrot.slane %v498_v34, 4 }
  0x93   : > { %v1721_v37 = vsel %vm660_vm11, %v1716_v35, %v1702_v30  ;;  %vm662_vm12 = vcmp.ne.s16.totalorder %v1716_v35, 0  ;;  %510 = vrot.lane.b32.xlu1 %v505_v40, %s1591_s22  ;;  %v1743_v45 = vpop.permute.xlu1 %425  ;;  %vm464_vm11 = vcmask 1041408  }
  0x94   : > { %v665_v39 = vsel %vm662_vm12, %v1680_v20, 0  ;;  %508 = vrot.lane.b32.xlu0 %v504_v36, %s1591_s22  ;;  %vm663_vm15 = vcmp.ne.s16.totalorder %v1721_v37, 0  ;;  %vm2159_vm2 = vcmp.ne.s16.totalorder %v1743_v45, 0 }
  0x95   : > { %v671_v41 = vrot.slane %v665_v39, 4  ;;  %v666_v46 = vsel %vm663_vm15, %v1688_v24, 0  ;;  %v434_v54 = vsel %vm2159_vm2, %v1691_v25, 0 }
  0x96   : > { %v1732_v42 = vpop.permute.xlu0 %476  ;;  %v672_v51 = vrot.slane %v666_v46, 4  ;;  %v454_v56 = vrot.slane %v434_v54, 4 }
  0x97   : > { %v1740_v44 = vsel %vm480_vm14, %v1732_v42, %v1724_v38  ;;  %646 = vrot.lane.b32.xlu1 %v1671_v17, %s1589_s20  ;;  %vm471_vm14 = vcmask 1043456   ;;  %vm2163_vm2 = vcmp.ne.s16.totalorder %v1732_v42, 0 }
  0x98   : > { %674 = vrot.lane.b32.xlu0 %v671_v41, %s1591_s22  ;;  %vm2160_vm8 = vcmp.ne.s16.totalorder %v1740_v44, 0  ;;  %v485_v12 = vsel %vm2163_vm2, %v1680_v20, 0 }
  0x99   : > { %v486_v2 = vsel %vm2160_vm8, %v1688_v24, 0  ;;  %vm648_vm8 = vcmask 261120  }
  0x9a   : > { %v1748_v47 = vpop.permute.xlu0 %423 }
  0x9b   : > { %v1754_v49 = vsel %vm427_vm0, %v1748_v47, %v1743_v45  ;;  %vm429_vm1 = vcmp.ne.s16.totalorder %v1748_v47, 0  ;;  %676 = vrot.lane.b32.xlu1 %v672_v51, %s1591_s22  ;;  %vm2168_vm0 = vcmask 1031168  }
  0x9c   : > { %vm430_vm3 = vcmp.ne.s16.totalorder %v1754_v49, 0  ;;  %v432_v50 = vsel %vm429_vm1, %v1680_v20, 0  ;;  %678 = vrot.lane.b32.xlu0 %v673_v48, %s1591_s22 }
  0x9d   : > { %v452_v52 = vrot.slane %v432_v50, 4  ;;  %v433_v53 = vsel %vm430_vm3, %v1688_v24, 0 }
  0x9e   : > { %v453_v55 = vrot.slane %v433_v53, 4  ;;  %v1773_v57 = vpop.permute.xlu0 %644 }
  0xa0   : > { %455 = vrot.lane.b32.xlu0 %v452_v52, %s1591_s22  ;;  %457 = vrot.lane.b32.xlu1 %v453_v55, %s1591_s22 }
  0xa4   : > { %459 = vrot.lane.b32.xlu0 %v454_v56, %s1591_s22 }
  0xf9   : > { %v441_v58 = vpop.permute.xlu0 %440 }
  0xfd   : > { %v443_v59 = vpop.permute.xlu1 %442  ;;  %v445_v60 = vpop.permute.xlu0 %444 }
  0xfe   : > { %v1778_v62 = vsel %vm2161_vm4, %v443_v59, %v445_v60  ;;  %v520_v3 = vsel %vm464_vm11, %v487_v0, %v445_v60  ;;  %v447_v5 = vsel %vm2161_vm4, %v441_v58, %v443_v59  ;;  %vm2164_vm4 = vcmp.ne.s16.totalorder %v1773_v57, 0  ;;  %v760_v59 = vld [vmem:[%s2151_s2] sm:$0xff] }
  0xff   : > { %v517_v8 = vsel %vm464_vm11, %v486_v2, %v1778_v62  ;;  %v515_v15 = vsel %vm464_vm11, %v485_v12, %v447_v5  ;;  %v653_v27 = vsel %vm2164_vm4, %v1680_v20, 0  ;;  %vm2169_vm4 = vcmp.ne.s16.totalorder %v1671_v17, 0 }
 0x100   : > { %v683_v34 = vsel %vm464_vm11, %v653_v27, %v447_v5  ;;  %v408_v54 = vsel %vm2169_vm4, %v1688_v24, 0 }
 0x101   : > { %v507_v61 = vpop.permute.xlu1 %506  ;;  %v470_v56 = vsel %vm464_vm11, %v408_v54, %v1778_v62 }
 0x105   : > { %v511_v4 = vpop.permute.xlu1 %510 }
 0x106   : > { %v509_v63 = vpop.permute.xlu0 %508  ;;  %v526_v7 = vsel %vm471_vm14, %v520_v3, %v511_v4 }
 0x107   : > { %v513_v6 = vsel %vm2168_vm0, %v509_v63, %v511_v4  ;;  %v512_v9 = vsel %vm2168_vm0, %v507_v61, %v509_v63  ;;  %539 = vrot.lane.b32.xlu1 %v526_v7, %s1592_s23 }
 0x108   : > { %v524_v11 = vsel %vm471_vm14, %v517_v8, %v513_v6  ;;  %v522_v19 = vsel %vm471_vm14, %v515_v15, %v512_v9 }
 0x109   : > { %537 = vrot.lane.b32.xlu0 %v524_v11, %s1592_s23  ;;  %v1803_v14 = vpop.permute.xlu1 %646 }
 0x10a   : > { %v675_v10 = vpop.permute.xlu0 %674  ;;  %v1809_v16 = vsel %vm648_vm8, %v1773_v57, %v1803_v14  ;;  %vm2167_vm5 = vcmp.ne.s16.totalorder %v1803_v14, 0  ;;  %vm2166_vm8 = vcmp.ne.s16.totalorder %v1674_v18, 0 }
 0x10b   : > { %vm2165_vm2 = vcmp.ne.s16.totalorder %v1809_v16, 0  ;;  %535 = vrot.lane.b32.xlu1 %v522_v19, %s1592_s23  ;;  %v655_v28 = vsel %vm2167_vm5, %v1691_v25, 0  ;;  %v407_v46 = vsel %vm2166_vm8, %v1680_v20, 0  ;;  %vm544_vm8 = vcmask 97280  }
 0x10c   : > { %v654_v26 = vsel %vm2165_vm2, %v1688_v24, 0  ;;  %v687_v25 = vsel %vm464_vm11, %v655_v28, %v445_v60  ;;  %v467_v51 = vsel %vm464_vm11, %v407_v46, %v447_v5  ;;  %vm548_vm2 = vcmask 1045504  }
 0x10d   : > { %v677_v32 = vpop.permute.xlu1 %676  ;;  %v685_v41 = vsel %vm464_vm11, %v654_v26, %v1778_v62  ;;  %vm541_vm11 = vcmask 916480   ;;  %vm705_vm5 = vcmask 785408  }
 0x10e   : > { %v679_v21 = vpop.permute.xlu0 %678  ;;  %v680_v33 = vsel %vm2168_vm0, %v675_v10, %v677_v32 }
 0x10f   : > { %v681_v36 = vsel %vm2168_vm0, %v677_v32, %v679_v21  ;;  %530 = vrot.lane.b32.xlu1 %v1508_v23, %s1593_s26  ;;  %v689_v40 = vsel %vm471_vm14, %v683_v34, %v680_v33  ;;  %v693_v53 = vsel %vm471_vm14, %v687_v25, %v679_v21 }
 0x110   : > { %699 = vrot.lane.b32.xlu0 %v689_v40, %s1594_s27  ;;  %v691_v50 = vsel %vm471_vm14, %v685_v41, %v681_v36 }
 0x112   : > { %v456_v39 = vpop.permute.xlu0 %455  ;;  %v458_v43 = vpop.permute.xlu1 %457 }
 0x113   : > { %v462_v48 = vsel %vm2168_vm0, %v456_v39, %v458_v43  ;;  %701 = vrot.lane.b32.xlu1 %v691_v50, %s1594_s27 }
 0x114   : > { %v473_v55 = vsel %vm471_vm14, %v467_v51, %v462_v48  ;;  %703 = vrot.lane.b32.xlu0 %v693_v53, %s1594_s27 }
 0x115   : > { %v599_v24 = vsel %vm548_vm2, %v473_v55, 0 }
 0x116   : > { %v460_v52 = vpop.permute.xlu0 %459 }
 0x117   : > { %v463_v20 = vsel %vm2168_vm0, %v458_v43, %v460_v52  ;;  %694 = vrot.lane.b32.xlu1 %v1508_v23, %s1595_s12 }
 0x118   : > { %v475_v58 = vsel %vm471_vm14, %v470_v56, %v463_v20  ;;  %763 = vperm.xlu0 %1561, %v760_v59  }
 0x119   : > { %1511 = vmatprep.subr.msk.bf16.mxu1 %vm548_vm2, %v475_v58 }
 0x11a   : > { %618 = vmatpush1.bf16.msra.mxu1 %v599_v24 }
 0x11d   : > { %1512 = vmatmul.mubr.msk.bf16.vlgmr.msra.gmra.mxu1 %vm544_vm8, %v342_v13 }
 0x11e   : > { %920 = vmatprep.mubr.bf16.mxu1 %v1583_v1 }
 0x179   : > { %v540_v60 = vpop.permute.xlu1 %539 }
 0x17b   : > { %v538_v61 = vpop.permute.xlu0 %537 }
 0x17c   : > { %v543_v62 = vsel %vm541_vm11, %v538_v61, %v540_v60 }
 0x17d   : > { %1509 = vmatprep.subr.msk.bf16.mxu0 %vm548_vm2, %v543_v62  ;;  %v536_v63 = vpop.permute.xlu1 %535 }
 0x17e   : > { %v542_v0 = vsel %vm541_vm11, %v536_v63, %v538_v61 }
 0x17f   : > { %v550_v2 = vsel %vm548_vm2, %v542_v0, 0 }
 0x180   : > { %570 = vmatpush1.bf16.msra.mxu0 %v550_v2 }
 0x181   : > { %v531_v3 = vpop.permute.xlu1 %530 }
 0x182   : > { %v700_v4 = vpop.permute.xlu0 %699 }
 0x183   : > { %1510 = vmatmul.mubr.msk.bf16.vlgmr.msra.gmra.mxu0 %vm544_vm8, %v531_v3 }
 0x184   : > { %749 = vmatprep.mubr.bf16.mxu0 %v1583_v1 }
 0x185   : > { %v702_v5 = vpop.permute.xlu1 %701 }
 0x186   : > { %v706_v6 = vsel %vm705_vm5, %v700_v4, %v702_v5  ;;  %v704_v7 = vpop.permute.xlu0 %703 }
 0x187   : > { %v712_v8 = vsel %vm548_vm2, %v706_v6, 0  ;;  %v707_v9 = vsel %vm705_vm5, %v702_v5, %v704_v7 }
 0x188   : > { %1513 = vmatprep.subr.msk.bf16.mxu0 %vm548_vm2, %v707_v9 }
 0x189   : > { %732 = vmatpush1.bf16.msra.mxu0 %v712_v8  ;;  %v695_v10 = vpop.permute.xlu1 %694 }
 0x18c   : > { %1514 = vmatmul.mubr.msk.bf16.vlgmr.msra.gmra.mxu0 %vm544_vm8, %v695_v10 }
 0x18d   : > { %970 = vmatprep.mubr.bf16.mxu0 %v1583_v1 }
 0x193   : > { %v764_v32 = vpop.permute.xlu0 %763 }
 0x1dd   : > { %v637_v11 = vpop.f32.mrf.mxu1 }
 0x1df   : > { %v639_v12 = vpop.f32.mrf.mxu1 }
 0x1e1   : > { %v641_v13 = vpop.f32.mrf.mxu1 }
 0x1e3   : > { %v642_v15 = vpop.f32.mrf.mxu1 }
 0x243   : > { %v589_v19 = vpop.f32.mrf.mxu0 }
 0x244   : > { %v638_v27 = vadd.f32 %v637_v11, %v589_v19 }
 0x245   : > { %v591_v21 = vpop.f32.mrf.mxu0 }
 0x246   : > { %v640_v33 = vadd.f32 %v639_v12, %v591_v21 }
 0x247   : > { %v593_v23 = vpop.f32.mrf.mxu0 }
 0x249   : > { %v594_v26 = vpop.f32.mrf.mxu0 }
 0x24a   : > { %v776_v26 = vld [vmem:[%s2152_s3] sm:$0xf] }
 0x24c   : > { %v751_v28 = vpop.f32.mrf.mxu0 }
 0x24d   : > { %v758_v34 = vadd.f32 %v751_v28, %v638_v27 }
 0x24e   : > { %v753_v36 = vpop.f32.mrf.mxu0 }
 0x24f   : > { %v766_v39 = vadd.f32 %v764_v32, %v758_v34  ;;  %v759_v40 = vadd.f32 %v753_v36, %v640_v33  ;;  %v1515_v36 = vcombine.low %v776_v26, %v776_v26 }
 0x250   : > { %v755_v41 = vpop.f32.mrf.mxu0 }
 0x251   : > { %vm768_vm2 = vcmp.gt.f32.partialorder %v766_v39, 0.0  ;;  %v770_v25 = vmul.f32 0.01, %v766_v39  ;;  %v767_v43 = vadd.f32 %v764_v32, %v759_v40 }
 0x252   : > { %v756_v46 = vpop.f32.mrf.mxu0 }
 0x253   : > { %v771_v48 = vmul.f32 0.01, %v767_v43  ;;  %v772_v50 = vsel %vm768_vm2, %v766_v39, %v770_v25  ;;  %vm769_vm8 = vcmp.gt.f32.partialorder %v767_v43, 0.0  ;;  %vm2170_vm2 = vcmp.ne.s16.totalorder %v1743_v45, 0 }
 0x254   : > { %v774_v51 = vpack.c.bf16 %v772_v50, %v772_v50 }
 0x255   : > { %v773_v52 = vsel %vm769_vm8, %v767_v43, %v771_v48  ;;  %vm2171_vm8 = vcmp.ne.s16.totalorder %v1724_v38, 0 }
 0x256   : > { %779 = vrot.lane.b32.xlu1 %v774_v51, %s1584_s15  ;;  %v775_v53 = vpack.c.bf16 %v773_v52, %v773_v52 }
 0x25a   : > { %781 = vrot.lane.b32.xlu1 %v775_v53, %s1584_s15 }
 0x2c8   : > { %v780_v54 = vpop.permute.xlu1 %779 }
 0x2c9   : > { %v1874_v55 = vsel %vm380_vm6, 0, %v780_v54 }
 0x2ca   : > { %v831_v20 = vsel %vm494_vm7, %v1874_v55, 0  ;;  %v798_v63 = vrot.slane %v1874_v55, 4  ;;  %v982_v0 = vsel %vm662_vm12, %v1874_v55, 0  ;;  %v793_v4 = vsel %vm429_vm1, %v1874_v55, 0 }
 0x2cb   : > { %837 = vrot.lane.b32.xlu0 %v831_v20, %s1591_s22 }
 0x2cc   : > { %v782_v56 = vpop.permute.xlu1 %781 }
 0x2cd   : > { %v1881_v58 = vsel %vm380_vm6, %v780_v54, %v782_v56  ;;  %v1884_v59 = vsel %vm380_vm6, %v782_v56, 0 }
 0x2ce   : > { %v833_v24 = vsel %vm496_vm9, %v1884_v59, 0  ;;  %v832_v60 = vsel %vm495_vm10, %v1881_v58, 0  ;;  %v800_v61 = vrot.slane %v1884_v59, 4  ;;  %v799_v62 = vrot.slane %v1881_v58, 4 }
 0x2cf   : > { %841 = vrot.lane.b32.xlu0 %v833_v24, %s1591_s22  ;;  %839 = vrot.lane.b32.xlu1 %v832_v60, %s1591_s22  ;;  %v984_v2 = vsel %vm664_vm13, %v1884_v59, 0  ;;  %v983_v3 = vsel %vm663_vm15, %v1881_v58, 0  ;;  %v794_v5 = vsel %vm430_vm3, %v1881_v58, 0  ;;  %v795_v6 = vsel %vm2170_vm2, %v1884_v59, 0 }
 0x2d0   : > { %v830_v33 = vsel %vm2171_vm8, %v1884_v59, 0  ;;  %vm2172_vm2 = vcmask 1039360   ;;  %v792_v48 = vsel %vm2169_vm4, %v1881_v58, 0  ;;  %vm878_vm4 = vcmask 195584  }
 0x2d1   : > { %vm2173_vm8 = vmmov %vm2172_vm2 }
 0x2d3   : > { %805 = vrot.lane.b32.xlu0 %v800_v61, %s1590_s21  ;;  %803 = vrot.lane.b32.xlu1 %v799_v62, %s1590_s21 }
 0x2d7   : > { %988 = vrot.lane.b32.xlu0 %v982_v0, %s1591_s22  ;;  %801 = vrot.lane.b32.xlu1 %v798_v63, %s1590_s21 }
 0x2db   : > { %992 = vrot.lane.b32.xlu0 %v984_v2, %s1591_s22  ;;  %990 = vrot.lane.b32.xlu1 %v983_v3, %s1591_s22  ;;  %v1097_v2 = vld [vmem:[%s2154_s5] sm:$0xff] }
 0x2df   : > { %812 = vrot.lane.b32.xlu1 %v793_v4, %s1591_s22  ;;  %814 = vrot.lane.b32.xlu0 %v794_v5, %s1591_s22 }
 0x2e3   : > { %816 = vrot.lane.b32.xlu1 %v795_v6, %s1591_s22 }
 0x33d   : > { %v838_v7 = vpop.permute.xlu0 %837 }
 0x341   : > { %v842_v8 = vpop.permute.xlu0 %841  ;;  %v840_v9 = vpop.permute.xlu1 %839 }
 0x342   : > { %870 = vrot.lane.b32.xlu1 %v842_v8, %s1592_s23  ;;  %v843_v12 = vsel %vm2168_vm0, %v838_v7, %v840_v9  ;;  %v844_v32 = vsel %vm2168_vm0, %v840_v9, %v842_v8 }
 0x345   : > { %v806_v10 = vpop.permute.xlu0 %805  ;;  %v804_v11 = vpop.permute.xlu1 %803 }
 0x346   : > { %866 = vrot.lane.b32.xlu1 %v843_v12, %s1592_s23  ;;  %v851_v34 = vsel %vm471_vm14, %v830_v33, %v806_v10  ;;  %v808_v40 = vsel %vm2172_vm2, %v804_v11, %v806_v10  ;;  %vm2174_vm2 = vcmp.ne.s16.totalorder %v1740_v44, 0 }
 0x347   : > { %v826_v51 = vsel %vm471_vm14, %v792_v48, %v808_v40  ;;  %v829_v52 = vsel %vm2174_vm2, %v1881_v58, 0  ;;  %vm2177_vm2 = vcmp.ne.s16.totalorder %v1732_v42, 0 }
 0x348   : > { %v848_v53 = vsel %vm471_vm14, %v829_v52, %v808_v40  ;;  %v828_v60 = vsel %vm2177_vm2, %v1874_v55, 0 }
 0x349   : > { %v989_v13 = vpop.permute.xlu0 %988  ;;  %v802_v15 = vpop.permute.xlu1 %801 }
 0x34a   : > { %v807_v50 = vsel %vm2173_vm8, %v802_v15, %v804_v11  ;;  %vm2176_vm8 = vcmp.ne.s16.totalorder %v1674_v18, 0 }
 0x34b   : > { %v791_v56 = vsel %vm2176_vm8, %v1874_v55, 0  ;;  %vm2179_vm8 = vcmp.ne.s16.totalorder %v1773_v57, 0 }
 0x34c   : > { %v822_v24 = vsel %vm471_vm14, %v791_v56, %v807_v50  ;;  %v979_v63 = vsel %vm2179_vm8, %v1874_v55, 0  ;;  %vm2189_vm8 = vcmp.ne.s16.totalorder %v1671_v17, 0 }
 0x34d   : > { %v993_v19 = vpop.permute.xlu0 %992  ;;  %v991_v21 = vpop.permute.xlu1 %990  ;;  %v997_v0 = vsel %vm471_vm14, %v979_v63, %v807_v50 }
 0x34e   : > { %1017 = vrot.lane.b32.xlu0 %v993_v19, %s1594_s27  ;;  %v995_v23 = vsel %vm2168_vm0, %v991_v21, %v993_v19  ;;  %v994_v25 = vsel %vm2168_vm0, %v989_v13, %v991_v21 }
 0x34f   : > { %1015 = vrot.lane.b32.xlu1 %v995_v23, %s1594_s27 }
 0x351   : > { %v813_v27 = vpop.permute.xlu1 %812  ;;  %v815_v28 = vpop.permute.xlu0 %814 }
 0x352   : > { %868 = vrot.lane.b32.xlu0 %v844_v32, %s1592_s23  ;;  %v818_v39 = vsel %vm2168_vm0, %v813_v27, %v815_v28 }
 0x353   : > { %864 = vrot.lane.b32.xlu1 %v851_v34, %s1592_s23  ;;  %v933_v46 = vsel %vm471_vm14, %v818_v39, 0 }
 0x355   : > { %v817_v41 = vpop.permute.xlu1 %816 }
 0x356   : > { %v819_v43 = vsel %vm2168_vm0, %v815_v28, %v817_v41  ;;  %1013 = vrot.lane.b32.xlu0 %v994_v25, %s1594_s27  ;;  %vm2175_vm0 = vcmp.ne.s16.totalorder %v1803_v14, 0 }
 0x357   : > { %855 = vrot.lane.b32.xlu1 %v1515_v36, %s1595_s12  ;;  %1518 = vmatprep.subr.msk.bf16.mxu0 %vm471_vm14, %v819_v43  ;;  %v981_v54 = vsel %vm2175_vm0, %v1884_v59, 0  ;;  %v846_v59 = vsel %vm471_vm14, %v828_v60, %v807_v50  ;;  %vm2178_vm0 = vcmp.ne.s16.totalorder %v1809_v16, 0 }
 0x358   : > { %951 = vmatpush1.bf16.msra.mxu0 %v933_v46  ;;  %v1001_v20 = vsel %vm471_vm14, %v981_v54, %v806_v10  ;;  %v980_v61 = vsel %vm2178_vm0, %v1881_v58, 0  ;;  %v1089_v58 = vld [vmem:[%s2153_s4] sm:$0xff] }
 0x359   : > { %952 = vmatprep.subr.bf16.mxu0 %v826_v51  ;;  %v999_v62 = vsel %vm471_vm14, %v980_v61, %v808_v40 }
 0x35a   : > { %862 = vrot.lane.b32.xlu0 %v848_v53, %s1592_s23 }
 0x35b   : > { %1011 = vrot.lane.b32.xlu1 %v1001_v20, %s1594_s27 }
 0x35c   : > { %953 = vmatpush1.bf16.msra.mxu0 %v822_v24 }
 0x35e   : > { %860 = vrot.lane.b32.xlu0 %v846_v59, %s1592_s23 }
 0x35f   : > { %1002 = vrot.lane.b32.xlu1 %v1515_v36, %s1596_s16  ;;  %1519 = vmatmul.mubr.msk.bf16.vlgmr.msra.gmra.mxu0 %vm878_vm4, %v776_v26 }
 0x360   : > { %1250 = vmatprep.mubr.bf16.mxu0 %v1583_v1 }
 0x362   : > { %1009 = vrot.lane.b32.xlu0 %v999_v62, %s1594_s27 }
 0x363   : > { %1100 = vperm.xlu1 %1562, %v1097_v2  }
 0x366   : > { %1007 = vrot.lane.b32.xlu0 %v997_v0, %s1594_s27 }
 0x36a   : > { %1092 = vperm.xlu0 %1561, %v1089_v58  }
 0x3b4   : > { %v871_v3 = vpop.permute.xlu1 %870 }
 0x3b8   : > { %v867_v4 = vpop.permute.xlu1 %866 }
 0x3c0   : > { %v1018_v5 = vpop.permute.xlu0 %1017 }
 0x3c1   : > { %v1016_v6 = vpop.permute.xlu1 %1015 }
 0x3c2   : > { %v1022_v23 = vsel %vm705_vm5, %v1016_v6, %v1018_v5 }
 0x3c4   : > { %v869_v7 = vpop.permute.xlu0 %868 }
 0x3c5   : > { %v874_v55 = vsel %vm541_vm11, %v867_v4, %v869_v7  ;;  %v875_v8 = vsel %vm541_vm11, %v869_v7, %v871_v3  ;;  %v865_v10 = vpop.permute.xlu1 %864 }
 0x3c6   : > { %v883_v9 = vsel %vm471_vm14, %v874_v55, 0  ;;  %1516 = vmatprep.subr.msk.bf16.mxu1 %vm471_vm14, %v875_v8 }
 0x3c7   : > { %901 = vmatpush1.bf16.msra.mxu1 %v883_v9 }
 0x3c8   : > { %v1014_v11 = vpop.permute.xlu0 %1013 }
 0x3c9   : > { %v856_v15 = vpop.permute.xlu1 %855  ;;  %v1021_v26 = vsel %vm705_vm5, %v1014_v11, %v1016_v6 }
 0x3ca   : > { %v1029_v32 = vsel %vm471_vm14, %v1021_v26, 0 }
 0x3cc   : > { %v863_v12 = vpop.permute.xlu0 %862 }
 0x3cd   : > { %v873_v13 = vsel %vm541_vm11, %v863_v12, %v865_v10  ;;  %v1012_v27 = vpop.permute.xlu1 %1011 }
 0x3ce   : > { %902 = vmatprep.subr.bf16.mxu1 %v873_v13 }
 0x3d0   : > { %v861_v19 = vpop.permute.xlu0 %860 }
 0x3d1   : > { %v872_v21 = vsel %vm541_vm11, %v861_v19, %v863_v12  ;;  %v1003_v39 = vpop.permute.xlu1 %1002 }
 0x3d2   : > { %903 = vmatpush1.bf16.msra.mxu1 %v872_v21 }
 0x3d3   : > { %1520 = vmatprep.subr.msk.bf16.mxu1 %vm471_vm14, %v1022_v23 }
 0x3d4   : > { %v1010_v28 = vpop.permute.xlu0 %1009 }
 0x3d5   : > { %1517 = vmatmul.mubr.msk.bf16.vlgmr.msra.gmra.mxu1 %vm878_vm4, %v856_v15  ;;  %v1020_v33 = vsel %vm705_vm5, %v1010_v28, %v1012_v27 }
 0x3d6   : > { %1047 = vmatpush1.bf16.msra.mxu1 %v1029_v32  ;;  %1066 = vmatprep.mubr.bf16.mxu1 %v1583_v1 }
 0x3d7   : > { %1048 = vmatprep.subr.bf16.mxu1 %v1020_v33 }
 0x3d8   : > { %v1008_v34 = vpop.permute.xlu0 %1007 }
 0x3d9   : > { %v1019_v36 = vsel %vm705_vm5, %v1008_v34, %v1010_v28 }
 0x3da   : > { %1049 = vmatpush1.bf16.msra.mxu1 %v1019_v36 }
 0x3dd   : > { %1521 = vmatmul.mubr.msk.bf16.vlgmr.msra.gmra.mxu1 %vm878_vm4, %v1003_v39 }
 0x3de   : > { %1300 = vmatprep.mubr.bf16.mxu1 %v1583_v1  ;;  %v1101_v5 = vpop.permute.xlu1 %1100 }
 0x3e5   : > { %v1093_v4 = vpop.permute.xlu0 %1092 }
 0x41f   : > { %v972_v40 = vpop.f32.mrf.mxu0 }
 0x421   : > { %v974_v41 = vpop.f32.mrf.mxu0 }
 0x423   : > { %v976_v25 = vpop.f32.mrf.mxu0 }
 0x425   : > { %v977_v43 = vpop.f32.mrf.mxu0 }
 0x495   : > { %v922_v46 = vpop.f32.mrf.mxu1 }
 0x496   : > { %v973_v52 = vadd.f32 %v972_v40, %v922_v46 }
 0x497   : > { %v924_v48 = vpop.f32.mrf.mxu1 }
 0x498   : > { %v975_v54 = vadd.f32 %v974_v41, %v924_v48 }
 0x499   : > { %v926_v50 = vpop.f32.mrf.mxu1 }
 0x49b   : > { %v927_v51 = vpop.f32.mrf.mxu1 }
 0x49d   : > { %v1068_v53 = vpop.f32.mrf.mxu1 }
 0x49e   : > { %v1075_v20 = vadd.f32 %v1068_v53, %v973_v52  ;;  %v1107_v52 = vld [vmem:[%s2155_s6] sm:$0xf] }
 0x49f   : > { %v1070_v56 = vpop.f32.mrf.mxu1 }
 0x4a0   : > { %v1079_v24 = vmin.f32 %v1075_v20, 0.0  ;;  %v1076_v60 = vadd.f32 %v1070_v56, %v975_v54  ;;  %vm1077_vm2 = vcmp.gt.f32.partialorder %v1075_v20, 0.0 }
 0x4a1   : > { %v1072_v59 = vpop.f32.mrf.mxu1 }
 0x4a2   : > { %v1081_v61 = vmul.f32 1.442695, %v1079_v24  ;;  %v1080_v62 = vmin.f32 %v1076_v60, 0.0  ;;  %vm1078_vm0 = vcmp.gt.f32.partialorder %v1076_v60, 0.0 }
 0x4a3   : > { %v1073_v63 = vpop.f32.mrf.mxu1 }
 0x4a4   : > { %1567 = vpow2.f32 %v1081_v61  ;;  %v1083_v0 = vmul.f32 1.442695, %v1080_v62  ;;  %v1524_v61 = vcombine.low %v1107_v52, %v1107_v52 }
 0x4a6   : > { %1569 = vpow2.f32 %v1083_v0 }
 0x4b1   : > { %v1568_v2 = vpop.eup %1567 }
 0x4b2   : > { %v1522_v58 = vadd.f32 -1.0, %v1568_v2 }
 0x4b3   : > { %v1570_v3 = vpop.eup %1569 }
 0x4b4   : > { %v1523_v6 = vadd.f32 -1.0, %v1570_v3  ;;  %v1087_v7 = vsel %vm1077_vm2, %v1075_v20, %v1522_v58 }
 0x4b5   : > { %v1095_v55 = vmul.f32 %v1093_v4, %v1087_v7 }
 0x4b6   : > { %v1088_v8 = vsel %vm1078_vm0, %v1076_v60, %v1523_v6  ;;  %vm2191_vm0 = vcmp.ne.s16.totalorder %v1740_v44, 0 }
 0x4b7   : > { %v1096_v9 = vmul.f32 %v1093_v4, %v1088_v8  ;;  %v1103_v10 = vadd.f32 %v1101_v5, %v1095_v55  ;;  %v1427_v55 = vld [vmem:[%s2157_s8] sm:$0xff] }
 0x4b9   : > { %v1104_v11 = vadd.f32 %v1101_v5, %v1096_v9  ;;  %v1105_v12 = vpack.c.bf16 %v1103_v10, %v1103_v10 }
 0x4bb   : > { %v1106_v13 = vpack.c.bf16 %v1104_v11, %v1104_v11  ;;  %1110 = vrot.lane.b32.xlu0 %v1105_v12, %s1584_s15 }
 0x4bd   : > { %1112 = vrot.lane.b32.xlu1 %v1106_v13, %s1584_s15 }
 0x52d   : > { %v1111_v15 = vpop.permute.xlu0 %1110 }
 0x52e   : > { %v2010_v19 = vsel %vm380_vm6, 0, %v1111_v15 }
 0x52f   : > { %v1113_v21 = vpop.permute.xlu1 %1112  ;;  %v1162_v23 = vsel %vm494_vm7, %v2010_v19, 0  ;;  %v1129_v34 = vrot.slane %v2010_v19, 4  ;;  %v1312_v31 = vsel %vm662_vm12, %v2010_v19, 0  ;;  %v1124_v39 = vsel %vm429_vm1, %v2010_v19, 0 }
 0x530   : > { %v2016_v26 = vsel %vm380_vm6, %v1111_v15, %v1113_v21  ;;  %v2019_v27 = vsel %vm380_vm6, %v1113_v21, 0  ;;  %1168 = vrot.lane.b32.xlu0 %v1162_v23, %s1591_s22  ;;  %vm2180_vm6 = vcmp.ne.s16.totalorder %v1743_v45, 0  ;;  %vm2181_vm7 = vcmask 1031168  }
 0x531   : > { %v1163_v28 = vsel %vm495_vm10, %v2016_v26, 0  ;;  %v1164_v32 = vsel %vm496_vm9, %v2019_v27, 0  ;;  %v1130_v22 = vrot.slane %v2016_v26, 4  ;;  %v1131_v33 = vrot.slane %v2019_v27, 4  ;;  %vm2182_vm9 = vmmov %vm2181_vm7 }
 0x532   : > { %1170 = vrot.lane.b32.xlu1 %v1163_v28, %s1591_s22  ;;  %v1313_v29 = vsel %vm663_vm15, %v2016_v26, 0  ;;  %v1314_v36 = vsel %vm664_vm13, %v2019_v27, 0  ;;  %v1125_v35 = vsel %vm430_vm3, %v2016_v26, 0  ;;  %v1126_v37 = vsel %vm2180_vm6, %v2019_v27, 0  ;;  %vm2183_vm10 = vmmov %vm2181_vm7 }
 0x533   : > { %vm2184_vm12 = vcmp.ne.s16.totalorder %v1724_v38, 0  ;;  %vm2185_vm13 = vmmov %vm2181_vm7  ;;  %vm2186_vm15 = vcmask 1039360   ;;  %v1123_v0 = vsel %vm2189_vm8, %v2016_v26, 0  ;;  %v1160_v3 = vsel %vm2191_vm0, %v2016_v26, 0 }
 0x534   : > { %1172 = vrot.lane.b32.xlu0 %v1164_v32, %s1591_s22  ;;  %v1161_v20 = vsel %vm2184_vm12, %v2019_v27, 0  ;;  %vm2187_vm1 = vmmov %vm2181_vm7  ;;  %vm2192_vm6 = vcmp.ne.s16.totalorder %v1674_v18, 0  ;;  %vm2196_vm12 = vcmp.ne.s16.totalorder %v1773_v57, 0 }
 0x535   : > { %vm2188_vm3 = vmmov %vm2187_vm1  ;;  %v1122_v4 = vsel %vm2192_vm6, %v2010_v19, 0 }
 0x536   : > { %1134 = vrot.lane.b32.xlu1 %v1130_v22, %s1590_s21  ;;  %vm2190_vm2 = vmmov %vm2186_vm15 }
 0x538   : > { %1136 = vrot.lane.b32.xlu0 %v1131_v33, %s1590_s21 }
 0x53a   : > { %1132 = vrot.lane.b32.xlu1 %v1129_v34, %s1590_s21 }
 0x53c   : > { %1318 = vrot.lane.b32.xlu0 %v1312_v31, %s1591_s22 }
 0x53e   : > { %1320 = vrot.lane.b32.xlu1 %v1313_v29, %s1591_s22 }
 0x540   : > { %1322 = vrot.lane.b32.xlu0 %v1314_v36, %s1591_s22 }
 0x542   : > { %1143 = vrot.lane.b32.xlu1 %v1124_v39, %s1591_s22 }
 0x544   : > { %1145 = vrot.lane.b32.xlu0 %v1125_v35, %s1591_s22 }
 0x546   : > { %1147 = vrot.lane.b32.xlu1 %v1126_v37, %s1591_s22 }
 0x5a2   : > { %v1169_v30 = vpop.permute.xlu0 %1168 }
 0x5a4   : > { %v1171_v40 = vpop.permute.xlu1 %1170 }
 0x5a5   : > { %v1174_v43 = vsel %vm2181_vm7, %v1169_v30, %v1171_v40  ;;  %vm2193_vm7 = vcmp.ne.s16.totalorder %v1803_v14, 0 }
 0x5a6   : > { %v1173_v41 = vpop.permute.xlu0 %1172  ;;  %v1311_v6 = vsel %vm2193_vm7, %v2019_v27, 0 }
 0x5a7   : > { %1201 = vrot.lane.b32.xlu1 %v1173_v41, %s1592_s23  ;;  %v1175_v54 = vsel %vm2183_vm10, %v1171_v40, %v1173_v41  ;;  %vm2195_vm10 = vcmp.ne.s16.totalorder %v1809_v16, 0  ;;  %v1419_v16 = vld [vmem:[%s2156_s7] sm:$0xff] }
 0x5a8   : > { %v1135_v47 = vpop.permute.xlu1 %1134  ;;  %v1310_v14 = vsel %vm2195_vm10, %v2016_v26, 0 }
 0x5aa   : > { %v1137_v25 = vpop.permute.xlu0 %1136 }
 0x5ab   : > { %1197 = vrot.lane.b32.xlu1 %v1174_v43, %s1592_s23  ;;  %v1182_v24 = vsel %vm471_vm14, %v1161_v20, %v1137_v25  ;;  %v1139_v60 = vsel %vm2186_vm15, %v1135_v47, %v1137_v25  ;;  %v1331_v7 = vsel %vm471_vm14, %v1311_v6, %v1137_v25 }
 0x5ac   : > { %v1133_v49 = vpop.permute.xlu1 %1132  ;;  %v1157_v58 = vsel %vm471_vm14, %v1123_v0, %v1139_v60  ;;  %v1179_v17 = vsel %vm471_vm14, %v1160_v3, %v1139_v60  ;;  %v1329_v8 = vsel %vm471_vm14, %v1310_v14, %v1139_v60 }
 0x5ad   : > { %v1138_v2 = vsel %vm2190_vm2, %v1133_v49, %v1135_v47 }
 0x5ae   : > { %v1319_v46 = vpop.permute.xlu0 %1318  ;;  %v1153_v5 = vsel %vm471_vm14, %v1122_v4, %v1138_v2 }
 0x5b0   : > { %v1321_v48 = vpop.permute.xlu1 %1320 }
 0x5b1   : > { %v1324_v38 = vsel %vm2188_vm3, %v1319_v46, %v1321_v48 }
 0x5b2   : > { %v1323_v50 = vpop.permute.xlu0 %1322 }
 0x5b3   : > { %1347 = vrot.lane.b32.xlu0 %v1323_v50, %s1594_s27  ;;  %v1325_v45 = vsel %vm2182_vm9, %v1321_v48, %v1323_v50  ;;  %vm2194_vm9 = vcmp.ne.s16.totalorder %v1732_v42, 0  ;;  %v1309_v42 = vsel %vm2196_vm12, %v2010_v19, 0 }
 0x5b4   : > { %1345 = vrot.lane.b32.xlu1 %v1325_v45, %s1594_s27  ;;  %v1144_v51 = vpop.permute.xlu1 %1143  ;;  %v1159_v18 = vsel %vm2194_vm9, %v2010_v19, 0  ;;  %v1327_v9 = vsel %vm471_vm14, %v1309_v42, %v1138_v2 }
 0x5b5   : > { %v1177_v44 = vsel %vm471_vm14, %v1159_v18, %v1138_v2 }
 0x5b6   : > { %v1146_v53 = vpop.permute.xlu0 %1145 }
 0x5b7   : > { %v1149_v56 = vsel %vm2185_vm13, %v1144_v51, %v1146_v53  ;;  %1199 = vrot.lane.b32.xlu0 %v1175_v54, %s1592_s23 }
 0x5b8   : > { %1195 = vrot.lane.b32.xlu1 %v1182_v24, %s1592_s23  ;;  %v1148_v59 = vpop.permute.xlu1 %1147  ;;  %v1263_v63 = vsel %vm471_vm14, %v1149_v56, 0 }
 0x5b9   : > { %v1150_v62 = vsel %vm2187_vm1, %v1146_v53, %v1148_v59 }
 0x5ba   : > { %1527 = vmatprep.subr.msk.bf16.mxu1 %vm471_vm14, %v1150_v62 }
 0x5bb   : > { %1343 = vrot.lane.b32.xlu0 %v1324_v38, %s1594_s27  ;;  %1281 = vmatpush1.bf16.msra.mxu1 %v1263_v63 }
 0x5bc   : > { %1186 = vrot.lane.b32.xlu1 %v1524_v61, %s1595_s12  ;;  %1282 = vmatprep.subr.bf16.mxu1 %v1157_v58 }
 0x5bf   : > { %1193 = vrot.lane.b32.xlu0 %v1179_v17, %s1592_s23  ;;  %1283 = vmatpush1.bf16.msra.mxu1 %v1153_v5 }
 0x5c0   : > { %1341 = vrot.lane.b32.xlu1 %v1331_v7, %s1594_s27 }
 0x5c2   : > { %1528 = vmatmul.mubr.msk.bf16.vlgmr.msra.gmra.mxu1 %vm878_vm4, %v1107_v52 }
 0x5c3   : > { %1191 = vrot.lane.b32.xlu0 %v1177_v44, %s1592_s23 }
 0x5c4   : > { %1332 = vrot.lane.b32.xlu1 %v1524_v61, %s1596_s16 }
 0x5c7   : > { %1339 = vrot.lane.b32.xlu0 %v1329_v8, %s1594_s27 }
 0x5c8   : > { %1430 = vperm.xlu1 %1562, %v1427_v55  }
 0x5cb   : > { %1337 = vrot.lane.b32.xlu0 %v1327_v9, %s1594_s27 }
 0x5cf   : > { %1422 = vperm.xlu0 %1561, %v1419_v16  }
 0x619   : > { %v1202_v10 = vpop.permute.xlu1 %1201 }
 0x61d   : > { %v1198_v11 = vpop.permute.xlu1 %1197 }
 0x625   : > { %v1348_v12 = vpop.permute.xlu0 %1347 }
 0x626   : > { %v1346_v13 = vpop.permute.xlu1 %1345 }
 0x627   : > { %v1352_v34 = vsel %vm705_vm5, %v1346_v13, %v1348_v12 }
 0x629   : > { %v1200_v15 = vpop.permute.xlu0 %1199 }
 0x62a   : > { %v1205_v21 = vsel %vm541_vm11, %v1198_v11, %v1200_v15  ;;  %v1206_v23 = vsel %vm541_vm11, %v1200_v15, %v1202_v10  ;;  %v1196_v19 = vpop.permute.xlu1 %1195 }
 0x62b   : > { %v1213_v57 = vsel %vm471_vm14, %v1205_v21, 0  ;;  %1525 = vmatprep.subr.msk.bf16.mxu0 %vm471_vm14, %v1206_v23 }
 0x62c   : > { %1231 = vmatpush1.bf16.msra.mxu0 %v1213_v57 }
 0x62d   : > { %v1344_v26 = vpop.permute.xlu0 %1343 }
 0x62e   : > { %v1187_v32 = vpop.permute.xlu1 %1186  ;;  %v1351_v31 = vsel %vm705_vm5, %v1344_v26, %v1346_v13 }
 0x62f   : > { %v1359_v39 = vsel %vm471_vm14, %v1351_v31, 0 }
 0x631   : > { %v1194_v27 = vpop.permute.xlu0 %1193 }
 0x632   : > { %v1204_v28 = vsel %vm541_vm11, %v1194_v27, %v1196_v19  ;;  %v1342_v29 = vpop.permute.xlu1 %1341 }
 0x633   : > { %1232 = vmatprep.subr.bf16.mxu0 %v1204_v28 }
 0x635   : > { %v1192_v22 = vpop.permute.xlu0 %1191 }
 0x636   : > { %v1203_v33 = vsel %vm541_vm11, %v1192_v22, %v1194_v27  ;;  %v1333_v40 = vpop.permute.xlu1 %1332 }
 0x637   : > { %1233 = vmatpush1.bf16.msra.mxu0 %v1203_v33 }
 0x638   : > { %1529 = vmatprep.subr.msk.bf16.mxu0 %vm471_vm14, %v1352_v34 }
 0x639   : > { %v1340_v36 = vpop.permute.xlu0 %1339 }
 0x63a   : > { %1526 = vmatmul.mubr.msk.bf16.vlgmr.msra.gmra.mxu0 %vm878_vm4, %v1187_v32  ;;  %v1350_v35 = vsel %vm705_vm5, %v1340_v36, %v1342_v29 }
 0x63b   : > { %1377 = vmatpush1.bf16.msra.mxu0 %v1359_v39  ;;  %1396 = vmatprep.mubr.bf16.mxu0 %v1583_v1 }
 0x63c   : > { %1378 = vmatprep.subr.bf16.mxu0 %v1350_v35 }
 0x63d   : > { %v1338_v37 = vpop.permute.xlu0 %1337 }
 0x63e   : > { %v1349_v30 = vsel %vm705_vm5, %v1338_v37, %v1340_v36 }
 0x63f   : > { %1379 = vmatpush1.bf16.msra.mxu0 %v1349_v30 }
 0x642   : > { %1530 = vmatmul.mubr.msk.bf16.vlgmr.msra.gmra.mxu0 %vm878_vm4, %v1333_v40 }
 0x643   : > { %v1431_v5 = vpop.permute.xlu1 %1430 }
 0x64a   : > { %v1423_v0 = vpop.permute.xlu0 %1422 }
 0x682   : > { %v1302_v41 = vpop.f32.mrf.mxu1 }
 0x684   : > { %v1304_v47 = vpop.f32.mrf.mxu1 }
 0x686   : > { %v1306_v25 = vpop.f32.mrf.mxu1 }
 0x688   : > { %v1307_v43 = vpop.f32.mrf.mxu1 }
 0x6fa   : > { %v1252_v49 = vpop.f32.mrf.mxu0 }
 0x6fb   : > { %v1303_v45 = vadd.f32 %v1302_v41, %v1252_v49 }
 0x6fc   : > { %v1254_v46 = vpop.f32.mrf.mxu0 }
 0x6fd   : > { %v1305_v52 = vadd.f32 %v1304_v47, %v1254_v46 }
 0x6fe   : > { %v1256_v48 = vpop.f32.mrf.mxu0 }
 0x700   : > { %v1257_v50 = vpop.f32.mrf.mxu0 }
 0x702   : > { %v1398_v51 = vpop.f32.mrf.mxu0 }
 0x703   : > { %v1405_v1 = vadd.f32 %v1398_v51, %v1303_v45 }
 0x704   : > { %v1400_v53 = vpop.f32.mrf.mxu0 }
 0x705   : > { %v1409_v54 = vmin.f32 %v1405_v1, 0.0  ;;  %v1406_v20 = vadd.f32 %v1400_v53, %v1305_v52  ;;  %vm1407_vm4 = vcmp.gt.f32.partialorder %v1405_v1, 0.0 }
 0x706   : > { %v1402_v56 = vpop.f32.mrf.mxu0 }
 0x707   : > { %v1411_v24 = vmul.f32 1.442695, %v1409_v54  ;;  %v1410_v60 = vmin.f32 %v1406_v20, 0.0  ;;  %vm1408_vm5 = vcmp.gt.f32.partialorder %v1406_v20, 0.0 }
 0x708   : > { %v1403_v59 = vpop.f32.mrf.mxu0 }
 0x709   : > { %1571 = vpow2.f32 %v1411_v24  ;;  %v1413_v61 = vmul.f32 1.442695, %v1410_v60 }
 0x70b   : > { %1573 = vpow2.f32 %v1413_v61 }
 0x716   : > { %v1572_v62 = vpop.eup %1571 }
 0x717   : > { %v1531_v63 = vadd.f32 -1.0, %v1572_v62 }
 0x718   : > { %v1574_v38 = vpop.eup %1573 }
 0x719   : > { %v1417_v2 = vsel %vm1407_vm4, %v1405_v1, %v1531_v63  ;;  %v1532_v58 = vadd.f32 -1.0, %v1574_v38 }
 0x71a   : > { %v1425_v3 = vmul.f32 %v1423_v0, %v1417_v2 }
 0x71b   : > { %v1418_v4 = vsel %vm1408_vm5, %v1406_v20, %v1532_v58 }
 0x71c   : > { %v1426_v17 = vmul.f32 %v1423_v0, %v1418_v4  ;;  %v1433_v6 = vadd.f32 %v1431_v5, %v1425_v3 }
 0x71e   : > { %v1434_v7 = vadd.f32 %v1431_v5, %v1426_v17 }
 0x720   : > { %v1538_v18 = vpack.c.bf16 %v1434_v7, %v1433_v6 }
 0x722   : > { %1443 = vst [vmem:[%s332_s28] sm:$0xff] %v1538_v18 }
 0x723 PF: > { %s19_s30 = sadd.s32 1, %s1581_s30  }
 0x724   : > { %p16_p4 = scmp.ge.s32.totalorder %s19_s30, 4  }
 0x726   :  { %18 = sbr.rel (!%p16_p4) target bundleno = 1 (0x1), region = 86 }

// kernel: xlfmnet_forward.5
= control target key start
LH: loop header
LB: loop body
LE: loop exit
PB: predicated region body
PF: predicated region fallthrough
CT: control target
= control target key end

     0   :  { %s1788_s17 = smov 0   ;;  %s2372_s0 = inlined_call_operand.vmem [shape: bf16[2,8,256], index: 0, kind: input, shape index: {}]   ;;  %s2373_s1 = inlined_call_operand.vmem [shape: bf16[2,8,256], index: 1, kind: input, shape index: {}]   ;;  %s2374_s2 = inlined_call_operand.vmem [shape: bf16[8,72], index: 2, kind: input, shape index: {}]   ;;  %s2375_s3 = inlined_call_operand.vmem [shape: bf16[8,72], index: 3, kind: input, shape index: {}]   ;;  %s2376_s4 = inlined_call_operand.vmem [shape: f32[8,1], index: 4, kind: input, shape index: {}]   ;;  %s2377_s5 = inlined_call_operand.vmem [shape: f32[8,1], index: 5, kind: input, shape index: {}]   ;;  %s2378_s6 = inlined_call_operand.vmem [shape: bf16[8,72], index: 6, kind: input, shape index: {}]   ;;  %s2379_s7 = inlined_call_operand.vmem [shape: f32[8,1], index: 7, kind: input, shape index: {}]   ;;  %s2380_s8 = inlined_call_operand.vmem [shape: f32[8,1], index: 8, kind: input, shape index: {}]   ;;  %s2381_s9 = inlined_call_operand.vmem [shape: bf16[8,8], index: 9, kind: input, shape index: {}]   ;;  %s2382_s10 = inlined_call_operand.vmem [shape: f32[8,1], index: 10, kind: input, shape index: {}]   ;;  %s2383_s11 = inlined_call_operand.vmem [shape: f32[2,8,256], index: 11, kind: output, shape index: {}]  }
   0x1 LB: > { %s1622_s18 = sadd.s32 4294967295, %s1713_s17   ;;  %p1626_p0 = scmp.ge.s32.totalorder %s1713_s17, 1  ;;  %s1713_s17 = sphi %s1788_s17, %s21_s17  }
   0x2   : > { %p347_p1 = scmp.lt.s32.totalorder %s1713_s17, 3 }
   0x4   : > { %p348_p2 = pnand %p1626_p0, %p347_p1 }
   0x5   : > { %p392_p3 = scmp.lt.s32.totalorder (!%p348_p2), %s1622_s18, 1  ;;  %s1716_s23 = smov (!%p348_p2), 17  }
   0x6   : > { %351 = sbr.rel (%p348_p2) target bundleno = 1494 (0x5d6), region = 64  ;;  %s1717_s27 = smov (!%p348_p2), 18  }
   0x7   : > { %s1718_s28 = smov (!%p348_p2), 34   ;;  %s1719_s29 = smov (!%p348_p2), 2  }
   0x8   : > { %s1720_s30 = smov (!%p348_p2), 16   ;;  %s1721_s12 = smov (!%p348_p2), 32  }
   0x9   : > { %s1722_s13 = smov (!%p348_p2), 127   ;;  %s1723_s14 = smov (!%p348_p2), 126  }
   0xa   : > { %s1725_s20 = smov (!%p348_p2), 112   ;;  %s1726_s21 = smov (!%p348_p2), 96  }
   0xb   : > { %v412_v0 = vlaneseq  ;;  %v1715_v1 = vmov 0   ;;  %s2411_s18 = smov (!%p392_p3, %s1622_s18), 1  ;;  %vm452_vm6 = vcmask 138240   ;;  %vm558_vm9 = vcmask 146432   ;;  %v1909_v51 = vld [vmem:[%s2374_s2] sm:$0xf] }
   0xc   : > { %703 = vmatprep.mubr.bf16.mxu1 %v1715_v1  ;;  %653 = vmatprep.mubr.bf16.mxu0 %v1715_v1  ;;  %s1666_s19 = sshll.u32 %s2411_s18, 3  ;;  %vm728_vm13 = vcmask 277504   ;;  %v1918_v53 = vcombine.low %v1909_v51, %v1909_v51 }
   0xd   : > { %v413_v2 = vand.u32 127, %v412_v0  ;;  %1690 = vset.pattern.permute.xlu0 %v1715_v1  ;;  %1691 = vset.pattern.permute.xlu1 %v1715_v1  ;;  %v470_v3 = vshrl.u32 %v412_v0, 7  ;;  %s396_s22 = scalar_lea.vmem %s2372_s0, %s1666_s19  ;;  %s401_s26 = scalar_lea.vmem %s2373_s1, %s1666_s19 }
   0xe   : > { %v410_v6 = vld [vmem:[%s396_s22] sm:$0xff]  ;;  %s1724_s19 = smov 104   ;;  %s1727_s22 = smov 80  }
   0xf   : > { %v414_v4 = vadd.s32 128, %v413_v2  ;;  %v419_v5 = vand.u32 15, %v413_v2  ;;  %v1633_v8 = vcombine.low %v410_v6, %v410_v6  ;;  %v471_v9 = vsub.s32 0, %v470_v3  ;;  %v829_v15 = vld [vmem:[%s401_s26] sm:$0xff] }
  0x10   : > { %v1634_v10 = vcombine.high %v410_v6, %v410_v6  ;;  %v475_v11 = vsub.s32 4, %v470_v3  ;;  %v1643_v16 = vcombine.high %v829_v15, %v829_v15  ;;  %v1642_v17 = vcombine.low %v829_v15, %v829_v15 }
  0x11   : > { %v426_v7 = vand.u32 15, %v414_v4  ;;  %vm441_vm0 = vcmp.ne.s32.totalorder %v419_v5, 15  ;;  %448 = vrot.lane.b32.xlu1 %v1633_v8, %s1716_s23  ;;  %vm439_vm3 = vcmp.ne.s32.totalorder %v419_v5, 0 }
  0x13   : > { %vm442_vm1 = vcmp.ne.s32.totalorder %v426_v7, 15  ;;  %vm440_vm4 = vcmp.ne.s32.totalorder %v426_v7, 0 }
  0x14   : > { %vm485_vm2 = vmpackc.low %vm442_vm1, %vm441_vm0  ;;  %vm499_vm0 = vcmask 15360  }
  0x15   : > { %v486_v12 = vsel %vm485_vm2, 65537, %v1715_v1  ;;  %450 = vrot.lane.b32.xlu1 %v1634_v10, %s1716_s23  ;;  %vm467_vm5 = vmpackc.low %vm440_vm4, %vm439_vm3  ;;  %vm533_vm4 = vcmask 1043456  }
  0x16   : > { %v490_v13 = vrot.slane %v486_v12, %v471_v9  ;;  %v494_v14 = vrot.slane %v486_v12, %v475_v11  ;;  %v468_v18 = vsel %vm467_vm5, 65537, %v1715_v1 }
  0x17   : > { %v1815_v19 = vrot.slane %v468_v18, %v471_v9  ;;  %v1818_v20 = vrot.slane %v468_v18, %v475_v11 }
  0x18   : > { %554 = vrot.lane.b32.xlu0 %v490_v13, %s1717_s27 }
  0x19   : > { %726 = vrot.lane.b32.xlu1 %v494_v14, %s1718_s28 }
  0x1c   : > { %556 = vrot.lane.b32.xlu0 %v494_v14, %s1717_s27 }
  0x1d   : > { %838 = vrot.lane.b32.xlu1 %v1643_v16, %s1716_s23 }
  0x20   : > { %724 = vrot.lane.b32.xlu0 %v490_v13, %s1718_s28 }
  0x21   : > { %497 = vrot.lane.b32.xlu1 %v494_v14, %s1719_s29 }
  0x24   : > { %836 = vrot.lane.b32.xlu0 %v1642_v17, %s1716_s23 }
  0x25   : > { %542 = vrot.lane.b32.xlu1 %v1815_v19, %s1720_s30 }
  0x28   : > { %495 = vrot.lane.b32.xlu0 %v490_v13, %s1719_s29 }
  0x29   : > { %712 = vrot.lane.b32.xlu1 %v1815_v19, %s1721_s12 }
  0x2c   : > { %544 = vrot.lane.b32.xlu0 %v1818_v20, %s1720_s30 }
  0x30   : > { %714 = vrot.lane.b32.xlu0 %v1818_v20, %s1721_s12 }
  0x83   : > { %v449_v21 = vpop.permute.xlu1 %448 }
  0x84   : > { %v1834_v28 = vsel %vm452_vm6, 0, %v449_v21 }
  0x85   : > { %v509_v30 = vrot.slane %v1834_v28, 4 }
  0x87   : > { %v451_v23 = vpop.permute.xlu1 %450 }
  0x88   : > { %v1826_v24 = vsel %vm452_vm6, %v449_v21, %v451_v23  ;;  %v1829_v25 = vsel %vm452_vm6, %v451_v23, 0 }
  0x89   : > { %v511_v26 = vrot.slane %v1829_v25, 4  ;;  %v510_v27 = vrot.slane %v1826_v24, 4 }
  0x8a   : > { %v1823_v22 = vpop.permute.xlu0 %554 }
  0x8b   : > { %vm560_vm7 = vcmp.ne.s16.totalorder %v1823_v22, 0  ;;  %516 = vrot.lane.b32.xlu0 %v511_v26, %s1722_s13  ;;  %514 = vrot.lane.b32.xlu1 %v510_v27, %s1722_s13  ;;  %v1850_v33 = vpop.permute.xlu1 %726 }
  0x8c   : > { %v563_v31 = vsel %vm560_vm7, %v1834_v28, 0  ;;  %vm732_vm12 = vcmp.ne.s16.totalorder %v1850_v33, 0 }
  0x8d   : > { %v735_v44 = vsel %vm732_vm12, %v1829_v25, 0 }
  0x8e   : > { %v1837_v29 = vpop.permute.xlu0 %556 }
  0x8f   : > { %vm562_vm8 = vcmp.ne.s16.totalorder %v1837_v29, 0  ;;  %569 = vrot.lane.b32.xlu0 %v563_v31, %s1723_s14  ;;  %512 = vrot.lane.b32.xlu1 %v509_v30, %s1722_s13  ;;  %v1857_v35 = vsel %vm558_vm9, %v1823_v22, %v1837_v29  ;;  %v839_v40 = vpop.permute.xlu1 %838  ;;  %vm546_vm9 = vcmask 130048  }
  0x90   : > { %v565_v34 = vsel %vm562_vm8, %v1829_v25, 0  ;;  %vm561_vm11 = vcmp.ne.s16.totalorder %v1857_v35, 0  ;;  %v1878_v42 = vsel %vm452_vm6, %v839_v40, 0 }
  0x91   : > { %v564_v41 = vsel %vm561_vm11, %v1826_v24, 0  ;;  %v890_v46 = vsel %vm562_vm8, %v1878_v42, 0  ;;  %v857_v50 = vrot.slane %v1878_v42, 4  ;;  %v1040_v56 = vsel %vm732_vm12, %v1878_v42, 0 }
  0x92   : > { %v1846_v32 = vpop.permute.xlu0 %724 }
  0x93   : > { %vm730_vm10 = vcmp.ne.s16.totalorder %v1846_v32, 0  ;;  %573 = vrot.lane.b32.xlu0 %v565_v34, %s1723_s14  ;;  %v1889_v45 = vsel %vm728_vm13, %v1846_v32, %v1850_v33  ;;  %v1936_v58 = vpop.permute.xlu1 %497  ;;  %vm518_vm13 = vcmask 1039360  }
  0x94   : > { %v733_v39 = vsel %vm730_vm10, %v1834_v28, 0  ;;  %vm731_vm14 = vcmp.ne.s16.totalorder %v1889_v45, 0  ;;  %vm2384_vm1 = vcmp.ne.s16.totalorder %v1936_v58, 0 }
  0x95   : > { %v734_v48 = vsel %vm731_vm14, %v1826_v24, 0  ;;  %v506_v62 = vsel %vm2384_vm1, %v1829_v25, 0  ;;  %v852_v63 = vsel %vm2384_vm1, %v1878_v42, 0 }
  0x96   : > { %v837_v36 = vpop.permute.xlu0 %836 }
  0x97   : > { %v1862_v37 = vsel %vm452_vm6, 0, %v837_v36  ;;  %739 = vrot.lane.b32.xlu0 %v733_v39, %s1723_s14  ;;  %v1881_v43 = vsel %vm452_vm6, %v837_v36, %v839_v40  ;;  %v1971_v4 = vpop.permute.xlu1 %542 }
  0x98   : > { %v888_v38 = vsel %vm560_vm7, %v1862_v37, 0  ;;  %v856_v47 = vrot.slane %v1881_v43, 4  ;;  %v855_v49 = vrot.slane %v1862_v37, 4  ;;  %v889_v52 = vsel %vm561_vm11, %v1881_v43, 0 }
  0x99   : > { %894 = vrot.lane.b32.xlu1 %v888_v38, %s1723_s14  ;;  %v1038_v54 = vsel %vm730_vm10, %v1862_v37, 0  ;;  %v1039_v57 = vsel %vm731_vm14, %v1881_v43, 0 }
  0x9a   : > { %v1924_v55 = vpop.permute.xlu0 %495 }
  0x9b   : > { %743 = vrot.lane.b32.xlu0 %v735_v44, %s1723_s14  ;;  %vm501_vm15 = vcmp.ne.s16.totalorder %v1924_v55, 0  ;;  %v1949_v61 = vsel %vm499_vm0, %v1924_v55, %v1936_v58  ;;  %v1976_v6 = vpop.permute.xlu1 %712  ;;  %vm477_vm0 = vcmp.ne.s16.totalorder %v1815_v19, 0 }
  0x9c   : > { %v504_v59 = vsel %vm501_vm15, %v1834_v28, 0  ;;  %v850_v60 = vsel %vm501_vm15, %v1862_v37, 0  ;;  %vm2385_vm2 = vcmp.ne.s16.totalorder %v1949_v61, 0  ;;  %v848_v34 = vsel %vm477_vm0, %v1862_v37, 0 }
  0x9d   : > { %571 = vrot.lane.b32.xlu1 %v564_v41, %s1723_s14  ;;  %v851_v0 = vsel %vm2385_vm2, %v1881_v43, 0  ;;  %v505_v2 = vsel %vm2385_vm2, %v1826_v24, 0  ;;  %vm2388_vm2 = vcmp.ne.s16.totalorder %v1971_v4, 0 }
  0x9e   : > { %v1969_v3 = vpop.permute.xlu0 %544 }
  0x9f   : > { %860 = vrot.lane.b32.xlu0 %v856_v47, %s1722_s13  ;;  %vm2386_vm3 = vcmp.ne.s16.totalorder %v1969_v3, 0  ;;  %v2005_v26 = vsel %vm546_vm9, %v1971_v4, %v1969_v3  ;;  %vm2389_vm9 = vcmp.ne.s16.totalorder %v1818_v20, 0 }
  0xa0   : > { %v553_v8 = vsel %vm2386_vm3, %v1829_v25, 0  ;;  %vm2387_vm1 = vcmp.ne.s16.totalorder %v2005_v26, 0  ;;  %v887_v39 = vsel %vm2386_vm3, %v1878_v42, 0  ;;  %vm716_vm3 = vcmask 261120  }
  0xa1   : > { %898 = vrot.lane.b32.xlu1 %v890_v46, %s1723_s14  ;;  %v886_v46 = vsel %vm2387_vm1, %v1881_v43, 0 }
  0xa2   : > { %v1973_v5 = vpop.permute.xlu0 %714 }
  0xa3   : > { %858 = vrot.lane.b32.xlu0 %v855_v49, %s1722_s13  ;;  %vm720_vm5 = vcmp.ne.s16.totalorder %v1973_v5, 0  ;;  %v849_v49 = vsel %vm2389_vm9, %v1881_v43, 0 }
  0xa4   : > { %v723_v12 = vsel %vm720_vm5, %v1829_v25, 0 }
  0xa5   : > { %741 = vrot.lane.b32.xlu1 %v734_v48, %s1723_s14 }
  0xa7   : > { %896 = vrot.lane.b32.xlu0 %v889_v52, %s1723_s14 }
  0xa9   : > { %862 = vrot.lane.b32.xlu1 %v857_v50, %s1722_s13 }
  0xab   : > { %587 = vrot.lane.b32.xlu0 %v1918_v53, %s1724_s19 }
  0xad   : > { %1044 = vrot.lane.b32.xlu1 %v1038_v54, %s1723_s14  ;;  %v552_v54 = vsel %vm2387_vm1, %v1826_v24, 0 }
  0xaf   : > { %1046 = vrot.lane.b32.xlu0 %v1039_v57, %s1723_s14 }
  0xb1   : > { %1048 = vrot.lane.b32.xlu1 %v1040_v56, %s1723_s14 }
  0xb3   : > { %869 = vrot.lane.b32.xlu0 %v850_v60, %s1723_s14  ;;  %v2064_v60 = vsel %vm716_vm3, %v1976_v6, %v1973_v5  ;;  %vm2390_vm3 = vcmp.ne.s16.totalorder %v1976_v6, 0 }
  0xb4   : > { %vm2391_vm1 = vcmp.ne.s16.totalorder %v2064_v60, 0 }
  0xb5   : > { %524 = vrot.lane.b32.xlu1 %v504_v59, %s1723_s14  ;;  %v885_v59 = vsel %vm2388_vm2, %v1862_v37, 0 }
  0xb7   : > { %873 = vrot.lane.b32.xlu0 %v852_v63, %s1723_s14 }
  0xb9   : > { %528 = vrot.lane.b32.xlu1 %v506_v62, %s1723_s14 }
  0xbb   : > { %526 = vrot.lane.b32.xlu0 %v505_v2, %s1723_s14 }
  0xbd   : > { %871 = vrot.lane.b32.xlu1 %v851_v0, %s1723_s14  ;;  %v551_v0 = vsel %vm2388_vm2, %v1834_v28, 0  ;;  %vm530_vm2 = vcmask 1031168  }
  0xfd   : > { %v517_v7 = vpop.permute.xlu0 %516  ;;  %v515_v9 = vpop.permute.xlu1 %514 }
  0xfe   : > { %v583_v10 = vsel %vm533_vm4, %v553_v8, %v517_v7  ;;  %v752_v13 = vsel %vm533_vm4, %v723_v12, %v517_v7  ;;  %v520_v47 = vsel %vm518_vm13, %v515_v9, %v517_v7 }
  0xff   : > { %596 = vrot.lane.b32.xlu1 %v583_v10, %s1725_s20  ;;  %v580_v57 = vsel %vm533_vm4, %v552_v54, %v520_v47  ;;  %v480_v54 = vsel %vm2389_vm9, %v1826_v24, 0  ;;  %vm611_vm9 = vcmask 195584  }
 0x101   : > { %v1984_v11 = vpop.permute.xlu0 %569  ;;  %v513_v14 = vpop.permute.xlu1 %512 }
 0x102   : > { %v519_v62 = vsel %vm518_vm13, %v513_v14, %v515_v9  ;;  %v722_v9 = vsel %vm2391_vm1, %v1826_v24, 0  ;;  %v721_v14 = vsel %vm2390_vm3, %v1834_v28, 0 }
 0x103   : > { %762 = vrot.lane.b32.xlu1 %v752_v13, %s1726_s21  ;;  %v578_v8 = vsel %vm533_vm4, %v551_v0, %v519_v62  ;;  %v750_v12 = vsel %vm533_vm4, %v722_v9, %v520_v47 }
 0x105   : > { %v1991_v15 = vpop.permute.xlu0 %573 }
 0x109   : > { %v1995_v17 = vpop.permute.xlu0 %739 }
 0x10b   : > { %v1993_v16 = vpop.permute.xlu1 %894 }
 0x10d   : > { %v1999_v21 = vpop.permute.xlu0 %743 }
 0x10f   : > { %v1997_v18 = vpop.permute.xlu1 %571 }
 0x111   : > { %v861_v25 = vpop.permute.xlu0 %860 }
 0x113   : > { %v2001_v23 = vpop.permute.xlu1 %898 }
 0x115   : > { %v859_v30 = vpop.permute.xlu0 %858 }
 0x116   : > { %v2012_v31 = vsel %vm518_vm13, %v859_v30, %v861_v25  ;;  %v748_v30 = vsel %vm533_vm4, %v721_v14, %v519_v62 }
 0x117   : > { %v2007_v27 = vpop.permute.xlu1 %741  ;;  %v2019_v36 = vsel %vm533_vm4, %v848_v34, %v2012_v31  ;;  %v903_v63 = vsel %vm533_vm4, %v885_v59, %v2012_v31  ;;  %v576_v34 = vsel %vm530_vm2, %v1997_v18, %v1991_v15  ;;  %v479_v59 = vsel %vm477_vm0, %v1834_v28, 0 }
 0x118   : > { %v536_v24 = vsel %vm533_vm4, %v479_v59, %v519_v62 }
 0x119   : > { %v2030_v41 = vpop.permute.xlu0 %896 }
 0x11a   : > { %v900_v28 = vsel %vm530_vm2, %v1993_v16, %v2030_v41 }
 0x11b   : > { %v2021_v38 = vpop.permute.xlu1 %862 }
 0x11c   : > { %v2028_v40 = vsel %vm518_vm13, %v861_v25, %v2021_v38  ;;  %v908_v44 = vsel %vm533_vm4, %v887_v39, %v2021_v38 }
 0x11d   : > { %921 = vrot.lane.b32.xlu0 %v908_v44, %s1725_s20  ;;  %v905_v48 = vsel %vm533_vm4, %v886_v46, %v2028_v40  ;;  %v2049_v50 = vsel %vm533_vm4, %v849_v49, %v2028_v40  ;;  %v2056_v56 = vpop.permute.xlu0 %587 }
 0x11e   : > { %919 = vrot.lane.b32.xlu1 %v905_v48, %s1725_s20 }
 0x11f   : > { %v2051_v52 = vpop.permute.xlu1 %1044 }
 0x121   : > { %594 = vrot.lane.b32.xlu0 %v580_v57, %s1725_s20  ;;  %v1047_v7 = vpop.permute.xlu0 %1046  ;;  %v540_v57 = vsel %vm533_vm4, %v480_v54, %v520_v47  ;;  %v2127_v47 = vld [vmem:[%s2375_s3] sm:$0xf] }
 0x122   : > { %917 = vrot.lane.b32.xlu1 %v903_v63, %s1725_s20 }
 0x123   : > { %v1049_v2 = vpop.permute.xlu1 %1048 }
 0x124   : > { %v1051_v16 = vsel %vm530_vm2, %v1047_v7, %v1049_v2 }
 0x125   : > { %592 = vrot.lane.b32.xlu0 %v578_v8, %s1725_s20  ;;  %v2083_v10 = vpop.permute.xlu0 %869 }
 0x126   : > { %768 = vrot.lane.b32.xlu1 %v1999_v21, %s1726_s21 }
 0x127   : > { %v525_v13 = vpop.permute.xlu1 %524 }
 0x129   : > { %760 = vrot.lane.b32.xlu0 %v750_v12, %s1726_s21  ;;  %v2092_v25 = vpop.permute.xlu0 %873 }
 0x12a   : > { %927 = vrot.lane.b32.xlu1 %v2001_v23, %s1725_s20 }
 0x12b   : > { %v529_v39 = vpop.permute.xlu1 %528 }
 0x12d   : > { %758 = vrot.lane.b32.xlu0 %v748_v30, %s1726_s21  ;;  %v527_v44 = vpop.permute.xlu0 %526 }
 0x12e   : > { %600 = vrot.lane.b32.xlu1 %v576_v34, %s1725_s20  ;;  %v532_v46 = vsel %vm530_vm2, %v527_v44, %v529_v39  ;;  %v531_v48 = vsel %vm530_vm2, %v525_v13, %v527_v44 }
 0x12f   : > { %1638 = vmatprep.subr.msk.bf16.mxu1 %vm533_vm4, %v532_v46  ;;  %v666_v49 = vsel %vm533_vm4, %v531_v48, 0 }
 0x130   : > { %684 = vmatpush1.bf16.msra.mxu1 %v666_v49 }
 0x131   : > { %602 = vrot.lane.b32.xlu0 %v1991_v15, %s1725_s20  ;;  %685 = vmatprep.subr.bf16.mxu1 %v540_v57  ;;  %v575_v15 = vsel %vm530_vm2, %v1984_v11, %v1997_v18  ;;  %v746_v11 = vsel %vm530_vm2, %v2007_v27, %v1999_v21  ;;  %v901_v18 = vsel %vm530_vm2, %v2030_v41, %v2001_v23 }
 0x132   : > { %753 = vrot.lane.b32.xlu1 %v1918_v53, %s1727_s22  ;;  %v745_v53 = vsel %vm530_vm2, %v1995_v17, %v2007_v27  ;;  %v1644_v17 = vcombine.low %v2127_v47, %v2127_v47  ;;  %v1050_v21 = vsel %vm530_vm2, %v2051_v52, %v1047_v7  ;;  %v1036_v27 = vsel %vm2391_vm1, %v1881_v43, 0  ;;  %v1147_v43 = vld [vmem:[%s2376_s4] sm:$0xff] }
 0x133   : > { %v1055_v41 = vsel %vm533_vm4, %v1036_v27, %v2028_v40  ;;  %v872_v40 = vpop.permute.xlu1 %871  ;;  %vm2392_vm1 = vcmask 785408  }
 0x134   : > { %686 = vmatpush1.bf16.msra.mxu1 %v536_v24 }
 0x135   : > { %598 = vrot.lane.b32.xlu0 %v575_v15, %s1725_s20 }
 0x136   : > { %764 = vrot.lane.b32.xlu1 %v745_v53, %s1726_s21 }
 0x137   : > { %1639 = vmatmul.mubr.msk.bf16.vlgmr.msra.gmra.mxu1 %vm611_vm9, %v1909_v51  ;;  %v1037_v51 = vsel %vm720_vm5, %v1878_v42, 0  ;;  %v1035_v42 = vsel %vm2390_vm3, %v1862_v37, 0  ;;  %vm2393_vm3 = vcmask 916480  }
 0x138   : > { %976 = vmatprep.mubr.bf16.mxu1 %v1715_v1  ;;  %v1057_v23 = vsel %vm533_vm4, %v1037_v51, %v2021_v38  ;;  %v1155_v38 = vld [vmem:[%s2377_s5] sm:$0xff]  ;;  %v1053_v52 = vsel %vm533_vm4, %v1035_v42, %v2012_v31 }
 0x139   : > { %766 = vrot.lane.b32.xlu0 %v746_v11, %s1726_s21 }
 0x13a   : > { %923 = vrot.lane.b32.xlu1 %v900_v28, %s1725_s20 }
 0x13d   : > { %925 = vrot.lane.b32.xlu0 %v901_v18, %s1725_s20 }
 0x13e   : > { %912 = vrot.lane.b32.xlu1 %v1644_v17, %s1724_s19 }
 0x141   : > { %1073 = vrot.lane.b32.xlu0 %v1049_v2, %s1726_s21 }
 0x142   : > { %1071 = vrot.lane.b32.xlu1 %v1051_v16, %s1726_s21 }
 0x145   : > { %1069 = vrot.lane.b32.xlu0 %v1050_v21, %s1726_s21 }
 0x146   : > { %1067 = vrot.lane.b32.xlu1 %v1057_v23, %s1726_s21 }
 0x149   : > { %1065 = vrot.lane.b32.xlu0 %v1055_v41, %s1726_s21 }
 0x14a   : > { %1058 = vrot.lane.b32.xlu1 %v1644_v17, %s1727_s22 }
 0x14d   : > { %1063 = vrot.lane.b32.xlu0 %v1053_v52, %s1726_s21  ;;  %v875_v52 = vsel %vm530_vm2, %v2083_v10, %v872_v40 }
 0x14e   : > { %1158 = vperm.xlu1 %1691, %v1155_v38  }
 0x151   : > { %1150 = vperm.xlu0 %1690, %v1147_v43   ;;  %v876_v43 = vsel %vm530_vm2, %v872_v40, %v2092_v25 }
 0x171   : > { %v597_v62 = vpop.permute.xlu1 %596 }
 0x175   : > { %v763_v63 = vpop.permute.xlu1 %762 }
 0x18f   : > { %v922_v0 = vpop.permute.xlu0 %921 }
 0x190   : > { %v920_v37 = vpop.permute.xlu1 %919 }
 0x191   : > { %v930_v23 = vsel %vm2393_vm3, %v920_v37, %v922_v0  ;;  %v989_v0 = vsel %vm533_vm4, %v875_v52, 0 }
 0x193   : > { %v595_v2 = vpop.permute.xlu0 %594 }
 0x194   : > { %v918_v7 = vpop.permute.xlu1 %917  ;;  %v606_v54 = vsel %vm2393_vm3, %v595_v2, %v597_v62 }
 0x195   : > { %v929_v42 = vsel %vm2393_vm3, %v918_v7, %v920_v37 }
 0x197   : > { %v593_v8 = vpop.permute.xlu0 %592 }
 0x198   : > { %v769_v9 = vpop.permute.xlu1 %768  ;;  %v605_v53 = vsel %vm2393_vm3, %v593_v8, %v595_v2 }
 0x19b   : > { %v761_v12 = vpop.permute.xlu0 %760 }
 0x19c   : > { %v928_v13 = vpop.permute.xlu1 %927  ;;  %v772_v51 = vsel %vm2392_vm1, %v761_v12, %v763_v63 }
 0x19f   : > { %v759_v31 = vpop.permute.xlu0 %758 }
 0x1a0   : > { %v601_v14 = vpop.permute.xlu1 %600  ;;  %v771_v38 = vsel %vm2392_vm1, %v759_v31, %v761_v12 }
 0x1a3   : > { %v603_v30 = vpop.permute.xlu0 %602 }
 0x1a4   : > { %v754_v34 = vpop.permute.xlu1 %753  ;;  %v608_v39 = vsel %vm2393_vm3, %v601_v14, %v603_v30 }
 0x1a5   : > { %1636 = vmatprep.subr.msk.bf16.mxu0 %vm533_vm4, %v608_v39 }
 0x1a7   : > { %v599_v44 = vpop.permute.xlu0 %598 }
 0x1a8   : > { %v765_v46 = vpop.permute.xlu1 %764  ;;  %v607_v48 = vsel %vm2393_vm3, %v599_v44, %v601_v14 }
 0x1a9   : > { %v616_v49 = vsel %vm533_vm4, %v607_v48, 0 }
 0x1aa   : > { %634 = vmatpush1.bf16.msra.mxu0 %v616_v49 }
 0x1ab   : > { %v767_v57 = vpop.permute.xlu0 %766  ;;  %635 = vmatprep.subr.bf16.mxu0 %v606_v54 }
 0x1ac   : > { %v924_v15 = vpop.permute.xlu1 %923  ;;  %v773_v59 = vsel %vm2392_vm1, %v765_v46, %v767_v57  ;;  %v774_v24 = vsel %vm2392_vm1, %v767_v57, %v769_v9 }
 0x1ad   : > { %v781_v16 = vsel %vm533_vm4, %v773_v59, 0 }
 0x1ae   : > { %636 = vmatpush1.bf16.msra.mxu0 %v605_v53 }
 0x1af   : > { %v926_v11 = vpop.permute.xlu0 %925  ;;  %1640 = vmatprep.subr.msk.bf16.mxu0 %vm533_vm4, %v774_v24 }
 0x1b0   : > { %v931_v28 = vsel %vm2393_vm3, %v924_v15, %v926_v11  ;;  %v932_v17 = vsel %vm2393_vm3, %v926_v11, %v928_v13  ;;  %v913_v18 = vpop.permute.xlu1 %912 }
 0x1b1   : > { %v939_v21 = vsel %vm533_vm4, %v931_v28, 0  ;;  %1637 = vmatmul.mubr.msk.bf16.vlgmr.msra.gmra.mxu0 %vm611_vm9, %v2056_v56  ;;  %1645 = vmatprep.subr.msk.bf16.mxu1 %vm533_vm4, %v932_v17 }
 0x1b2   : > { %799 = vmatpush1.bf16.msra.mxu0 %v781_v16  ;;  %957 = vmatpush1.bf16.msra.mxu1 %v939_v21 }
 0x1b3   : > { %v1074_v27 = vpop.permute.xlu0 %1073  ;;  %800 = vmatprep.subr.bf16.mxu0 %v772_v51  ;;  %958 = vmatprep.subr.bf16.mxu1 %v930_v23 }
 0x1b4   : > { %v1072_v41 = vpop.permute.xlu1 %1071  ;;  %818 = vmatprep.mubr.bf16.mxu0 %v1715_v1 }
 0x1b5   : > { %v1078_v56 = vsel %vm2392_vm1, %v1072_v41, %v1074_v27 }
 0x1b6   : > { %801 = vmatpush1.bf16.msra.mxu0 %v771_v38  ;;  %959 = vmatpush1.bf16.msra.mxu1 %v929_v42 }
 0x1b7   : > { %v1070_v62 = vpop.permute.xlu0 %1069  ;;  %1647 = vmatprep.subr.msk.bf16.mxu0 %vm533_vm4, %v876_v43  ;;  %1649 = vmatprep.subr.msk.bf16.mxu1 %vm533_vm4, %v1078_v56 }
 0x1b8   : > { %v1077_v63 = vsel %vm2392_vm1, %v1070_v62, %v1072_v41  ;;  %v1068_v10 = vpop.permute.xlu1 %1067 }
 0x1b9   : > { %v1085_v37 = vsel %vm533_vm4, %v1077_v63, 0  ;;  %1641 = vmatmul.mubr.msk.bf16.vlgmr.msra.gmra.mxu0 %vm611_vm9, %v754_v34  ;;  %1646 = vmatmul.mubr.msk.bf16.vlgmr.msra.gmra.mxu1 %vm611_vm9, %v913_v18 }
 0x1ba   : > { %1007 = vmatpush1.bf16.msra.mxu0 %v989_v0  ;;  %1103 = vmatpush1.bf16.msra.mxu1 %v1085_v37 }
 0x1bb   : > { %v1066_v25 = vpop.permute.xlu0 %1065  ;;  %1008 = vmatprep.subr.bf16.mxu0 %v2049_v50  ;;  %1026 = vmatprep.mubr.bf16.mxu0 %v1715_v1 }
 0x1bc   : > { %v1076_v40 = vsel %vm2392_vm1, %v1066_v25, %v1068_v10  ;;  %1122 = vmatprep.mubr.bf16.mxu1 %v1715_v1  ;;  %v1059_v8 = vpop.permute.xlu1 %1058 }
 0x1bd   : > { %1104 = vmatprep.subr.bf16.mxu1 %v1076_v40 }
 0x1be   : > { %1009 = vmatpush1.bf16.msra.mxu0 %v2019_v36 }
 0x1bf   : > { %v1064_v2 = vpop.permute.xlu0 %1063 }
 0x1c0   : > { %v1075_v7 = vsel %vm2392_vm1, %v1064_v2, %v1066_v25 }
 0x1c1   : > { %1648 = vmatmul.mubr.msk.bf16.vlgmr.msra.gmra.mxu0 %vm611_vm9, %v2127_v47  ;;  %1105 = vmatpush1.bf16.msra.mxu1 %v1075_v7 }
 0x1c2   : > { %1308 = vmatprep.mubr.bf16.mxu0 %v1715_v1 }
 0x1c4   : > { %1650 = vmatmul.mubr.msk.bf16.vlgmr.msra.gmra.mxu1 %vm611_vm9, %v1059_v8 }
 0x1c5   : > { %1358 = vmatprep.mubr.bf16.mxu1 %v1715_v1 }
 0x1c9   : > { %v1159_v7 = vpop.permute.xlu1 %1158 }
 0x1cc   : > { %v1151_v37 = vpop.permute.xlu0 %1150 }
 0x1f7   : > { %v705_v50 = vpop.f32.mrf.mxu1 }
 0x1f9   : > { %v707_v9 = vpop.f32.mrf.mxu1 }
 0x1fb   : > { %v709_v12 = vpop.f32.mrf.mxu1 }
 0x1fd   : > { %v710_v13 = vpop.f32.mrf.mxu1 }
 0x271   : > { %v655_v31 = vpop.f32.mrf.mxu0 }
 0x272   : > { %v706_v53 = vadd.f32 %v705_v50, %v655_v31 }
 0x273   : > { %v657_v36 = vpop.f32.mrf.mxu0 }
 0x274   : > { %v708_v28 = vadd.f32 %v707_v9, %v657_v36 }
 0x275   : > { %v659_v14 = vpop.f32.mrf.mxu0 }
 0x277   : > { %v660_v30 = vpop.f32.mrf.mxu0 }
 0x279   : > { %v820_v34 = vpop.f32.mrf.mxu0  ;;  %v978_v39 = vpop.f32.mrf.mxu1 }
 0x27a   : > { %v827_v17 = vadd.f32 %v820_v34, %v706_v53 }
 0x27b   : > { %v822_v44 = vpop.f32.mrf.mxu0  ;;  %v980_v47 = vpop.f32.mrf.mxu1 }
 0x27c   : > { %v828_v51 = vadd.f32 %v822_v44, %v708_v28 }
 0x27d   : > { %v824_v46 = vpop.f32.mrf.mxu0  ;;  %v982_v48 = vpop.f32.mrf.mxu1 }
 0x27f   : > { %v825_v49 = vpop.f32.mrf.mxu0  ;;  %v983_v54 = vpop.f32.mrf.mxu1 }
 0x281   : > { %v1028_v57 = vpop.f32.mrf.mxu0 }
 0x282   : > { %v1029_v15 = vadd.f32 %v1028_v57, %v978_v39 }
 0x283   : > { %v1030_v59 = vpop.f32.mrf.mxu0 }
 0x284   : > { %v1031_v24 = vadd.f32 %v1030_v59, %v980_v47  ;;  %v1124_v11 = vpop.f32.mrf.mxu1 }
 0x285   : > { %v1131_v18 = vadd.f32 %v1124_v11, %v1029_v15  ;;  %v1032_v16 = vpop.f32.mrf.mxu0 }
 0x286   : > { %v1126_v21 = vpop.f32.mrf.mxu1 }
 0x287   : > { %v1133_v23 = vadd.f32 %v1131_v18, %v827_v17  ;;  %v1132_v27 = vadd.f32 %v1126_v21, %v1031_v24  ;;  %v1033_v41 = vpop.f32.mrf.mxu0  ;;  %v1165_v21 = vld [vmem:[%s2378_s6] sm:$0xf] }
 0x288   : > { %v1128_v42 = vpop.f32.mrf.mxu1 }
 0x289   : > { %v1137_v38 = vmin.f32 %v1133_v23, 0.0  ;;  %v1134_v56 = vadd.f32 %v1132_v27, %v828_v51  ;;  %vm1135_vm1 = vcmp.gt.f32.partialorder %v1133_v23, 0.0 }
 0x28a   : > { %v1129_v52 = vpop.f32.mrf.mxu1 }
 0x28b   : > { %v1139_v43 = vmul.f32 1.442695, %v1137_v38  ;;  %v1138_v62 = vmin.f32 %v1134_v56, 0.0  ;;  %vm1136_vm3 = vcmp.gt.f32.partialorder %v1134_v56, 0.0  ;;  %v1653_v52 = vcombine.low %v1165_v21, %v1165_v21 }
 0x28d   : > { %1699 = vpow2.f32 %v1139_v43  ;;  %v1141_v63 = vmul.f32 1.442695, %v1138_v62 }
 0x28f   : > { %1701 = vpow2.f32 %v1141_v63 }
 0x29a   : > { %v1700_v0 = vpop.eup %1699 }
 0x29b   : > { %v1651_v10 = vadd.f32 -1.0, %v1700_v0 }
 0x29c   : > { %v1702_v25 = vpop.eup %1701 }
 0x29d   : > { %v1652_v40 = vadd.f32 -1.0, %v1702_v25  ;;  %v1145_v2 = vsel %vm1135_vm1, %v1133_v23, %v1651_v10  ;;  %vm2402_vm1 = vcmask 916480  }
 0x29e   : > { %v1153_v8 = vmul.f32 %v1151_v37, %v1145_v2 }
 0x29f   : > { %v1146_v50 = vsel %vm1136_vm3, %v1134_v56, %v1652_v40 }
 0x2a0   : > { %v1154_v9 = vmul.f32 %v1151_v37, %v1146_v50  ;;  %v1161_v12 = vadd.f32 %v1159_v7, %v1153_v8  ;;  %v1485_v8 = vld [vmem:[%s2380_s8] sm:$0xff] }
 0x2a2   : > { %v1162_v13 = vadd.f32 %v1159_v7, %v1154_v9  ;;  %v1163_v31 = vpack.c.bf16 %v1161_v12, %v1161_v12  ;;  %v1496_v12 = vld [vmem:[%s2382_s10] sm:$0xff] }
 0x2a4   : > { %v1164_v36 = vpack.c.bf16 %v1162_v13, %v1162_v13  ;;  %1168 = vrot.lane.b32.xlu1 %v1163_v31, %s1716_s23 }
 0x2a6   : > { %1170 = vrot.lane.b32.xlu0 %v1164_v36, %s1716_s23 }
 0x316   : > { %v1169_v14 = vpop.permute.xlu1 %1168 }
 0x317   : > { %v2225_v30 = vsel %vm452_vm6, 0, %v1169_v14 }
 0x318   : > { %v1171_v34 = vpop.permute.xlu0 %1170  ;;  %v1220_v39 = vsel %vm560_vm7, %v2225_v30, 0  ;;  %v1187_v54 = vrot.slane %v2225_v30, 4  ;;  %v1370_v35 = vsel %vm730_vm10, %v2225_v30, 0  ;;  %v1182_v15 = vsel %vm501_vm15, %v2225_v30, 0 }
 0x319   : > { %v2231_v44 = vsel %vm452_vm6, %v1169_v14, %v1171_v34  ;;  %v2234_v47 = vsel %vm452_vm6, %v1171_v34, 0  ;;  %1226 = vrot.lane.b32.xlu1 %v1220_v39, %s1723_s14  ;;  %vm2394_vm6 = vcmp.ne.s16.totalorder %v1949_v61, 0  ;;  %vm2395_vm7 = vcmp.ne.s16.totalorder %v1936_v58, 0 }
 0x31a   : > { %v1221_v46 = vsel %vm561_vm11, %v2231_v44, 0  ;;  %v1222_v48 = vsel %vm562_vm8, %v2234_v47, 0  ;;  %v1188_v22 = vrot.slane %v2231_v44, 4  ;;  %v1189_v49 = vrot.slane %v2234_v47, 4 }
 0x31b   : > { %1228 = vrot.lane.b32.xlu0 %v1221_v46, %s1723_s14  ;;  %v1371_v29 = vsel %vm731_vm14, %v2231_v44, 0  ;;  %v1372_v57 = vsel %vm732_vm12, %v2234_v47, 0  ;;  %v1183_v32 = vsel %vm2394_vm6, %v2231_v44, 0  ;;  %v1184_v45 = vsel %vm2395_vm7, %v2234_v47, 0 }
 0x31c   : > { %vm2396_vm8 = vcmp.ne.s16.totalorder %v1969_v3, 0  ;;  %vm2397_vm10 = vcmp.ne.s16.totalorder %v1818_v20, 0  ;;  %vm2398_vm11 = vcmp.ne.s16.totalorder %v2005_v26, 0  ;;  %v1180_v25 = vsel %vm477_vm0, %v2225_v30, 0 }
 0x31d   : > { %1230 = vrot.lane.b32.xlu1 %v1222_v48, %s1723_s14  ;;  %v1219_v27 = vsel %vm2396_vm8, %v2234_v47, 0  ;;  %v1181_v63 = vsel %vm2397_vm10, %v2231_v44, 0  ;;  %v1218_v10 = vsel %vm2398_vm11, %v2231_v44, 0  ;;  %v1369_v2 = vsel %vm720_vm5, %v2234_v47, 0  ;;  %vm2404_vm5 = vmmov %vm2402_vm1 }
 0x31e   : > { %vm2399_vm12 = vcmp.ne.s16.totalorder %v1971_v4, 0  ;;  %vm2400_vm14 = vcmp.ne.s16.totalorder %v2064_v60, 0  ;;  %vm2401_vm15 = vcmp.ne.s16.totalorder %v1976_v6, 0  ;;  %v1477_v60 = vld [vmem:[%s2379_s7] sm:$0xff]  ;;  %vm2406_vm0 = vcmask 785408  }
 0x31f   : > { %1192 = vrot.lane.b32.xlu0 %v1188_v22, %s1722_s13  ;;  %v1217_v19 = vsel %vm2399_vm12, %v2225_v30, 0  ;;  %v1368_v5 = vsel %vm2400_vm14, %v2231_v44, 0  ;;  %v1367_v50 = vsel %vm2401_vm15, %v2225_v30, 0  ;;  %vm2407_vm3 = vmmov %vm2406_vm0  ;;  %vm1502_vm10 = vcmask 64512  }
 0x320   : > { %vm2408_vm6 = vmmov %vm2406_vm0 }
 0x321   : > { %1194 = vrot.lane.b32.xlu1 %v1189_v49, %s1722_s13  ;;  %vm2409_vm7 = vmmov %vm2406_vm0 }
 0x323   : > { %1190 = vrot.lane.b32.xlu0 %v1187_v54, %s1722_s13 }
 0x325   : > { %1376 = vrot.lane.b32.xlu1 %v1370_v35, %s1723_s14 }
 0x327   : > { %1378 = vrot.lane.b32.xlu0 %v1371_v29, %s1723_s14 }
 0x329   : > { %1380 = vrot.lane.b32.xlu1 %v1372_v57, %s1723_s14 }
 0x32b   : > { %1201 = vrot.lane.b32.xlu0 %v1182_v15, %s1723_s14 }
 0x32d   : > { %1203 = vrot.lane.b32.xlu1 %v1183_v32, %s1723_s14 }
 0x32f   : > { %1205 = vrot.lane.b32.xlu0 %v1184_v45, %s1723_s14 }
 0x38b   : > { %v1227_v33 = vpop.permute.xlu1 %1226 }
 0x38d   : > { %v1229_v53 = vpop.permute.xlu0 %1228 }
 0x38e   : > { %v1232_v11 = vsel %vm530_vm2, %v1227_v33, %v1229_v53 }
 0x38f   : > { %v1231_v59 = vpop.permute.xlu1 %1230 }
 0x390   : > { %1259 = vrot.lane.b32.xlu0 %v1231_v59, %s1725_s20  ;;  %v1233_v23 = vsel %vm530_vm2, %v1229_v53, %v1231_v59 }
 0x391   : > { %v1193_v55 = vpop.permute.xlu0 %1192 }
 0x393   : > { %v1195_v24 = vpop.permute.xlu1 %1194 }
 0x394   : > { %1255 = vrot.lane.b32.xlu0 %v1232_v11, %s1725_s20  ;;  %v1240_v42 = vsel %vm533_vm4, %v1219_v27, %v1195_v24  ;;  %v1197_v38 = vsel %vm518_vm13, %v1193_v55, %v1195_v24  ;;  %v1389_v7 = vsel %vm533_vm4, %v1369_v2, %v1195_v24 }
 0x395   : > { %v1191_v61 = vpop.permute.xlu0 %1190  ;;  %v1215_v37 = vsel %vm533_vm4, %v1181_v63, %v1197_v38  ;;  %v1237_v20 = vsel %vm533_vm4, %v1218_v10, %v1197_v38  ;;  %v1387_v4 = vsel %vm533_vm4, %v1368_v5, %v1197_v38 }
 0x396   : > { %v1196_v0 = vsel %vm518_vm13, %v1191_v61, %v1193_v55  ;;  %vm2405_vm13 = vmmov %vm2402_vm1 }
 0x397   : > { %v1377_v28 = vpop.permute.xlu1 %1376  ;;  %v1211_v40 = vsel %vm533_vm4, %v1180_v25, %v1196_v0  ;;  %v1235_v26 = vsel %vm533_vm4, %v1217_v19, %v1196_v0  ;;  %v1385_v9 = vsel %vm533_vm4, %v1367_v50, %v1196_v0 }
 0x399   : > { %v1379_v17 = vpop.permute.xlu0 %1378 }
 0x39a   : > { %v1382_v3 = vsel %vm530_vm2, %v1377_v28, %v1379_v17 }
 0x39b   : > { %v1381_v18 = vpop.permute.xlu1 %1380 }
 0x39c   : > { %1405 = vrot.lane.b32.xlu1 %v1381_v18, %s1726_s21  ;;  %v1383_v58 = vsel %vm530_vm2, %v1379_v17, %v1381_v18 }
 0x39d   : > { %1403 = vrot.lane.b32.xlu0 %v1383_v58, %s1726_s21  ;;  %v1202_v16 = vpop.permute.xlu0 %1201 }
 0x39f   : > { %v1204_v51 = vpop.permute.xlu1 %1203 }
 0x3a0   : > { %v1207_v41 = vsel %vm530_vm2, %v1202_v16, %v1204_v51  ;;  %1257 = vrot.lane.b32.xlu1 %v1233_v23, %s1725_s20 }
 0x3a1   : > { %1253 = vrot.lane.b32.xlu0 %v1240_v42, %s1725_s20  ;;  %v1206_v56 = vpop.permute.xlu0 %1205  ;;  %v1321_v62 = vsel %vm533_vm4, %v1207_v41, 0 }
 0x3a2   : > { %v1208_v43 = vsel %vm530_vm2, %v1204_v51, %v1206_v56  ;;  %vm2403_vm2 = vmmov %vm2402_vm1 }
 0x3a3   : > { %1656 = vmatprep.subr.msk.bf16.mxu1 %vm533_vm4, %v1208_v43 }
 0x3a4   : > { %1401 = vrot.lane.b32.xlu1 %v1382_v3, %s1726_s21  ;;  %1339 = vmatpush1.bf16.msra.mxu1 %v1321_v62 }
 0x3a5   : > { %1244 = vrot.lane.b32.xlu0 %v1653_v52, %s1724_s19  ;;  %1340 = vmatprep.subr.bf16.mxu1 %v1215_v37 }
 0x3a8   : > { %1251 = vrot.lane.b32.xlu1 %v1237_v20, %s1725_s20  ;;  %1341 = vmatpush1.bf16.msra.mxu1 %v1211_v40 }
 0x3a9   : > { %1399 = vrot.lane.b32.xlu0 %v1389_v7, %s1726_s21 }
 0x3ab   : > { %1657 = vmatmul.mubr.msk.bf16.vlgmr.msra.gmra.mxu1 %vm611_vm9, %v1165_v21 }
 0x3ac   : > { %1249 = vrot.lane.b32.xlu1 %v1235_v26, %s1725_s20  ;;  %1544 = vmatprep.mubr.bf16.mxu1 %v1715_v1 }
 0x3ad   : > { %1390 = vrot.lane.b32.xlu0 %v1653_v52, %s1727_s22  ;;  %s1668_s22 = sshll.u32 %s2411_s18, 4 }
 0x3ae   : > { %s406_s26 = scalar_lea.vmem %s2383_s11, %s1668_s22 }
 0x3b0   : > { %1397 = vrot.lane.b32.xlu1 %v1387_v4, %s1726_s21  ;;  %v1493_v4 = vld [vmem:[%s2381_s9] sm:$0xf] }
 0x3b1   : > { %1488 = vperm.xlu0 %1690, %v1485_v8  }
 0x3b4   : > { %1395 = vrot.lane.b32.xlu1 %v1385_v9, %s1726_s21 }
 0x3b8   : > { %1480 = vperm.xlu1 %1691, %v1477_v60  }
 0x3bc   : > { %1499 = vperm.xlu1 %1691, %v1496_v12  }
 0x402   : > { %v1260_v13 = vpop.permute.xlu0 %1259 }
 0x406   : > { %v1256_v31 = vpop.permute.xlu0 %1255 }
 0x40e   : > { %v1406_v36 = vpop.permute.xlu1 %1405 }
 0x40f   : > { %v1404_v14 = vpop.permute.xlu0 %1403 }
 0x410   : > { %v1410_v35 = vsel %vm2406_vm0, %v1404_v14, %v1406_v36 }
 0x412   : > { %v1258_v6 = vpop.permute.xlu1 %1257 }
 0x413   : > { %v1263_v30 = vsel %vm2402_vm1, %v1256_v31, %v1258_v6  ;;  %v1264_v34 = vsel %vm2403_vm2, %v1258_v6, %v1260_v13  ;;  %v1254_v44 = vpop.permute.xlu0 %1253 }
 0x414   : > { %v1271_v39 = vsel %vm533_vm4, %v1263_v30, 0  ;;  %1654 = vmatprep.subr.msk.bf16.mxu0 %vm533_vm4, %v1264_v34 }
 0x415   : > { %1289 = vmatpush1.bf16.msra.mxu0 %v1271_v39 }
 0x416   : > { %v1402_v47 = vpop.permute.xlu1 %1401 }
 0x417   : > { %v1245_v22 = vpop.permute.xlu0 %1244  ;;  %v1409_v29 = vsel %vm2407_vm3, %v1402_v47, %v1404_v14 }
 0x418   : > { %v1417_v32 = vsel %vm533_vm4, %v1409_v29, 0 }
 0x41a   : > { %v1252_v46 = vpop.permute.xlu1 %1251 }
 0x41b   : > { %v1262_v48 = vsel %vm2404_vm5, %v1252_v46, %v1254_v44  ;;  %v1400_v57 = vpop.permute.xlu0 %1399 }
 0x41c   : > { %1290 = vmatprep.subr.bf16.mxu0 %v1262_v48 }
 0x41e   : > { %v1250_v49 = vpop.permute.xlu1 %1249 }
 0x41f   : > { %v1261_v54 = vsel %vm2405_vm13, %v1250_v49, %v1252_v46  ;;  %v1391_v59 = vpop.permute.xlu0 %1390 }
 0x420   : > { %1291 = vmatpush1.bf16.msra.mxu0 %v1261_v54 }
 0x421   : > { %1658 = vmatprep.subr.msk.bf16.mxu0 %vm533_vm4, %v1410_v35 }
 0x422   : > { %v1398_v15 = vpop.permute.xlu1 %1397 }
 0x423   : > { %1655 = vmatmul.mubr.msk.bf16.vlgmr.msra.gmra.mxu0 %vm611_vm9, %v1245_v22  ;;  %v1408_v45 = vsel %vm2408_vm6, %v1398_v15, %v1400_v57 }
 0x424   : > { %1435 = vmatpush1.bf16.msra.mxu0 %v1417_v32  ;;  %1454 = vmatprep.mubr.bf16.mxu0 %v1715_v1 }
 0x425   : > { %1436 = vmatprep.subr.bf16.mxu0 %v1408_v45 }
 0x426   : > { %v1396_v33 = vpop.permute.xlu1 %1395 }
 0x427   : > { %v1407_v53 = vsel %vm2409_vm7, %v1396_v33, %v1398_v15 }
 0x428   : > { %1437 = vmatpush1.bf16.msra.mxu0 %v1407_v53 }
 0x42b   : > { %1659 = vmatmul.mubr.msk.bf16.vlgmr.msra.gmra.mxu0 %vm611_vm9, %v1391_v59 }
 0x42c   : > { %v1489_v20 = vpop.permute.xlu0 %1488 }
 0x433   : > { %v1481_v0 = vpop.permute.xlu1 %1480 }
 0x437   : > { %v1500_v50 = vpop.permute.xlu1 %1499 }
 0x46b   : > { %v1360_v55 = vpop.f32.mrf.mxu1 }
 0x46d   : > { %v1362_v24 = vpop.f32.mrf.mxu1 }
 0x46f   : > { %v1364_v11 = vpop.f32.mrf.mxu1 }
 0x471   : > { %v1365_v61 = vpop.f32.mrf.mxu1 }
 0x4e3   : > { %v1310_v28 = vpop.f32.mrf.mxu0 }
 0x4e4   : > { %v1361_v16 = vadd.f32 %v1360_v55, %v1310_v28 }
 0x4e5   : > { %v1312_v17 = vpop.f32.mrf.mxu0 }
 0x4e6   : > { %v1363_v51 = vadd.f32 %v1362_v24, %v1312_v17 }
 0x4e7   : > { %v1314_v18 = vpop.f32.mrf.mxu0 }
 0x4e9   : > { %v1315_v58 = vpop.f32.mrf.mxu0 }
 0x4eb   : > { %v1456_v21 = vpop.f32.mrf.mxu0 }
 0x4ec   : > { %v1463_v1 = vadd.f32 %v1456_v21, %v1361_v16 }
 0x4ed   : > { %v1458_v23 = vpop.f32.mrf.mxu0 }
 0x4ee   : > { %v1467_v27 = vmin.f32 %v1463_v1, 0.0  ;;  %v1464_v41 = vadd.f32 %v1458_v23, %v1363_v51  ;;  %vm1465_vm9 = vcmp.gt.f32.partialorder %v1463_v1, 0.0 }
 0x4ef   : > { %v1460_v42 = vpop.f32.mrf.mxu0 }
 0x4f0   : > { %v1469_v38 = vmul.f32 1.442695, %v1467_v27  ;;  %v1468_v56 = vmin.f32 %v1464_v41, 0.0  ;;  %vm1466_vm8 = vcmp.gt.f32.partialorder %v1464_v41, 0.0 }
 0x4f1   : > { %v1461_v52 = vpop.f32.mrf.mxu0 }
 0x4f2   : > { %1703 = vpow2.f32 %v1469_v38  ;;  %v1471_v43 = vmul.f32 1.442695, %v1468_v56 }
 0x4f4   : > { %1705 = vpow2.f32 %v1471_v43 }
 0x4ff   : > { %v1704_v62 = vpop.eup %1703 }
 0x500   : > { %v1660_v3 = vadd.f32 -1.0, %v1704_v62 }
 0x501   : > { %v1706_v63 = vpop.eup %1705 }
 0x502   : > { %v1475_v37 = vsel %vm1465_vm9, %v1463_v1, %v1660_v3  ;;  %v1661_v10 = vadd.f32 -1.0, %v1706_v63 }
 0x503   : > { %v1483_v25 = vmul.f32 %v1481_v0, %v1475_v37 }
 0x504   : > { %v1476_v40 = vsel %vm1466_vm8, %v1464_v41, %v1661_v10 }
 0x505   : > { %v1484_v2 = vmul.f32 %v1481_v0, %v1476_v40  ;;  %v1491_v7 = vadd.f32 %v1489_v20, %v1483_v25 }
 0x507   : > { %v1492_v19 = vadd.f32 %v1489_v20, %v1484_v2  ;;  %v1494_v26 = vpack.c.bf16 %v1491_v7, %v1491_v7 }
 0x509   : > { %v1495_v5 = vpack.c.bf16 %v1492_v19, %v1492_v19  ;;  %v1507_v8 = vsel %vm533_vm4, %v1494_v26, 0 }
 0x50b   : > { %1662 = vmatprep.subr.msk.bf16.mxu1 %vm533_vm4, %v1495_v5 }
 0x50c   : > { %1527 = vmatpush1.bf16.msra.mxu1 %v1507_v8 }
 0x50f   : > { %1663 = vmatmul.mubr.msk.bf16.vlgmr.msra.gmra.mxu1 %vm1502_vm10, %v1493_v4 }
 0x5cf   : > { %v1546_v9 = vpop.f32.mrf.mxu1 }
 0x5d0   : > { %v1547_v60 = vadd.f32 %v1546_v9, %v1500_v50 }
 0x5d1   : > { %v1548_v12 = vpop.f32.mrf.mxu1 }
 0x5d2   : > { %1553 = vst [vmem:[%s406_s26] sm:$0xff] %v1547_v60  ;;  %v1549_v13 = vadd.f32 %v1548_v12, %v1500_v50 }
 0x5d3   : > { %v1550_v31 = vpop.f32.mrf.mxu1 }
 0x5d4   : > { %1554 = vst [vmem:[%s406_s26 + $0x8] sm:$0xff] %v1549_v13 }
 0x5d5   : > { %v1551_v36 = vpop.f32.mrf.mxu1 }
 0x5d6 PF: > { %s21_s17 = sadd.s32 1, %s1713_s17  }
 0x5d7   : > { %p18_p4 = scmp.ge.s32.totalorder %s21_s17, 4  }
 0x5d9   :  { %20 = sbr.rel (!%p18_p4) target bundleno = 1 (0x1), region = 97 }

</bundles_post_ra>
